<compile_context>
chip_gen: v7x
topology: tpu7x:2x2x1
jax: 0.10.0
libtpu: 0.0.40
codegen_flags: <defaults>
</compile_context>

<pallas_src>
import functools
import math

import numpy as np
import jax
import jax.numpy as jnp
from jax.experimental import pallas as pl
from jax.experimental.pallas import tpu as pltpu


def _round_up(x, m):
    return (x + m - 1) // m * m


# ----------------------------- Pallas kernel --------------------------------
def _mixconv_kernel(x_hbm, w_ref, b_ref, o_ref, xbuf, sem, *,
                    shifts, lane, l_tile, tile_stride, cout_pad):
    """One (image n, row-tile t) step.

    x_hbm : (N, cin_pad, flat_len)   bf16, stays in HBM (memory_space=pl.ANY)
    w_ref : (KK, cout_pad, cin_pad)  bf16, grid-invariant, one tap per leading idx
    b_ref : (cout_pad, 1)            f32
    o_ref : (cout_pad, lane)         output block (lane = tile_h*Wp, % 128 == 0)
    xbuf  : (2, cin_pad, l_tile)     bf16 VMEM double buffer (manual DMA)
    sem   : (2,)                     DMA semaphores
    """
    n = pl.program_id(0)
    t = pl.program_id(1)
    num_t = pl.num_programs(1)

    def start_fetch(tile_idx, slot):
        off = pl.multiple_of(tile_idx * tile_stride, 128)
        pltpu.make_async_copy(
            x_hbm.at[n, :, pl.ds(off, l_tile)], xbuf.at[slot], sem.at[slot]
        ).start()

    # Prime the double buffer at the first row tile of every image.  The row
    # tile axis is "arbitrary" (sequential on one core), so the chain resets
    # per image and stays correct if the "parallel" batch axis is split across
    # TensorCores (v7x megacore).
    @pl.when(t == 0)
    def _():
        start_fetch(t, 0)

    # Prefetch the next row tile of this image while computing the current one.
    @pl.when(t + 1 < num_t)
    def _():
        start_fetch(jnp.minimum(t + 1, num_t - 1), (t + 1) % 2)

    slot = t % 2
    pltpu.make_async_copy(
        x_hbm.at[n, :, pl.ds(0, l_tile)], xbuf.at[slot], sem.at[slot]).wait()

    # Per-tap matmul accumulation straight off lane-shifted views of the slab:
    # no f32 im2col patch, no VMEM scatter traffic.  bf16 operands with f32
    # accumulation; bias is folded into the epilogue store.
    # TODO(synk): for large Cout (>=128) split into per-branch matmuls so the
    # smaller kernels don't spend MXU FLOPs on their zero-padded outer taps.
    xb = xbuf.at[slot]
    acc = jnp.zeros((cout_pad, lane), jnp.float32)
    for i, s in enumerate(shifts):
        acc = acc + jnp.dot(w_ref[i], xb[:, s:s + lane],
                            preferred_element_type=jnp.float32)
    o_ref[...] = (acc + b_ref[...]).astype(o_ref.dtype)


# --------------------------- tiling / weights --------------------------------
def _tile_config(tile_h, W, P):
    # Wp multiple of 128 for wide images -> all kh*Wp shift components are
    # lane-aligned (only k_max distinct lane rotations); otherwise just enough
    # padding so tile_h * Wp is a multiple of 128 (lane-dense output stores).
    gran = 128 if (W + 2 * P) >= 256 else 128 // math.gcd(tile_h, 128)
    Wp = _round_up(W + 2 * P, gran)
    lane = tile_h * Wp
    l_tile = _round_up((tile_h + 2 * P) * Wp + 2 * P, 128)
    return Wp, lane, l_tile


def _choose_tile(H, W, P, cin_pad, cout_pad, KK, vmem_budget, max_lane=4096):
    """Largest row tile whose per-step footprint fits the VMEM budget."""
    best = None
    for th in range(1, min(H, 128) + 1):
        Wp, lane, l_tile = _tile_config(th, W, P)
        if lane > max_lane:
            continue
        foot = (2 * cin_pad * l_tile * 2              # double-buffered bf16 slab
                + 2 * cout_pad * lane * 4             # double-buffered f32 out
                + cout_pad * lane * 4                 # f32 accumulator
                + KK * cout_pad * max(cin_pad, 128) * 2)   # resident weights
        if foot <= vmem_budget:
            best = (th, Wp, lane, l_tile)
    if best is None:
        # TODO(synk): very wide images would want a 2-D (row, col) spatial
        # tiling; fall back to single-row tiles here.
        th = 1
        best = (th,) + _tile_config(th, W, P)
    return best


def _prepare_weights(params, taps, k_max, cin, cin_pad, cout, cout_pad):
    """Center each branch's KxK filter inside Kmax x Kmax, concat on Cout, and
    lay the taps out as (KK, cout_pad, cin_pad) in the same order as `taps`."""
    blocks, biases = [], []
    for (w, b, K) in params:
        d = (k_max - K) // 2
        wp = jnp.pad(w, ((0, 0), (0, cin_pad - cin),
                         (d, k_max - K - d), (d, k_max - K - d)))
        blocks.append(wp)
        biases.append(b)
    wc = jnp.concatenate(blocks, axis=0)                     # (Cout, cin_pad, K, K)
    wc = jnp.pad(wc, ((0, cout_pad - cout), (0, 0), (0, 0), (0, 0)))
    w_taps = jnp.stack([wc[:, :, kh, kw] for (kh, kw) in taps],
                       axis=0).astype(jnp.bfloat16)          # (KK, cout_pad, cin_pad)
    bias = jnp.concatenate(biases)
    b2d = jnp.pad(bias, (0, cout_pad - cout)).reshape(cout_pad, 1).astype(jnp.float32)
    return w_taps, b2d


# --------------------------- wrapper / glue ----------------------------------
def mixconv2d_forward(x_nchw, params, out_dtype=jnp.float32):
    """x_nchw: (N, Cin, H, W) -> (N, out_ch, H, W), matching torch.cat(dim=1)."""
    N, Cin, H, W = map(int, x_nchw.shape)
    ks = [K for (_, _, K) in params]
    k_max = max(ks)
    P = k_max // 2
    KK = k_max * k_max
    couts = [int(w.shape[0]) for (w, _, _) in params]
    Cout = sum(couts)

    cin_pad = _round_up(Cin, 16)               # bf16 sublane packing
    cout_pad = _round_up(max(Cout, 8), 8)

    # Per-generation VMEM budget (v7x: 64 MiB/core, v5e/v6e: 128 MiB).
    try:
        vmem_cap = int(pltpu.get_tpu_info().vmem_capacity_bytes)
    except Exception:
        vmem_cap = 64 * 1024 * 1024            # conservative (v7x-safe) fallback
    vmem_budget = min(int(0.7 * vmem_cap), 96 * 1024 * 1024)

    tile_h, Wp, lane, l_tile = _choose_tile(H, W, P, cin_pad, cout_pad, KK,
                                            vmem_budget)
    T = -(-H // tile_h)
    tile_stride = tile_h * Wp

    # Taps grouped by kw so the lane rotation only changes k_max times.
    taps = [(kh, kw) for kw in range(k_max) for kh in range(k_max)]
    shifts = tuple(kh * Wp + kw for (kh, kw) in taps)

    # Single bf16, channels-first, spatially flattened slab in HBM (one copy,
    # no per-tile stacking).  Halo of P rows top/bottom, width padded to Wp.
    Hp = T * tile_h + 2 * P
    xp = jnp.pad(x_nchw.astype(jnp.bfloat16),
                 ((0, 0), (0, cin_pad - Cin), (P, Hp - H - P), (P, Wp - W - P)))
    xflat = xp.reshape(N, cin_pad, Hp * Wp)
    flat_len = (T - 1) * tile_stride + l_tile
    xflat = jnp.pad(xflat, ((0, 0), (0, 0), (0, flat_len - Hp * Wp)))

    w_taps, b2d = _prepare_weights(params, taps, k_max, Cin, cin_pad, Cout, cout_pad)

    kernel = functools.partial(_mixconv_kernel, shifts=shifts, lane=lane,
                               l_tile=l_tile, tile_stride=tile_stride,
                               cout_pad=cout_pad)

    flops = 2 * N * T * KK * cout_pad * cin_pad * lane
    bytes_accessed = int(N * T * cin_pad * l_tile * 2       # input slabs (incl. halo)
                         + w_taps.size * 2 + b2d.size * 4
                         + N * T * cout_pad * lane * jnp.dtype(out_dtype).itemsize)

    out = pl.pallas_call(
        kernel,
        out_shape=jax.ShapeDtypeStruct((N, cout_pad, T * lane), out_dtype),
        grid_spec=pltpu.PrefetchScalarGridSpec(
            num_scalar_prefetch=0,
            grid=(N, T),
            in_specs=[
                pl.BlockSpec(memory_space=pl.ANY),            # flat slab, manual DMA
                pl.BlockSpec((KK, cout_pad, cin_pad), lambda n, t: (0, 0, 0)),
                pl.BlockSpec((cout_pad, 1), lambda n, t: (0, 0)),
            ],
            out_specs=pl.BlockSpec((None, cout_pad, lane), lambda n, t: (n, 0, t)),
            scratch_shapes=[
                pltpu.VMEM((2, cin_pad, l_tile), jnp.bfloat16),
                pltpu.SemaphoreType.DMA((2,)),
            ],
        ),
        compiler_params=pltpu.CompilerParams(
            dimension_semantics=("parallel", "arbitrary"),
            vmem_limit_bytes=int(vmem_budget)),
        cost_estimate=pl.CostEstimate(flops=int(flops), transcendentals=0,
                                      bytes_accessed=bytes_accessed),
    )(xflat, w_taps, b2d)

    # Output is already channels-first and row-major in (tile, row, col):
    # pure reshape + slice, no transpose.
    out = out.reshape(N, cout_pad, T * tile_h, Wp)
    return out[:, :Cout, :H, :W]


# --------------------------- MixConv2d params --------------------------------
def mixconv_channel_split(out_ch, k):
    """'equal_params' channel split — transcription of the torch code."""
    groups = len(k)
    b = [out_ch] + [0] * groups
    a = np.eye(groups + 1, groups, k=-1)
    a -= np.roll(a, 1, axis=1)
    a *= np.array(k) ** 2
    a[0] = 1
    ch = np.linalg.lstsq(a, b, rcond=None)[0].round().astype(int)
    ch = [int(c) for c in ch]
    # Guard (review): lstsq + round can drift off out_ch for some (out_ch, k).
    ch[0] += out_ch - sum(ch)
    return ch


def init_mixconv_params(key, in_ch, out_ch, k=(3, 5, 7)):
    """Deterministic synthetic params; shapes match nn.Conv2d in the module."""
    ch = mixconv_channel_split(out_ch, k)
    params = []
    for g, K in enumerate(k):
        kw_key, kb_key = jax.random.split(jax.random.fold_in(key, g))
        w = 0.1 * jax.random.normal(kw_key, (ch[g], in_ch, K, K), jnp.float32)
        b = 0.1 * jax.random.normal(kb_key, (ch[g],), jnp.float32)
        params.append((w, b, K))
    return params


# Pure-JAX reference for correctness checking.
def mixconv2d_reference(x_nchw, params):
    outs = []
    for (w, b, K) in params:
        y = jax.lax.conv_general_dilated(
            x_nchw, w, window_strides=(1, 1),
            padding=[(K // 2, K // 2), (K // 2, K // 2)],
            dimension_numbers=("NCHW", "OIHW", "NCHW"))
        outs.append(y + b.reshape(1, -1, 1, 1))
    return jnp.concatenate(outs, axis=1)


if __name__ == "__main__":
    key = jax.random.PRNGKey(0)
    x_key, p_key = jax.random.split(key)

    N, Cin, H, W = 2, 4, 16, 16
    out_ch = 16
    k = (3, 5, 7)

    x = jax.random.normal(x_key, (N, Cin, H, W), jnp.float32)
    params = init_mixconv_params(p_key, Cin, out_ch, k)

    y = jax.block_until_ready(mixconv2d_forward(x, params))
    assert y.shape == (N, out_ch, H, W), y.shape

    y_ref = jax.block_until_ready(mixconv2d_reference(x, params))
    # bf16 MXU operands with f32 accumulation -> bf16-level tolerance.
    np.testing.assert_allclose(np.asarray(y), np.asarray(y_ref),
                               rtol=5e-2, atol=5e-2)

    print("KERNEL_OK")
</pallas_src>

<mosaic_0001>
module attributes {stable_mosaic.version = 11 : i64} {
  func.func @_mixconv_kernel(%arg0: i32, %arg1: i32, %arg2: memref<2x16x640xbf16, #tpu.memory_space<any>>, %arg3: memref<49x16x16xbf16, #tpu.memory_space<vmem>>, %arg4: memref<16x1xf32, #tpu.memory_space<vmem>>, %arg5: memref<1x16x384xf32, #tpu.memory_space<vmem>>, %arg6: memref<2x16x640xbf16, #tpu.memory_space<vmem>>, %arg7: memref<2x!tpu.dma_semaphore, #tpu.memory_space<semaphore_mem>>) attributes {dimension_semantics = [#tpu.dimension_semantics<parallel>, #tpu.dimension_semantics<arbitrary>], iteration_bounds = array<i64: 2, 1>, scalar_prefetch = 0 : i64, scratch_operands = 2 : i64, tpu.core_type = #tpu.core_type<tc>, window_params = [{}, {pipeline_mode = #tpu.pipeline_mode<synchronous>, transform_indices = @transform_1, window_bounds = array<i64: 49, 16, 16>}, {pipeline_mode = #tpu.pipeline_mode<synchronous>, transform_indices = @transform_2, window_bounds = array<i64: 16, 1>}, {transform_indices = @transform_3, window_bounds = array<i64: 1, 16, 384>}]} {
    %c0_i32 = arith.constant 0 : i32
    %0 = arith.cmpi eq, %arg1, %c0_i32 : i32
    %1 = arith.extui %0 : i1 to i32
    %c0_i32_0 = arith.constant 0 : i32
    %2 = arith.cmpi ne, %1, %c0_i32_0 : i32
    scf.if %2 {
      %c384_i32 = arith.constant 384 : i32
      %373 = arith.muli %arg1, %c384_i32 : i32
      %374 = tpu.assume_multiple %373, 128 : i32
      %c0_i32_326 = arith.constant 0 : i32
      %c0_i32_327 = arith.constant 0 : i32
      %c0_i32_328 = arith.constant 0 : i32
      %375 = tpu.memref_slice %arg2[%arg0, %c0_i32_328, %374] : memref<2x16x640xbf16, #tpu.memory_space<any>> -> memref<1x16x640xbf16, #tpu.memory_space<any>>
      %376 = tpu.memref_squeeze %375 : memref<1x16x640xbf16, #tpu.memory_space<any>> -> memref<16x640xbf16, #tpu.memory_space<any>>
      %c0_i32_329 = arith.constant 0 : i32
      %c0_i32_330 = arith.constant 0 : i32
      %377 = tpu.memref_slice %arg6[%c0_i32_326, %c0_i32_329, %c0_i32_330] : memref<2x16x640xbf16, #tpu.memory_space<vmem>> -> memref<1x16x640xbf16, #tpu.memory_space<vmem>>
      %378 = tpu.memref_squeeze %377 : memref<1x16x640xbf16, #tpu.memory_space<vmem>> -> memref<16x640xbf16, #tpu.memory_space<vmem>>
      %379 = tpu.memref_slice %arg7[%c0_i32_327] : memref<2x!tpu.dma_semaphore, #tpu.memory_space<semaphore_mem>> -> memref<1x!tpu.dma_semaphore, #tpu.memory_space<semaphore_mem>>
      %380 = tpu.memref_squeeze %379 : memref<1x!tpu.dma_semaphore, #tpu.memory_space<semaphore_mem>> -> memref<!tpu.dma_semaphore, #tpu.memory_space<semaphore_mem>>
      tpu.enqueue_dma source(%376 : memref<16x640xbf16, #tpu.memory_space<any>>) target(%378 : memref<16x640xbf16, #tpu.memory_space<vmem>>) target_semaphore(%380 : memref<!tpu.dma_semaphore, #tpu.memory_space<semaphore_mem>>)
    } else {
    }
    %c1_i32 = arith.constant 1 : i32
    %3 = arith.addi %arg1, %c1_i32 : i32
    %c1_i32_1 = arith.constant 1 : i32
    %4 = arith.cmpi slt, %3, %c1_i32_1 : i32
    %5 = arith.extui %4 : i1 to i32
    %c0_i32_2 = arith.constant 0 : i32
    %6 = arith.cmpi ne, %5, %c0_i32_2 : i32
    scf.if %6 {
      %c1_i32_326 = arith.constant 1 : i32
      %373 = arith.addi %arg1, %c1_i32_326 : i32
      %c0_i32_327 = arith.constant 0 : i32
      %374 = arith.minsi %373, %c0_i32_327 : i32
      %c1_i32_328 = arith.constant 1 : i32
      %375 = arith.addi %arg1, %c1_i32_328 : i32
      %c2_i32_329 = arith.constant 2 : i32
      %c0_i32_330 = arith.constant 0 : i32
      %376 = arith.cmpi eq, %c2_i32_329, %c0_i32_330 : i32
      %c1_i32_331 = arith.constant 1 : i32
      %377 = arith.select %376, %c1_i32_331, %c2_i32_329 : i32
      %378 = arith.remsi %375, %377 : i32
      %c0_i32_332 = arith.constant 0 : i32
      %379 = arith.cmpi ne, %378, %c0_i32_332 : i32
      %c0_i32_333 = arith.constant 0 : i32
      %380 = arith.cmpi slt, %378, %c0_i32_333 : i32
      %c0_i32_334 = arith.constant 0 : i32
      %381 = arith.cmpi slt, %377, %c0_i32_334 : i32
      %382 = arith.xori %380, %381 : i1
      %383 = arith.andi %382, %379 : i1
      %384 = arith.addi %378, %377 : i32
      %385 = arith.select %383, %384, %378 : i32
      %c384_i32 = arith.constant 384 : i32
      %386 = arith.muli %374, %c384_i32 : i32
      %387 = tpu.assume_multiple %386, 128 : i32
      %c0_i32_335 = arith.constant 0 : i32
      %388 = tpu.memref_slice %arg2[%arg0, %c0_i32_335, %387] : memref<2x16x640xbf16, #tpu.memory_space<any>> -> memref<1x16x640xbf16, #tpu.memory_space<any>>
      %389 = tpu.memref_squeeze %388 : memref<1x16x640xbf16, #tpu.memory_space<any>> -> memref<16x640xbf16, #tpu.memory_space<any>>
      %c0_i32_336 = arith.constant 0 : i32
      %c0_i32_337 = arith.constant 0 : i32
      %390 = tpu.memref_slice %arg6[%385, %c0_i32_336, %c0_i32_337] : memref<2x16x640xbf16, #tpu.memory_space<vmem>> -> memref<1x16x640xbf16, #tpu.memory_space<vmem>>
      %391 = tpu.memref_squeeze %390 : memref<1x16x640xbf16, #tpu.memory_space<vmem>> -> memref<16x640xbf16, #tpu.memory_space<vmem>>
      %392 = tpu.memref_slice %arg7[%385] : memref<2x!tpu.dma_semaphore, #tpu.memory_space<semaphore_mem>> -> memref<1x!tpu.dma_semaphore, #tpu.memory_space<semaphore_mem>>
      %393 = tpu.memref_squeeze %392 : memref<1x!tpu.dma_semaphore, #tpu.memory_space<semaphore_mem>> -> memref<!tpu.dma_semaphore, #tpu.memory_space<semaphore_mem>>
      tpu.enqueue_dma source(%389 : memref<16x640xbf16, #tpu.memory_space<any>>) target(%391 : memref<16x640xbf16, #tpu.memory_space<vmem>>) target_semaphore(%393 : memref<!tpu.dma_semaphore, #tpu.memory_space<semaphore_mem>>)
    } else {
    }
    %c2_i32 = arith.constant 2 : i32
    %c0_i32_3 = arith.constant 0 : i32
    %7 = arith.cmpi eq, %c2_i32, %c0_i32_3 : i32
    %c1_i32_4 = arith.constant 1 : i32
    %8 = arith.select %7, %c1_i32_4, %c2_i32 : i32
    %9 = arith.remsi %arg1, %8 : i32
    %c0_i32_5 = arith.constant 0 : i32
    %10 = arith.cmpi ne, %9, %c0_i32_5 : i32
    %c0_i32_6 = arith.constant 0 : i32
    %11 = arith.cmpi slt, %9, %c0_i32_6 : i32
    %c0_i32_7 = arith.constant 0 : i32
    %12 = arith.cmpi slt, %8, %c0_i32_7 : i32
    %13 = arith.xori %11, %12 : i1
    %14 = arith.andi %13, %10 : i1
    %15 = arith.addi %9, %8 : i32
    %16 = arith.select %14, %15, %9 : i32
    %c0_i32_8 = arith.constant 0 : i32
    %c0_i32_9 = arith.constant 0 : i32
    %17 = tpu.memref_slice %arg2[%arg0, %c0_i32_8, %c0_i32_9] : memref<2x16x640xbf16, #tpu.memory_space<any>> -> memref<1x16x640xbf16, #tpu.memory_space<any>>
    %18 = tpu.memref_squeeze %17 : memref<1x16x640xbf16, #tpu.memory_space<any>> -> memref<16x640xbf16, #tpu.memory_space<any>>
    %c0_i32_10 = arith.constant 0 : i32
    %c0_i32_11 = arith.constant 0 : i32
    %19 = tpu.memref_slice %arg6[%16, %c0_i32_10, %c0_i32_11] : memref<2x16x640xbf16, #tpu.memory_space<vmem>> -> memref<1x16x640xbf16, #tpu.memory_space<vmem>>
    %20 = tpu.memref_squeeze %19 : memref<1x16x640xbf16, #tpu.memory_space<vmem>> -> memref<16x640xbf16, #tpu.memory_space<vmem>>
    %21 = tpu.memref_slice %arg7[%16] : memref<2x!tpu.dma_semaphore, #tpu.memory_space<semaphore_mem>> -> memref<1x!tpu.dma_semaphore, #tpu.memory_space<semaphore_mem>>
    %22 = tpu.memref_squeeze %21 : memref<1x!tpu.dma_semaphore, #tpu.memory_space<semaphore_mem>> -> memref<!tpu.dma_semaphore, #tpu.memory_space<semaphore_mem>>
    tpu.wait_dma2 semaphore(%22 : memref<!tpu.dma_semaphore, #tpu.memory_space<semaphore_mem>>) src(%18 : memref<16x640xbf16, #tpu.memory_space<any>>) dst(%20 : memref<16x640xbf16, #tpu.memory_space<vmem>>)
    %cst = arith.constant 0.000000e+00 : f32
    %23 = vector.broadcast %cst : f32 to vector<16x384xf32>
    %c0 = arith.constant 0 : index
    %c0_12 = arith.constant 0 : index
    %c0_13 = arith.constant 0 : index
    %24 = vector.load %arg3[%c0, %c0_12, %c0_13] : memref<49x16x16xbf16, #tpu.memory_space<vmem>>, vector<1x16x16xbf16>
    %25 = vector.shape_cast %24 : vector<1x16x16xbf16> to vector<16x16xbf16>
    %c0_i32_14 = arith.constant 0 : i32
    %c0_i32_15 = arith.constant 0 : i32
    %26 = tpu.memref_slice %arg6[%16, %c0_i32_14, %c0_i32_15] : memref<2x16x640xbf16, #tpu.memory_space<vmem>> -> memref<1x16x640xbf16, #tpu.memory_space<vmem>>
    %27 = tpu.memref_squeeze %26 : memref<1x16x640xbf16, #tpu.memory_space<vmem>> -> memref<16x640xbf16, #tpu.memory_space<vmem>>
    %c0_16 = arith.constant 0 : index
    %c0_17 = arith.constant 0 : index
    %28 = vector.load %27[%c0_16, %c0_17] : memref<16x640xbf16, #tpu.memory_space<vmem>>, vector<16x384xbf16>
    %cst_18 = arith.constant dense<0.000000e+00> : vector<16x384xf32>
    %29 = tpu.matmul %25, %28, %cst_18 {dimension_numbers = #tpu.dot_dimension_numbers<[1], [0], [0], [1], [0, 0, 1, 1], [], []>} : vector<16x16xbf16>, vector<16x384xbf16>, vector<16x384xf32> -> vector<16x384xf32>
    %30 = arith.addf %23, %29 : vector<16x384xf32>
    %c1 = arith.constant 1 : index
    %c0_19 = arith.constant 0 : index
    %c0_20 = arith.constant 0 : index
    %31 = vector.load %arg3[%c1, %c0_19, %c0_20] : memref<49x16x16xbf16, #tpu.memory_space<vmem>>, vector<1x16x16xbf16>
    %32 = vector.shape_cast %31 : vector<1x16x16xbf16> to vector<16x16xbf16>
    %c0_i32_21 = arith.constant 0 : i32
    %c0_i32_22 = arith.constant 0 : i32
    %33 = tpu.memref_slice %arg6[%16, %c0_i32_21, %c0_i32_22] : memref<2x16x640xbf16, #tpu.memory_space<vmem>> -> memref<1x16x640xbf16, #tpu.memory_space<vmem>>
    %34 = tpu.memref_squeeze %33 : memref<1x16x640xbf16, #tpu.memory_space<vmem>> -> memref<16x640xbf16, #tpu.memory_space<vmem>>
    %c0_23 = arith.constant 0 : index
    %c24 = arith.constant 24 : index
    %35 = vector.load %34[%c0_23, %c24] : memref<16x640xbf16, #tpu.memory_space<vmem>>, vector<16x384xbf16>
    %cst_24 = arith.constant dense<0.000000e+00> : vector<16x384xf32>
    %36 = tpu.matmul %32, %35, %cst_24 {dimension_numbers = #tpu.dot_dimension_numbers<[1], [0], [0], [1], [0, 0, 1, 1], [], []>} : vector<16x16xbf16>, vector<16x384xbf16>, vector<16x384xf32> -> vector<16x384xf32>
    %37 = arith.addf %30, %36 : vector<16x384xf32>
    %c2 = arith.constant 2 : index
    %c0_25 = arith.constant 0 : index
    %c0_26 = arith.constant 0 : index
    %38 = vector.load %arg3[%c2, %c0_25, %c0_26] : memref<49x16x16xbf16, #tpu.memory_space<vmem>>, vector<1x16x16xbf16>
    %39 = vector.shape_cast %38 : vector<1x16x16xbf16> to vector<16x16xbf16>
    %c0_i32_27 = arith.constant 0 : i32
    %c0_i32_28 = arith.constant 0 : i32
    %40 = tpu.memref_slice %arg6[%16, %c0_i32_27, %c0_i32_28] : memref<2x16x640xbf16, #tpu.memory_space<vmem>> -> memref<1x16x640xbf16, #tpu.memory_space<vmem>>
    %41 = tpu.memref_squeeze %40 : memref<1x16x640xbf16, #tpu.memory_space<vmem>> -> memref<16x640xbf16, #tpu.memory_space<vmem>>
    %c0_29 = arith.constant 0 : index
    %c48 = arith.constant 48 : index
    %42 = vector.load %41[%c0_29, %c48] : memref<16x640xbf16, #tpu.memory_space<vmem>>, vector<16x384xbf16>
    %cst_30 = arith.constant dense<0.000000e+00> : vector<16x384xf32>
    %43 = tpu.matmul %39, %42, %cst_30 {dimension_numbers = #tpu.dot_dimension_numbers<[1], [0], [0], [1], [0, 0, 1, 1], [], []>} : vector<16x16xbf16>, vector<16x384xbf16>, vector<16x384xf32> -> vector<16x384xf32>
    %44 = arith.addf %37, %43 : vector<16x384xf32>
    %c3 = arith.constant 3 : index
    %c0_31 = arith.constant 0 : index
    %c0_32 = arith.constant 0 : index
    %45 = vector.load %arg3[%c3, %c0_31, %c0_32] : memref<49x16x16xbf16, #tpu.memory_space<vmem>>, vector<1x16x16xbf16>
    %46 = vector.shape_cast %45 : vector<1x16x16xbf16> to vector<16x16xbf16>
    %c0_i32_33 = arith.constant 0 : i32
    %c0_i32_34 = arith.constant 0 : i32
    %47 = tpu.memref_slice %arg6[%16, %c0_i32_33, %c0_i32_34] : memref<2x16x640xbf16, #tpu.memory_space<vmem>> -> memref<1x16x640xbf16, #tpu.memory_space<vmem>>
    %48 = tpu.memref_squeeze %47 : memref<1x16x640xbf16, #tpu.memory_space<vmem>> -> memref<16x640xbf16, #tpu.memory_space<vmem>>
    %c0_35 = arith.constant 0 : index
    %c72 = arith.constant 72 : index
    %49 = vector.load %48[%c0_35, %c72] : memref<16x640xbf16, #tpu.memory_space<vmem>>, vector<16x384xbf16>
    %cst_36 = arith.constant dense<0.000000e+00> : vector<16x384xf32>
    %50 = tpu.matmul %46, %49, %cst_36 {dimension_numbers = #tpu.dot_dimension_numbers<[1], [0], [0], [1], [0, 0, 1, 1], [], []>} : vector<16x16xbf16>, vector<16x384xbf16>, vector<16x384xf32> -> vector<16x384xf32>
    %51 = arith.addf %44, %50 : vector<16x384xf32>
    %c4 = arith.constant 4 : index
    %c0_37 = arith.constant 0 : index
    %c0_38 = arith.constant 0 : index
    %52 = vector.load %arg3[%c4, %c0_37, %c0_38] : memref<49x16x16xbf16, #tpu.memory_space<vmem>>, vector<1x16x16xbf16>
    %53 = vector.shape_cast %52 : vector<1x16x16xbf16> to vector<16x16xbf16>
    %c0_i32_39 = arith.constant 0 : i32
    %c0_i32_40 = arith.constant 0 : i32
    %54 = tpu.memref_slice %arg6[%16, %c0_i32_39, %c0_i32_40] : memref<2x16x640xbf16, #tpu.memory_space<vmem>> -> memref<1x16x640xbf16, #tpu.memory_space<vmem>>
    %55 = tpu.memref_squeeze %54 : memref<1x16x640xbf16, #tpu.memory_space<vmem>> -> memref<16x640xbf16, #tpu.memory_space<vmem>>
    %c0_41 = arith.constant 0 : index
    %c96 = arith.constant 96 : index
    %56 = vector.load %55[%c0_41, %c96] : memref<16x640xbf16, #tpu.memory_space<vmem>>, vector<16x384xbf16>
    %cst_42 = arith.constant dense<0.000000e+00> : vector<16x384xf32>
    %57 = tpu.matmul %53, %56, %cst_42 {dimension_numbers = #tpu.dot_dimension_numbers<[1], [0], [0], [1], [0, 0, 1, 1], [], []>} : vector<16x16xbf16>, vector<16x384xbf16>, vector<16x384xf32> -> vector<16x384xf32>
    %58 = arith.addf %51, %57 : vector<16x384xf32>
    %c5 = arith.constant 5 : index
    %c0_43 = arith.constant 0 : index
    %c0_44 = arith.constant 0 : index
    %59 = vector.load %arg3[%c5, %c0_43, %c0_44] : memref<49x16x16xbf16, #tpu.memory_space<vmem>>, vector<1x16x16xbf16>
    %60 = vector.shape_cast %59 : vector<1x16x16xbf16> to vector<16x16xbf16>
    %c0_i32_45 = arith.constant 0 : i32
    %c0_i32_46 = arith.constant 0 : i32
    %61 = tpu.memref_slice %arg6[%16, %c0_i32_45, %c0_i32_46] : memref<2x16x640xbf16, #tpu.memory_space<vmem>> -> memref<1x16x640xbf16, #tpu.memory_space<vmem>>
    %62 = tpu.memref_squeeze %61 : memref<1x16x640xbf16, #tpu.memory_space<vmem>> -> memref<16x640xbf16, #tpu.memory_space<vmem>>
    %c0_47 = arith.constant 0 : index
    %c120 = arith.constant 120 : index
    %63 = vector.load %62[%c0_47, %c120] : memref<16x640xbf16, #tpu.memory_space<vmem>>, vector<16x384xbf16>
    %cst_48 = arith.constant dense<0.000000e+00> : vector<16x384xf32>
    %64 = tpu.matmul %60, %63, %cst_48 {dimension_numbers = #tpu.dot_dimension_numbers<[1], [0], [0], [1], [0, 0, 1, 1], [], []>} : vector<16x16xbf16>, vector<16x384xbf16>, vector<16x384xf32> -> vector<16x384xf32>
    %65 = arith.addf %58, %64 : vector<16x384xf32>
    %c6 = arith.constant 6 : index
    %c0_49 = arith.constant 0 : index
    %c0_50 = arith.constant 0 : index
    %66 = vector.load %arg3[%c6, %c0_49, %c0_50] : memref<49x16x16xbf16, #tpu.memory_space<vmem>>, vector<1x16x16xbf16>
    %67 = vector.shape_cast %66 : vector<1x16x16xbf16> to vector<16x16xbf16>
    %c0_i32_51 = arith.constant 0 : i32
    %c0_i32_52 = arith.constant 0 : i32
    %68 = tpu.memref_slice %arg6[%16, %c0_i32_51, %c0_i32_52] : memref<2x16x640xbf16, #tpu.memory_space<vmem>> -> memref<1x16x640xbf16, #tpu.memory_space<vmem>>
    %69 = tpu.memref_squeeze %68 : memref<1x16x640xbf16, #tpu.memory_space<vmem>> -> memref<16x640xbf16, #tpu.memory_space<vmem>>
    %c0_53 = arith.constant 0 : index
    %c144 = arith.constant 144 : index
    %70 = vector.load %69[%c0_53, %c144] : memref<16x640xbf16, #tpu.memory_space<vmem>>, vector<16x384xbf16>
    %cst_54 = arith.constant dense<0.000000e+00> : vector<16x384xf32>
    %71 = tpu.matmul %67, %70, %cst_54 {dimension_numbers = #tpu.dot_dimension_numbers<[1], [0], [0], [1], [0, 0, 1, 1], [], []>} : vector<16x16xbf16>, vector<16x384xbf16>, vector<16x384xf32> -> vector<16x384xf32>
    %72 = arith.addf %65, %71 : vector<16x384xf32>
    %c7 = arith.constant 7 : index
    %c0_55 = arith.constant 0 : index
    %c0_56 = arith.constant 0 : index
    %73 = vector.load %arg3[%c7, %c0_55, %c0_56] : memref<49x16x16xbf16, #tpu.memory_space<vmem>>, vector<1x16x16xbf16>
    %74 = vector.shape_cast %73 : vector<1x16x16xbf16> to vector<16x16xbf16>
    %c0_i32_57 = arith.constant 0 : i32
    %c0_i32_58 = arith.constant 0 : i32
    %75 = tpu.memref_slice %arg6[%16, %c0_i32_57, %c0_i32_58] : memref<2x16x640xbf16, #tpu.memory_space<vmem>> -> memref<1x16x640xbf16, #tpu.memory_space<vmem>>
    %76 = tpu.memref_squeeze %75 : memref<1x16x640xbf16, #tpu.memory_space<vmem>> -> memref<16x640xbf16, #tpu.memory_space<vmem>>
    %c0_59 = arith.constant 0 : index
    %c1_60 = arith.constant 1 : index
    %77 = vector.load %76[%c0_59, %c1_60] : memref<16x640xbf16, #tpu.memory_space<vmem>>, vector<16x384xbf16>
    %cst_61 = arith.constant dense<0.000000e+00> : vector<16x384xf32>
    %78 = tpu.matmul %74, %77, %cst_61 {dimension_numbers = #tpu.dot_dimension_numbers<[1], [0], [0], [1], [0, 0, 1, 1], [], []>} : vector<16x16xbf16>, vector<16x384xbf16>, vector<16x384xf32> -> vector<16x384xf32>
    %79 = arith.addf %72, %78 : vector<16x384xf32>
    %c8 = arith.constant 8 : index
    %c0_62 = arith.constant 0 : index
    %c0_63 = arith.constant 0 : index
    %80 = vector.load %arg3[%c8, %c0_62, %c0_63] : memref<49x16x16xbf16, #tpu.memory_space<vmem>>, vector<1x16x16xbf16>
    %81 = vector.shape_cast %80 : vector<1x16x16xbf16> to vector<16x16xbf16>
    %c0_i32_64 = arith.constant 0 : i32
    %c0_i32_65 = arith.constant 0 : i32
    %82 = tpu.memref_slice %arg6[%16, %c0_i32_64, %c0_i32_65] : memref<2x16x640xbf16, #tpu.memory_space<vmem>> -> memref<1x16x640xbf16, #tpu.memory_space<vmem>>
    %83 = tpu.memref_squeeze %82 : memref<1x16x640xbf16, #tpu.memory_space<vmem>> -> memref<16x640xbf16, #tpu.memory_space<vmem>>
    %c0_66 = arith.constant 0 : index
    %c25 = arith.constant 25 : index
    %84 = vector.load %83[%c0_66, %c25] : memref<16x640xbf16, #tpu.memory_space<vmem>>, vector<16x384xbf16>
    %cst_67 = arith.constant dense<0.000000e+00> : vector<16x384xf32>
    %85 = tpu.matmul %81, %84, %cst_67 {dimension_numbers = #tpu.dot_dimension_numbers<[1], [0], [0], [1], [0, 0, 1, 1], [], []>} : vector<16x16xbf16>, vector<16x384xbf16>, vector<16x384xf32> -> vector<16x384xf32>
    %86 = arith.addf %79, %85 : vector<16x384xf32>
    %c9 = arith.constant 9 : index
    %c0_68 = arith.constant 0 : index
    %c0_69 = arith.constant 0 : index
    %87 = vector.load %arg3[%c9, %c0_68, %c0_69] : memref<49x16x16xbf16, #tpu.memory_space<vmem>>, vector<1x16x16xbf16>
    %88 = vector.shape_cast %87 : vector<1x16x16xbf16> to vector<16x16xbf16>
    %c0_i32_70 = arith.constant 0 : i32
    %c0_i32_71 = arith.constant 0 : i32
    %89 = tpu.memref_slice %arg6[%16, %c0_i32_70, %c0_i32_71] : memref<2x16x640xbf16, #tpu.memory_space<vmem>> -> memref<1x16x640xbf16, #tpu.memory_space<vmem>>
    %90 = tpu.memref_squeeze %89 : memref<1x16x640xbf16, #tpu.memory_space<vmem>> -> memref<16x640xbf16, #tpu.memory_space<vmem>>
    %c0_72 = arith.constant 0 : index
    %c49 = arith.constant 49 : index
    %91 = vector.load %90[%c0_72, %c49] : memref<16x640xbf16, #tpu.memory_space<vmem>>, vector<16x384xbf16>
    %cst_73 = arith.constant dense<0.000000e+00> : vector<16x384xf32>
    %92 = tpu.matmul %88, %91, %cst_73 {dimension_numbers = #tpu.dot_dimension_numbers<[1], [0], [0], [1], [0, 0, 1, 1], [], []>} : vector<16x16xbf16>, vector<16x384xbf16>, vector<16x384xf32> -> vector<16x384xf32>
    %93 = arith.addf %86, %92 : vector<16x384xf32>
    %c10 = arith.constant 10 : index
    %c0_74 = arith.constant 0 : index
    %c0_75 = arith.constant 0 : index
    %94 = vector.load %arg3[%c10, %c0_74, %c0_75] : memref<49x16x16xbf16, #tpu.memory_space<vmem>>, vector<1x16x16xbf16>
    %95 = vector.shape_cast %94 : vector<1x16x16xbf16> to vector<16x16xbf16>
    %c0_i32_76 = arith.constant 0 : i32
    %c0_i32_77 = arith.constant 0 : i32
    %96 = tpu.memref_slice %arg6[%16, %c0_i32_76, %c0_i32_77] : memref<2x16x640xbf16, #tpu.memory_space<vmem>> -> memref<1x16x640xbf16, #tpu.memory_space<vmem>>
    %97 = tpu.memref_squeeze %96 : memref<1x16x640xbf16, #tpu.memory_space<vmem>> -> memref<16x640xbf16, #tpu.memory_space<vmem>>
    %c0_78 = arith.constant 0 : index
    %c73 = arith.constant 73 : index
    %98 = vector.load %97[%c0_78, %c73] : memref<16x640xbf16, #tpu.memory_space<vmem>>, vector<16x384xbf16>
    %cst_79 = arith.constant dense<0.000000e+00> : vector<16x384xf32>
    %99 = tpu.matmul %95, %98, %cst_79 {dimension_numbers = #tpu.dot_dimension_numbers<[1], [0], [0], [1], [0, 0, 1, 1], [], []>} : vector<16x16xbf16>, vector<16x384xbf16>, vector<16x384xf32> -> vector<16x384xf32>
    %100 = arith.addf %93, %99 : vector<16x384xf32>
    %c11 = arith.constant 11 : index
    %c0_80 = arith.constant 0 : index
    %c0_81 = arith.constant 0 : index
    %101 = vector.load %arg3[%c11, %c0_80, %c0_81] : memref<49x16x16xbf16, #tpu.memory_space<vmem>>, vector<1x16x16xbf16>
    %102 = vector.shape_cast %101 : vector<1x16x16xbf16> to vector<16x16xbf16>
    %c0_i32_82 = arith.constant 0 : i32
    %c0_i32_83 = arith.constant 0 : i32
    %103 = tpu.memref_slice %arg6[%16, %c0_i32_82, %c0_i32_83] : memref<2x16x640xbf16, #tpu.memory_space<vmem>> -> memref<1x16x640xbf16, #tpu.memory_space<vmem>>
    %104 = tpu.memref_squeeze %103 : memref<1x16x640xbf16, #tpu.memory_space<vmem>> -> memref<16x640xbf16, #tpu.memory_space<vmem>>
    %c0_84 = arith.constant 0 : index
    %c97 = arith.constant 97 : index
    %105 = vector.load %104[%c0_84, %c97] : memref<16x640xbf16, #tpu.memory_space<vmem>>, vector<16x384xbf16>
    %cst_85 = arith.constant dense<0.000000e+00> : vector<16x384xf32>
    %106 = tpu.matmul %102, %105, %cst_85 {dimension_numbers = #tpu.dot_dimension_numbers<[1], [0], [0], [1], [0, 0, 1, 1], [], []>} : vector<16x16xbf16>, vector<16x384xbf16>, vector<16x384xf32> -> vector<16x384xf32>
    %107 = arith.addf %100, %106 : vector<16x384xf32>
    %c12 = arith.constant 12 : index
    %c0_86 = arith.constant 0 : index
    %c0_87 = arith.constant 0 : index
    %108 = vector.load %arg3[%c12, %c0_86, %c0_87] : memref<49x16x16xbf16, #tpu.memory_space<vmem>>, vector<1x16x16xbf16>
    %109 = vector.shape_cast %108 : vector<1x16x16xbf16> to vector<16x16xbf16>
    %c0_i32_88 = arith.constant 0 : i32
    %c0_i32_89 = arith.constant 0 : i32
    %110 = tpu.memref_slice %arg6[%16, %c0_i32_88, %c0_i32_89] : memref<2x16x640xbf16, #tpu.memory_space<vmem>> -> memref<1x16x640xbf16, #tpu.memory_space<vmem>>
    %111 = tpu.memref_squeeze %110 : memref<1x16x640xbf16, #tpu.memory_space<vmem>> -> memref<16x640xbf16, #tpu.memory_space<vmem>>
    %c0_90 = arith.constant 0 : index
    %c121 = arith.constant 121 : index
    %112 = vector.load %111[%c0_90, %c121] : memref<16x640xbf16, #tpu.memory_space<vmem>>, vector<16x384xbf16>
    %cst_91 = arith.constant dense<0.000000e+00> : vector<16x384xf32>
    %113 = tpu.matmul %109, %112, %cst_91 {dimension_numbers = #tpu.dot_dimension_numbers<[1], [0], [0], [1], [0, 0, 1, 1], [], []>} : vector<16x16xbf16>, vector<16x384xbf16>, vector<16x384xf32> -> vector<16x384xf32>
    %114 = arith.addf %107, %113 : vector<16x384xf32>
    %c13 = arith.constant 13 : index
    %c0_92 = arith.constant 0 : index
    %c0_93 = arith.constant 0 : index
    %115 = vector.load %arg3[%c13, %c0_92, %c0_93] : memref<49x16x16xbf16, #tpu.memory_space<vmem>>, vector<1x16x16xbf16>
    %116 = vector.shape_cast %115 : vector<1x16x16xbf16> to vector<16x16xbf16>
    %c0_i32_94 = arith.constant 0 : i32
    %c0_i32_95 = arith.constant 0 : i32
    %117 = tpu.memref_slice %arg6[%16, %c0_i32_94, %c0_i32_95] : memref<2x16x640xbf16, #tpu.memory_space<vmem>> -> memref<1x16x640xbf16, #tpu.memory_space<vmem>>
    %118 = tpu.memref_squeeze %117 : memref<1x16x640xbf16, #tpu.memory_space<vmem>> -> memref<16x640xbf16, #tpu.memory_space<vmem>>
    %c0_96 = arith.constant 0 : index
    %c145 = arith.constant 145 : index
    %119 = vector.load %118[%c0_96, %c145] : memref<16x640xbf16, #tpu.memory_space<vmem>>, vector<16x384xbf16>
    %cst_97 = arith.constant dense<0.000000e+00> : vector<16x384xf32>
    %120 = tpu.matmul %116, %119, %cst_97 {dimension_numbers = #tpu.dot_dimension_numbers<[1], [0], [0], [1], [0, 0, 1, 1], [], []>} : vector<16x16xbf16>, vector<16x384xbf16>, vector<16x384xf32> -> vector<16x384xf32>
    %121 = arith.addf %114, %120 : vector<16x384xf32>
    %c14 = arith.constant 14 : index
    %c0_98 = arith.constant 0 : index
    %c0_99 = arith.constant 0 : index
    %122 = vector.load %arg3[%c14, %c0_98, %c0_99] : memref<49x16x16xbf16, #tpu.memory_space<vmem>>, vector<1x16x16xbf16>
    %123 = vector.shape_cast %122 : vector<1x16x16xbf16> to vector<16x16xbf16>
    %c0_i32_100 = arith.constant 0 : i32
    %c0_i32_101 = arith.constant 0 : i32
    %124 = tpu.memref_slice %arg6[%16, %c0_i32_100, %c0_i32_101] : memref<2x16x640xbf16, #tpu.memory_space<vmem>> -> memref<1x16x640xbf16, #tpu.memory_space<vmem>>
    %125 = tpu.memref_squeeze %124 : memref<1x16x640xbf16, #tpu.memory_space<vmem>> -> memref<16x640xbf16, #tpu.memory_space<vmem>>
    %c0_102 = arith.constant 0 : index
    %c2_103 = arith.constant 2 : index
    %126 = vector.load %125[%c0_102, %c2_103] : memref<16x640xbf16, #tpu.memory_space<vmem>>, vector<16x384xbf16>
    %cst_104 = arith.constant dense<0.000000e+00> : vector<16x384xf32>
    %127 = tpu.matmul %123, %126, %cst_104 {dimension_numbers = #tpu.dot_dimension_numbers<[1], [0], [0], [1], [0, 0, 1, 1], [], []>} : vector<16x16xbf16>, vector<16x384xbf16>, vector<16x384xf32> -> vector<16x384xf32>
    %128 = arith.addf %121, %127 : vector<16x384xf32>
    %c15 = arith.constant 15 : index
    %c0_105 = arith.constant 0 : index
    %c0_106 = arith.constant 0 : index
    %129 = vector.load %arg3[%c15, %c0_105, %c0_106] : memref<49x16x16xbf16, #tpu.memory_space<vmem>>, vector<1x16x16xbf16>
    %130 = vector.shape_cast %129 : vector<1x16x16xbf16> to vector<16x16xbf16>
    %c0_i32_107 = arith.constant 0 : i32
    %c0_i32_108 = arith.constant 0 : i32
    %131 = tpu.memref_slice %arg6[%16, %c0_i32_107, %c0_i32_108] : memref<2x16x640xbf16, #tpu.memory_space<vmem>> -> memref<1x16x640xbf16, #tpu.memory_space<vmem>>
    %132 = tpu.memref_squeeze %131 : memref<1x16x640xbf16, #tpu.memory_space<vmem>> -> memref<16x640xbf16, #tpu.memory_space<vmem>>
    %c0_109 = arith.constant 0 : index
    %c26 = arith.constant 26 : index
    %133 = vector.load %132[%c0_109, %c26] : memref<16x640xbf16, #tpu.memory_space<vmem>>, vector<16x384xbf16>
    %cst_110 = arith.constant dense<0.000000e+00> : vector<16x384xf32>
    %134 = tpu.matmul %130, %133, %cst_110 {dimension_numbers = #tpu.dot_dimension_numbers<[1], [0], [0], [1], [0, 0, 1, 1], [], []>} : vector<16x16xbf16>, vector<16x384xbf16>, vector<16x384xf32> -> vector<16x384xf32>
    %135 = arith.addf %128, %134 : vector<16x384xf32>
    %c16 = arith.constant 16 : index
    %c0_111 = arith.constant 0 : index
    %c0_112 = arith.constant 0 : index
    %136 = vector.load %arg3[%c16, %c0_111, %c0_112] : memref<49x16x16xbf16, #tpu.memory_space<vmem>>, vector<1x16x16xbf16>
    %137 = vector.shape_cast %136 : vector<1x16x16xbf16> to vector<16x16xbf16>
    %c0_i32_113 = arith.constant 0 : i32
    %c0_i32_114 = arith.constant 0 : i32
    %138 = tpu.memref_slice %arg6[%16, %c0_i32_113, %c0_i32_114] : memref<2x16x640xbf16, #tpu.memory_space<vmem>> -> memref<1x16x640xbf16, #tpu.memory_space<vmem>>
    %139 = tpu.memref_squeeze %138 : memref<1x16x640xbf16, #tpu.memory_space<vmem>> -> memref<16x640xbf16, #tpu.memory_space<vmem>>
    %c0_115 = arith.constant 0 : index
    %c50 = arith.constant 50 : index
    %140 = vector.load %139[%c0_115, %c50] : memref<16x640xbf16, #tpu.memory_space<vmem>>, vector<16x384xbf16>
    %cst_116 = arith.constant dense<0.000000e+00> : vector<16x384xf32>
    %141 = tpu.matmul %137, %140, %cst_116 {dimension_numbers = #tpu.dot_dimension_numbers<[1], [0], [0], [1], [0, 0, 1, 1], [], []>} : vector<16x16xbf16>, vector<16x384xbf16>, vector<16x384xf32> -> vector<16x384xf32>
    %142 = arith.addf %135, %141 : vector<16x384xf32>
    %c17 = arith.constant 17 : index
    %c0_117 = arith.constant 0 : index
    %c0_118 = arith.constant 0 : index
    %143 = vector.load %arg3[%c17, %c0_117, %c0_118] : memref<49x16x16xbf16, #tpu.memory_space<vmem>>, vector<1x16x16xbf16>
    %144 = vector.shape_cast %143 : vector<1x16x16xbf16> to vector<16x16xbf16>
    %c0_i32_119 = arith.constant 0 : i32
    %c0_i32_120 = arith.constant 0 : i32
    %145 = tpu.memref_slice %arg6[%16, %c0_i32_119, %c0_i32_120] : memref<2x16x640xbf16, #tpu.memory_space<vmem>> -> memref<1x16x640xbf16, #tpu.memory_space<vmem>>
    %146 = tpu.memref_squeeze %145 : memref<1x16x640xbf16, #tpu.memory_space<vmem>> -> memref<16x640xbf16, #tpu.memory_space<vmem>>
    %c0_121 = arith.constant 0 : index
    %c74 = arith.constant 74 : index
    %147 = vector.load %146[%c0_121, %c74] : memref<16x640xbf16, #tpu.memory_space<vmem>>, vector<16x384xbf16>
    %cst_122 = arith.constant dense<0.000000e+00> : vector<16x384xf32>
    %148 = tpu.matmul %144, %147, %cst_122 {dimension_numbers = #tpu.dot_dimension_numbers<[1], [0], [0], [1], [0, 0, 1, 1], [], []>} : vector<16x16xbf16>, vector<16x384xbf16>, vector<16x384xf32> -> vector<16x384xf32>
    %149 = arith.addf %142, %148 : vector<16x384xf32>
    %c18 = arith.constant 18 : index
    %c0_123 = arith.constant 0 : index
    %c0_124 = arith.constant 0 : index
    %150 = vector.load %arg3[%c18, %c0_123, %c0_124] : memref<49x16x16xbf16, #tpu.memory_space<vmem>>, vector<1x16x16xbf16>
    %151 = vector.shape_cast %150 : vector<1x16x16xbf16> to vector<16x16xbf16>
    %c0_i32_125 = arith.constant 0 : i32
    %c0_i32_126 = arith.constant 0 : i32
    %152 = tpu.memref_slice %arg6[%16, %c0_i32_125, %c0_i32_126] : memref<2x16x640xbf16, #tpu.memory_space<vmem>> -> memref<1x16x640xbf16, #tpu.memory_space<vmem>>
    %153 = tpu.memref_squeeze %152 : memref<1x16x640xbf16, #tpu.memory_space<vmem>> -> memref<16x640xbf16, #tpu.memory_space<vmem>>
    %c0_127 = arith.constant 0 : index
    %c98 = arith.constant 98 : index
    %154 = vector.load %153[%c0_127, %c98] : memref<16x640xbf16, #tpu.memory_space<vmem>>, vector<16x384xbf16>
    %cst_128 = arith.constant dense<0.000000e+00> : vector<16x384xf32>
    %155 = tpu.matmul %151, %154, %cst_128 {dimension_numbers = #tpu.dot_dimension_numbers<[1], [0], [0], [1], [0, 0, 1, 1], [], []>} : vector<16x16xbf16>, vector<16x384xbf16>, vector<16x384xf32> -> vector<16x384xf32>
    %156 = arith.addf %149, %155 : vector<16x384xf32>
    %c19 = arith.constant 19 : index
    %c0_129 = arith.constant 0 : index
    %c0_130 = arith.constant 0 : index
    %157 = vector.load %arg3[%c19, %c0_129, %c0_130] : memref<49x16x16xbf16, #tpu.memory_space<vmem>>, vector<1x16x16xbf16>
    %158 = vector.shape_cast %157 : vector<1x16x16xbf16> to vector<16x16xbf16>
    %c0_i32_131 = arith.constant 0 : i32
    %c0_i32_132 = arith.constant 0 : i32
    %159 = tpu.memref_slice %arg6[%16, %c0_i32_131, %c0_i32_132] : memref<2x16x640xbf16, #tpu.memory_space<vmem>> -> memref<1x16x640xbf16, #tpu.memory_space<vmem>>
    %160 = tpu.memref_squeeze %159 : memref<1x16x640xbf16, #tpu.memory_space<vmem>> -> memref<16x640xbf16, #tpu.memory_space<vmem>>
    %c0_133 = arith.constant 0 : index
    %c122 = arith.constant 122 : index
    %161 = vector.load %160[%c0_133, %c122] : memref<16x640xbf16, #tpu.memory_space<vmem>>, vector<16x384xbf16>
    %cst_134 = arith.constant dense<0.000000e+00> : vector<16x384xf32>
    %162 = tpu.matmul %158, %161, %cst_134 {dimension_numbers = #tpu.dot_dimension_numbers<[1], [0], [0], [1], [0, 0, 1, 1], [], []>} : vector<16x16xbf16>, vector<16x384xbf16>, vector<16x384xf32> -> vector<16x384xf32>
    %163 = arith.addf %156, %162 : vector<16x384xf32>
    %c20 = arith.constant 20 : index
    %c0_135 = arith.constant 0 : index
    %c0_136 = arith.constant 0 : index
    %164 = vector.load %arg3[%c20, %c0_135, %c0_136] : memref<49x16x16xbf16, #tpu.memory_space<vmem>>, vector<1x16x16xbf16>
    %165 = vector.shape_cast %164 : vector<1x16x16xbf16> to vector<16x16xbf16>
    %c0_i32_137 = arith.constant 0 : i32
    %c0_i32_138 = arith.constant 0 : i32
    %166 = tpu.memref_slice %arg6[%16, %c0_i32_137, %c0_i32_138] : memref<2x16x640xbf16, #tpu.memory_space<vmem>> -> memref<1x16x640xbf16, #tpu.memory_space<vmem>>
    %167 = tpu.memref_squeeze %166 : memref<1x16x640xbf16, #tpu.memory_space<vmem>> -> memref<16x640xbf16, #tpu.memory_space<vmem>>
    %c0_139 = arith.constant 0 : index
    %c146 = arith.constant 146 : index
    %168 = vector.load %167[%c0_139, %c146] : memref<16x640xbf16, #tpu.memory_space<vmem>>, vector<16x384xbf16>
    %cst_140 = arith.constant dense<0.000000e+00> : vector<16x384xf32>
    %169 = tpu.matmul %165, %168, %cst_140 {dimension_numbers = #tpu.dot_dimension_numbers<[1], [0], [0], [1], [0, 0, 1, 1], [], []>} : vector<16x16xbf16>, vector<16x384xbf16>, vector<16x384xf32> -> vector<16x384xf32>
    %170 = arith.addf %163, %169 : vector<16x384xf32>
    %c21 = arith.constant 21 : index
    %c0_141 = arith.constant 0 : index
    %c0_142 = arith.constant 0 : index
    %171 = vector.load %arg3[%c21, %c0_141, %c0_142] : memref<49x16x16xbf16, #tpu.memory_space<vmem>>, vector<1x16x16xbf16>
    %172 = vector.shape_cast %171 : vector<1x16x16xbf16> to vector<16x16xbf16>
    %c0_i32_143 = arith.constant 0 : i32
    %c0_i32_144 = arith.constant 0 : i32
    %173 = tpu.memref_slice %arg6[%16, %c0_i32_143, %c0_i32_144] : memref<2x16x640xbf16, #tpu.memory_space<vmem>> -> memref<1x16x640xbf16, #tpu.memory_space<vmem>>
    %174 = tpu.memref_squeeze %173 : memref<1x16x640xbf16, #tpu.memory_space<vmem>> -> memref<16x640xbf16, #tpu.memory_space<vmem>>
    %c0_145 = arith.constant 0 : index
    %c3_146 = arith.constant 3 : index
    %175 = vector.load %174[%c0_145, %c3_146] : memref<16x640xbf16, #tpu.memory_space<vmem>>, vector<16x384xbf16>
    %cst_147 = arith.constant dense<0.000000e+00> : vector<16x384xf32>
    %176 = tpu.matmul %172, %175, %cst_147 {dimension_numbers = #tpu.dot_dimension_numbers<[1], [0], [0], [1], [0, 0, 1, 1], [], []>} : vector<16x16xbf16>, vector<16x384xbf16>, vector<16x384xf32> -> vector<16x384xf32>
    %177 = arith.addf %170, %176 : vector<16x384xf32>
    %c22 = arith.constant 22 : index
    %c0_148 = arith.constant 0 : index
    %c0_149 = arith.constant 0 : index
    %178 = vector.load %arg3[%c22, %c0_148, %c0_149] : memref<49x16x16xbf16, #tpu.memory_space<vmem>>, vector<1x16x16xbf16>
    %179 = vector.shape_cast %178 : vector<1x16x16xbf16> to vector<16x16xbf16>
    %c0_i32_150 = arith.constant 0 : i32
    %c0_i32_151 = arith.constant 0 : i32
    %180 = tpu.memref_slice %arg6[%16, %c0_i32_150, %c0_i32_151] : memref<2x16x640xbf16, #tpu.memory_space<vmem>> -> memref<1x16x640xbf16, #tpu.memory_space<vmem>>
    %181 = tpu.memref_squeeze %180 : memref<1x16x640xbf16, #tpu.memory_space<vmem>> -> memref<16x640xbf16, #tpu.memory_space<vmem>>
    %c0_152 = arith.constant 0 : index
    %c27 = arith.constant 27 : index
    %182 = vector.load %181[%c0_152, %c27] : memref<16x640xbf16, #tpu.memory_space<vmem>>, vector<16x384xbf16>
    %cst_153 = arith.constant dense<0.000000e+00> : vector<16x384xf32>
    %183 = tpu.matmul %179, %182, %cst_153 {dimension_numbers = #tpu.dot_dimension_numbers<[1], [0], [0], [1], [0, 0, 1, 1], [], []>} : vector<16x16xbf16>, vector<16x384xbf16>, vector<16x384xf32> -> vector<16x384xf32>
    %184 = arith.addf %177, %183 : vector<16x384xf32>
    %c23 = arith.constant 23 : index
    %c0_154 = arith.constant 0 : index
    %c0_155 = arith.constant 0 : index
    %185 = vector.load %arg3[%c23, %c0_154, %c0_155] : memref<49x16x16xbf16, #tpu.memory_space<vmem>>, vector<1x16x16xbf16>
    %186 = vector.shape_cast %185 : vector<1x16x16xbf16> to vector<16x16xbf16>
    %c0_i32_156 = arith.constant 0 : i32
    %c0_i32_157 = arith.constant 0 : i32
    %187 = tpu.memref_slice %arg6[%16, %c0_i32_156, %c0_i32_157] : memref<2x16x640xbf16, #tpu.memory_space<vmem>> -> memref<1x16x640xbf16, #tpu.memory_space<vmem>>
    %188 = tpu.memref_squeeze %187 : memref<1x16x640xbf16, #tpu.memory_space<vmem>> -> memref<16x640xbf16, #tpu.memory_space<vmem>>
    %c0_158 = arith.constant 0 : index
    %c51 = arith.constant 51 : index
    %189 = vector.load %188[%c0_158, %c51] : memref<16x640xbf16, #tpu.memory_space<vmem>>, vector<16x384xbf16>
    %cst_159 = arith.constant dense<0.000000e+00> : vector<16x384xf32>
    %190 = tpu.matmul %186, %189, %cst_159 {dimension_numbers = #tpu.dot_dimension_numbers<[1], [0], [0], [1], [0, 0, 1, 1], [], []>} : vector<16x16xbf16>, vector<16x384xbf16>, vector<16x384xf32> -> vector<16x384xf32>
    %191 = arith.addf %184, %190 : vector<16x384xf32>
    %c24_160 = arith.constant 24 : index
    %c0_161 = arith.constant 0 : index
    %c0_162 = arith.constant 0 : index
    %192 = vector.load %arg3[%c24_160, %c0_161, %c0_162] : memref<49x16x16xbf16, #tpu.memory_space<vmem>>, vector<1x16x16xbf16>
    %193 = vector.shape_cast %192 : vector<1x16x16xbf16> to vector<16x16xbf16>
    %c0_i32_163 = arith.constant 0 : i32
    %c0_i32_164 = arith.constant 0 : i32
    %194 = tpu.memref_slice %arg6[%16, %c0_i32_163, %c0_i32_164] : memref<2x16x640xbf16, #tpu.memory_space<vmem>> -> memref<1x16x640xbf16, #tpu.memory_space<vmem>>
    %195 = tpu.memref_squeeze %194 : memref<1x16x640xbf16, #tpu.memory_space<vmem>> -> memref<16x640xbf16, #tpu.memory_space<vmem>>
    %c0_165 = arith.constant 0 : index
    %c75 = arith.constant 75 : index
    %196 = vector.load %195[%c0_165, %c75] : memref<16x640xbf16, #tpu.memory_space<vmem>>, vector<16x384xbf16>
    %cst_166 = arith.constant dense<0.000000e+00> : vector<16x384xf32>
    %197 = tpu.matmul %193, %196, %cst_166 {dimension_numbers = #tpu.dot_dimension_numbers<[1], [0], [0], [1], [0, 0, 1, 1], [], []>} : vector<16x16xbf16>, vector<16x384xbf16>, vector<16x384xf32> -> vector<16x384xf32>
    %198 = arith.addf %191, %197 : vector<16x384xf32>
    %c25_167 = arith.constant 25 : index
    %c0_168 = arith.constant 0 : index
    %c0_169 = arith.constant 0 : index
    %199 = vector.load %arg3[%c25_167, %c0_168, %c0_169] : memref<49x16x16xbf16, #tpu.memory_space<vmem>>, vector<1x16x16xbf16>
    %200 = vector.shape_cast %199 : vector<1x16x16xbf16> to vector<16x16xbf16>
    %c0_i32_170 = arith.constant 0 : i32
    %c0_i32_171 = arith.constant 0 : i32
    %201 = tpu.memref_slice %arg6[%16, %c0_i32_170, %c0_i32_171] : memref<2x16x640xbf16, #tpu.memory_space<vmem>> -> memref<1x16x640xbf16, #tpu.memory_space<vmem>>
    %202 = tpu.memref_squeeze %201 : memref<1x16x640xbf16, #tpu.memory_space<vmem>> -> memref<16x640xbf16, #tpu.memory_space<vmem>>
    %c0_172 = arith.constant 0 : index
    %c99 = arith.constant 99 : index
    %203 = vector.load %202[%c0_172, %c99] : memref<16x640xbf16, #tpu.memory_space<vmem>>, vector<16x384xbf16>
    %cst_173 = arith.constant dense<0.000000e+00> : vector<16x384xf32>
    %204 = tpu.matmul %200, %203, %cst_173 {dimension_numbers = #tpu.dot_dimension_numbers<[1], [0], [0], [1], [0, 0, 1, 1], [], []>} : vector<16x16xbf16>, vector<16x384xbf16>, vector<16x384xf32> -> vector<16x384xf32>
    %205 = arith.addf %198, %204 : vector<16x384xf32>
    %c26_174 = arith.constant 26 : index
    %c0_175 = arith.constant 0 : index
    %c0_176 = arith.constant 0 : index
    %206 = vector.load %arg3[%c26_174, %c0_175, %c0_176] : memref<49x16x16xbf16, #tpu.memory_space<vmem>>, vector<1x16x16xbf16>
    %207 = vector.shape_cast %206 : vector<1x16x16xbf16> to vector<16x16xbf16>
    %c0_i32_177 = arith.constant 0 : i32
    %c0_i32_178 = arith.constant 0 : i32
    %208 = tpu.memref_slice %arg6[%16, %c0_i32_177, %c0_i32_178] : memref<2x16x640xbf16, #tpu.memory_space<vmem>> -> memref<1x16x640xbf16, #tpu.memory_space<vmem>>
    %209 = tpu.memref_squeeze %208 : memref<1x16x640xbf16, #tpu.memory_space<vmem>> -> memref<16x640xbf16, #tpu.memory_space<vmem>>
    %c0_179 = arith.constant 0 : index
    %c123 = arith.constant 123 : index
    %210 = vector.load %209[%c0_179, %c123] : memref<16x640xbf16, #tpu.memory_space<vmem>>, vector<16x384xbf16>
    %cst_180 = arith.constant dense<0.000000e+00> : vector<16x384xf32>
    %211 = tpu.matmul %207, %210, %cst_180 {dimension_numbers = #tpu.dot_dimension_numbers<[1], [0], [0], [1], [0, 0, 1, 1], [], []>} : vector<16x16xbf16>, vector<16x384xbf16>, vector<16x384xf32> -> vector<16x384xf32>
    %212 = arith.addf %205, %211 : vector<16x384xf32>
    %c27_181 = arith.constant 27 : index
    %c0_182 = arith.constant 0 : index
    %c0_183 = arith.constant 0 : index
    %213 = vector.load %arg3[%c27_181, %c0_182, %c0_183] : memref<49x16x16xbf16, #tpu.memory_space<vmem>>, vector<1x16x16xbf16>
    %214 = vector.shape_cast %213 : vector<1x16x16xbf16> to vector<16x16xbf16>
    %c0_i32_184 = arith.constant 0 : i32
    %c0_i32_185 = arith.constant 0 : i32
    %215 = tpu.memref_slice %arg6[%16, %c0_i32_184, %c0_i32_185] : memref<2x16x640xbf16, #tpu.memory_space<vmem>> -> memref<1x16x640xbf16, #tpu.memory_space<vmem>>
    %216 = tpu.memref_squeeze %215 : memref<1x16x640xbf16, #tpu.memory_space<vmem>> -> memref<16x640xbf16, #tpu.memory_space<vmem>>
    %c0_186 = arith.constant 0 : index
    %c147 = arith.constant 147 : index
    %217 = vector.load %216[%c0_186, %c147] : memref<16x640xbf16, #tpu.memory_space<vmem>>, vector<16x384xbf16>
    %cst_187 = arith.constant dense<0.000000e+00> : vector<16x384xf32>
    %218 = tpu.matmul %214, %217, %cst_187 {dimension_numbers = #tpu.dot_dimension_numbers<[1], [0], [0], [1], [0, 0, 1, 1], [], []>} : vector<16x16xbf16>, vector<16x384xbf16>, vector<16x384xf32> -> vector<16x384xf32>
    %219 = arith.addf %212, %218 : vector<16x384xf32>
    %c28 = arith.constant 28 : index
    %c0_188 = arith.constant 0 : index
    %c0_189 = arith.constant 0 : index
    %220 = vector.load %arg3[%c28, %c0_188, %c0_189] : memref<49x16x16xbf16, #tpu.memory_space<vmem>>, vector<1x16x16xbf16>
    %221 = vector.shape_cast %220 : vector<1x16x16xbf16> to vector<16x16xbf16>
    %c0_i32_190 = arith.constant 0 : i32
    %c0_i32_191 = arith.constant 0 : i32
    %222 = tpu.memref_slice %arg6[%16, %c0_i32_190, %c0_i32_191] : memref<2x16x640xbf16, #tpu.memory_space<vmem>> -> memref<1x16x640xbf16, #tpu.memory_space<vmem>>
    %223 = tpu.memref_squeeze %222 : memref<1x16x640xbf16, #tpu.memory_space<vmem>> -> memref<16x640xbf16, #tpu.memory_space<vmem>>
    %c0_192 = arith.constant 0 : index
    %c4_193 = arith.constant 4 : index
    %224 = vector.load %223[%c0_192, %c4_193] : memref<16x640xbf16, #tpu.memory_space<vmem>>, vector<16x384xbf16>
    %cst_194 = arith.constant dense<0.000000e+00> : vector<16x384xf32>
    %225 = tpu.matmul %221, %224, %cst_194 {dimension_numbers = #tpu.dot_dimension_numbers<[1], [0], [0], [1], [0, 0, 1, 1], [], []>} : vector<16x16xbf16>, vector<16x384xbf16>, vector<16x384xf32> -> vector<16x384xf32>
    %226 = arith.addf %219, %225 : vector<16x384xf32>
    %c29 = arith.constant 29 : index
    %c0_195 = arith.constant 0 : index
    %c0_196 = arith.constant 0 : index
    %227 = vector.load %arg3[%c29, %c0_195, %c0_196] : memref<49x16x16xbf16, #tpu.memory_space<vmem>>, vector<1x16x16xbf16>
    %228 = vector.shape_cast %227 : vector<1x16x16xbf16> to vector<16x16xbf16>
    %c0_i32_197 = arith.constant 0 : i32
    %c0_i32_198 = arith.constant 0 : i32
    %229 = tpu.memref_slice %arg6[%16, %c0_i32_197, %c0_i32_198] : memref<2x16x640xbf16, #tpu.memory_space<vmem>> -> memref<1x16x640xbf16, #tpu.memory_space<vmem>>
    %230 = tpu.memref_squeeze %229 : memref<1x16x640xbf16, #tpu.memory_space<vmem>> -> memref<16x640xbf16, #tpu.memory_space<vmem>>
    %c0_199 = arith.constant 0 : index
    %c28_200 = arith.constant 28 : index
    %231 = vector.load %230[%c0_199, %c28_200] : memref<16x640xbf16, #tpu.memory_space<vmem>>, vector<16x384xbf16>
    %cst_201 = arith.constant dense<0.000000e+00> : vector<16x384xf32>
    %232 = tpu.matmul %228, %231, %cst_201 {dimension_numbers = #tpu.dot_dimension_numbers<[1], [0], [0], [1], [0, 0, 1, 1], [], []>} : vector<16x16xbf16>, vector<16x384xbf16>, vector<16x384xf32> -> vector<16x384xf32>
    %233 = arith.addf %226, %232 : vector<16x384xf32>
    %c30 = arith.constant 30 : index
    %c0_202 = arith.constant 0 : index
    %c0_203 = arith.constant 0 : index
    %234 = vector.load %arg3[%c30, %c0_202, %c0_203] : memref<49x16x16xbf16, #tpu.memory_space<vmem>>, vector<1x16x16xbf16>
    %235 = vector.shape_cast %234 : vector<1x16x16xbf16> to vector<16x16xbf16>
    %c0_i32_204 = arith.constant 0 : i32
    %c0_i32_205 = arith.constant 0 : i32
    %236 = tpu.memref_slice %arg6[%16, %c0_i32_204, %c0_i32_205] : memref<2x16x640xbf16, #tpu.memory_space<vmem>> -> memref<1x16x640xbf16, #tpu.memory_space<vmem>>
    %237 = tpu.memref_squeeze %236 : memref<1x16x640xbf16, #tpu.memory_space<vmem>> -> memref<16x640xbf16, #tpu.memory_space<vmem>>
    %c0_206 = arith.constant 0 : index
    %c52 = arith.constant 52 : index
    %238 = vector.load %237[%c0_206, %c52] : memref<16x640xbf16, #tpu.memory_space<vmem>>, vector<16x384xbf16>
    %cst_207 = arith.constant dense<0.000000e+00> : vector<16x384xf32>
    %239 = tpu.matmul %235, %238, %cst_207 {dimension_numbers = #tpu.dot_dimension_numbers<[1], [0], [0], [1], [0, 0, 1, 1], [], []>} : vector<16x16xbf16>, vector<16x384xbf16>, vector<16x384xf32> -> vector<16x384xf32>
    %240 = arith.addf %233, %239 : vector<16x384xf32>
    %c31 = arith.constant 31 : index
    %c0_208 = arith.constant 0 : index
    %c0_209 = arith.constant 0 : index
    %241 = vector.load %arg3[%c31, %c0_208, %c0_209] : memref<49x16x16xbf16, #tpu.memory_space<vmem>>, vector<1x16x16xbf16>
    %242 = vector.shape_cast %241 : vector<1x16x16xbf16> to vector<16x16xbf16>
    %c0_i32_210 = arith.constant 0 : i32
    %c0_i32_211 = arith.constant 0 : i32
    %243 = tpu.memref_slice %arg6[%16, %c0_i32_210, %c0_i32_211] : memref<2x16x640xbf16, #tpu.memory_space<vmem>> -> memref<1x16x640xbf16, #tpu.memory_space<vmem>>
    %244 = tpu.memref_squeeze %243 : memref<1x16x640xbf16, #tpu.memory_space<vmem>> -> memref<16x640xbf16, #tpu.memory_space<vmem>>
    %c0_212 = arith.constant 0 : index
    %c76 = arith.constant 76 : index
    %245 = vector.load %244[%c0_212, %c76] : memref<16x640xbf16, #tpu.memory_space<vmem>>, vector<16x384xbf16>
    %cst_213 = arith.constant dense<0.000000e+00> : vector<16x384xf32>
    %246 = tpu.matmul %242, %245, %cst_213 {dimension_numbers = #tpu.dot_dimension_numbers<[1], [0], [0], [1], [0, 0, 1, 1], [], []>} : vector<16x16xbf16>, vector<16x384xbf16>, vector<16x384xf32> -> vector<16x384xf32>
    %247 = arith.addf %240, %246 : vector<16x384xf32>
    %c32 = arith.constant 32 : index
    %c0_214 = arith.constant 0 : index
    %c0_215 = arith.constant 0 : index
    %248 = vector.load %arg3[%c32, %c0_214, %c0_215] : memref<49x16x16xbf16, #tpu.memory_space<vmem>>, vector<1x16x16xbf16>
    %249 = vector.shape_cast %248 : vector<1x16x16xbf16> to vector<16x16xbf16>
    %c0_i32_216 = arith.constant 0 : i32
    %c0_i32_217 = arith.constant 0 : i32
    %250 = tpu.memref_slice %arg6[%16, %c0_i32_216, %c0_i32_217] : memref<2x16x640xbf16, #tpu.memory_space<vmem>> -> memref<1x16x640xbf16, #tpu.memory_space<vmem>>
    %251 = tpu.memref_squeeze %250 : memref<1x16x640xbf16, #tpu.memory_space<vmem>> -> memref<16x640xbf16, #tpu.memory_space<vmem>>
    %c0_218 = arith.constant 0 : index
    %c100 = arith.constant 100 : index
    %252 = vector.load %251[%c0_218, %c100] : memref<16x640xbf16, #tpu.memory_space<vmem>>, vector<16x384xbf16>
    %cst_219 = arith.constant dense<0.000000e+00> : vector<16x384xf32>
    %253 = tpu.matmul %249, %252, %cst_219 {dimension_numbers = #tpu.dot_dimension_numbers<[1], [0], [0], [1], [0, 0, 1, 1], [], []>} : vector<16x16xbf16>, vector<16x384xbf16>, vector<16x384xf32> -> vector<16x384xf32>
    %254 = arith.addf %247, %253 : vector<16x384xf32>
    %c33 = arith.constant 33 : index
    %c0_220 = arith.constant 0 : index
    %c0_221 = arith.constant 0 : index
    %255 = vector.load %arg3[%c33, %c0_220, %c0_221] : memref<49x16x16xbf16, #tpu.memory_space<vmem>>, vector<1x16x16xbf16>
    %256 = vector.shape_cast %255 : vector<1x16x16xbf16> to vector<16x16xbf16>
    %c0_i32_222 = arith.constant 0 : i32
    %c0_i32_223 = arith.constant 0 : i32
    %257 = tpu.memref_slice %arg6[%16, %c0_i32_222, %c0_i32_223] : memref<2x16x640xbf16, #tpu.memory_space<vmem>> -> memref<1x16x640xbf16, #tpu.memory_space<vmem>>
    %258 = tpu.memref_squeeze %257 : memref<1x16x640xbf16, #tpu.memory_space<vmem>> -> memref<16x640xbf16, #tpu.memory_space<vmem>>
    %c0_224 = arith.constant 0 : index
    %c124 = arith.constant 124 : index
    %259 = vector.load %258[%c0_224, %c124] : memref<16x640xbf16, #tpu.memory_space<vmem>>, vector<16x384xbf16>
    %cst_225 = arith.constant dense<0.000000e+00> : vector<16x384xf32>
    %260 = tpu.matmul %256, %259, %cst_225 {dimension_numbers = #tpu.dot_dimension_numbers<[1], [0], [0], [1], [0, 0, 1, 1], [], []>} : vector<16x16xbf16>, vector<16x384xbf16>, vector<16x384xf32> -> vector<16x384xf32>
    %261 = arith.addf %254, %260 : vector<16x384xf32>
    %c34 = arith.constant 34 : index
    %c0_226 = arith.constant 0 : index
    %c0_227 = arith.constant 0 : index
    %262 = vector.load %arg3[%c34, %c0_226, %c0_227] : memref<49x16x16xbf16, #tpu.memory_space<vmem>>, vector<1x16x16xbf16>
    %263 = vector.shape_cast %262 : vector<1x16x16xbf16> to vector<16x16xbf16>
    %c0_i32_228 = arith.constant 0 : i32
    %c0_i32_229 = arith.constant 0 : i32
    %264 = tpu.memref_slice %arg6[%16, %c0_i32_228, %c0_i32_229] : memref<2x16x640xbf16, #tpu.memory_space<vmem>> -> memref<1x16x640xbf16, #tpu.memory_space<vmem>>
    %265 = tpu.memref_squeeze %264 : memref<1x16x640xbf16, #tpu.memory_space<vmem>> -> memref<16x640xbf16, #tpu.memory_space<vmem>>
    %c0_230 = arith.constant 0 : index
    %c148 = arith.constant 148 : index
    %266 = vector.load %265[%c0_230, %c148] : memref<16x640xbf16, #tpu.memory_space<vmem>>, vector<16x384xbf16>
    %cst_231 = arith.constant dense<0.000000e+00> : vector<16x384xf32>
    %267 = tpu.matmul %263, %266, %cst_231 {dimension_numbers = #tpu.dot_dimension_numbers<[1], [0], [0], [1], [0, 0, 1, 1], [], []>} : vector<16x16xbf16>, vector<16x384xbf16>, vector<16x384xf32> -> vector<16x384xf32>
    %268 = arith.addf %261, %267 : vector<16x384xf32>
    %c35 = arith.constant 35 : index
    %c0_232 = arith.constant 0 : index
    %c0_233 = arith.constant 0 : index
    %269 = vector.load %arg3[%c35, %c0_232, %c0_233] : memref<49x16x16xbf16, #tpu.memory_space<vmem>>, vector<1x16x16xbf16>
    %270 = vector.shape_cast %269 : vector<1x16x16xbf16> to vector<16x16xbf16>
    %c0_i32_234 = arith.constant 0 : i32
    %c0_i32_235 = arith.constant 0 : i32
    %271 = tpu.memref_slice %arg6[%16, %c0_i32_234, %c0_i32_235] : memref<2x16x640xbf16, #tpu.memory_space<vmem>> -> memref<1x16x640xbf16, #tpu.memory_space<vmem>>
    %272 = tpu.memref_squeeze %271 : memref<1x16x640xbf16, #tpu.memory_space<vmem>> -> memref<16x640xbf16, #tpu.memory_space<vmem>>
    %c0_236 = arith.constant 0 : index
    %c5_237 = arith.constant 5 : index
    %273 = vector.load %272[%c0_236, %c5_237] : memref<16x640xbf16, #tpu.memory_space<vmem>>, vector<16x384xbf16>
    %cst_238 = arith.constant dense<0.000000e+00> : vector<16x384xf32>
    %274 = tpu.matmul %270, %273, %cst_238 {dimension_numbers = #tpu.dot_dimension_numbers<[1], [0], [0], [1], [0, 0, 1, 1], [], []>} : vector<16x16xbf16>, vector<16x384xbf16>, vector<16x384xf32> -> vector<16x384xf32>
    %275 = arith.addf %268, %274 : vector<16x384xf32>
    %c36 = arith.constant 36 : index
    %c0_239 = arith.constant 0 : index
    %c0_240 = arith.constant 0 : index
    %276 = vector.load %arg3[%c36, %c0_239, %c0_240] : memref<49x16x16xbf16, #tpu.memory_space<vmem>>, vector<1x16x16xbf16>
    %277 = vector.shape_cast %276 : vector<1x16x16xbf16> to vector<16x16xbf16>
    %c0_i32_241 = arith.constant 0 : i32
    %c0_i32_242 = arith.constant 0 : i32
    %278 = tpu.memref_slice %arg6[%16, %c0_i32_241, %c0_i32_242] : memref<2x16x640xbf16, #tpu.memory_space<vmem>> -> memref<1x16x640xbf16, #tpu.memory_space<vmem>>
    %279 = tpu.memref_squeeze %278 : memref<1x16x640xbf16, #tpu.memory_space<vmem>> -> memref<16x640xbf16, #tpu.memory_space<vmem>>
    %c0_243 = arith.constant 0 : index
    %c29_244 = arith.constant 29 : index
    %280 = vector.load %279[%c0_243, %c29_244] : memref<16x640xbf16, #tpu.memory_space<vmem>>, vector<16x384xbf16>
    %cst_245 = arith.constant dense<0.000000e+00> : vector<16x384xf32>
    %281 = tpu.matmul %277, %280, %cst_245 {dimension_numbers = #tpu.dot_dimension_numbers<[1], [0], [0], [1], [0, 0, 1, 1], [], []>} : vector<16x16xbf16>, vector<16x384xbf16>, vector<16x384xf32> -> vector<16x384xf32>
    %282 = arith.addf %275, %281 : vector<16x384xf32>
    %c37 = arith.constant 37 : index
    %c0_246 = arith.constant 0 : index
    %c0_247 = arith.constant 0 : index
    %283 = vector.load %arg3[%c37, %c0_246, %c0_247] : memref<49x16x16xbf16, #tpu.memory_space<vmem>>, vector<1x16x16xbf16>
    %284 = vector.shape_cast %283 : vector<1x16x16xbf16> to vector<16x16xbf16>
    %c0_i32_248 = arith.constant 0 : i32
    %c0_i32_249 = arith.constant 0 : i32
    %285 = tpu.memref_slice %arg6[%16, %c0_i32_248, %c0_i32_249] : memref<2x16x640xbf16, #tpu.memory_space<vmem>> -> memref<1x16x640xbf16, #tpu.memory_space<vmem>>
    %286 = tpu.memref_squeeze %285 : memref<1x16x640xbf16, #tpu.memory_space<vmem>> -> memref<16x640xbf16, #tpu.memory_space<vmem>>
    %c0_250 = arith.constant 0 : index
    %c53 = arith.constant 53 : index
    %287 = vector.load %286[%c0_250, %c53] : memref<16x640xbf16, #tpu.memory_space<vmem>>, vector<16x384xbf16>
    %cst_251 = arith.constant dense<0.000000e+00> : vector<16x384xf32>
    %288 = tpu.matmul %284, %287, %cst_251 {dimension_numbers = #tpu.dot_dimension_numbers<[1], [0], [0], [1], [0, 0, 1, 1], [], []>} : vector<16x16xbf16>, vector<16x384xbf16>, vector<16x384xf32> -> vector<16x384xf32>
    %289 = arith.addf %282, %288 : vector<16x384xf32>
    %c38 = arith.constant 38 : index
    %c0_252 = arith.constant 0 : index
    %c0_253 = arith.constant 0 : index
    %290 = vector.load %arg3[%c38, %c0_252, %c0_253] : memref<49x16x16xbf16, #tpu.memory_space<vmem>>, vector<1x16x16xbf16>
    %291 = vector.shape_cast %290 : vector<1x16x16xbf16> to vector<16x16xbf16>
    %c0_i32_254 = arith.constant 0 : i32
    %c0_i32_255 = arith.constant 0 : i32
    %292 = tpu.memref_slice %arg6[%16, %c0_i32_254, %c0_i32_255] : memref<2x16x640xbf16, #tpu.memory_space<vmem>> -> memref<1x16x640xbf16, #tpu.memory_space<vmem>>
    %293 = tpu.memref_squeeze %292 : memref<1x16x640xbf16, #tpu.memory_space<vmem>> -> memref<16x640xbf16, #tpu.memory_space<vmem>>
    %c0_256 = arith.constant 0 : index
    %c77 = arith.constant 77 : index
    %294 = vector.load %293[%c0_256, %c77] : memref<16x640xbf16, #tpu.memory_space<vmem>>, vector<16x384xbf16>
    %cst_257 = arith.constant dense<0.000000e+00> : vector<16x384xf32>
    %295 = tpu.matmul %291, %294, %cst_257 {dimension_numbers = #tpu.dot_dimension_numbers<[1], [0], [0], [1], [0, 0, 1, 1], [], []>} : vector<16x16xbf16>, vector<16x384xbf16>, vector<16x384xf32> -> vector<16x384xf32>
    %296 = arith.addf %289, %295 : vector<16x384xf32>
    %c39 = arith.constant 39 : index
    %c0_258 = arith.constant 0 : index
    %c0_259 = arith.constant 0 : index
    %297 = vector.load %arg3[%c39, %c0_258, %c0_259] : memref<49x16x16xbf16, #tpu.memory_space<vmem>>, vector<1x16x16xbf16>
    %298 = vector.shape_cast %297 : vector<1x16x16xbf16> to vector<16x16xbf16>
    %c0_i32_260 = arith.constant 0 : i32
    %c0_i32_261 = arith.constant 0 : i32
    %299 = tpu.memref_slice %arg6[%16, %c0_i32_260, %c0_i32_261] : memref<2x16x640xbf16, #tpu.memory_space<vmem>> -> memref<1x16x640xbf16, #tpu.memory_space<vmem>>
    %300 = tpu.memref_squeeze %299 : memref<1x16x640xbf16, #tpu.memory_space<vmem>> -> memref<16x640xbf16, #tpu.memory_space<vmem>>
    %c0_262 = arith.constant 0 : index
    %c101 = arith.constant 101 : index
    %301 = vector.load %300[%c0_262, %c101] : memref<16x640xbf16, #tpu.memory_space<vmem>>, vector<16x384xbf16>
    %cst_263 = arith.constant dense<0.000000e+00> : vector<16x384xf32>
    %302 = tpu.matmul %298, %301, %cst_263 {dimension_numbers = #tpu.dot_dimension_numbers<[1], [0], [0], [1], [0, 0, 1, 1], [], []>} : vector<16x16xbf16>, vector<16x384xbf16>, vector<16x384xf32> -> vector<16x384xf32>
    %303 = arith.addf %296, %302 : vector<16x384xf32>
    %c40 = arith.constant 40 : index
    %c0_264 = arith.constant 0 : index
    %c0_265 = arith.constant 0 : index
    %304 = vector.load %arg3[%c40, %c0_264, %c0_265] : memref<49x16x16xbf16, #tpu.memory_space<vmem>>, vector<1x16x16xbf16>
    %305 = vector.shape_cast %304 : vector<1x16x16xbf16> to vector<16x16xbf16>
    %c0_i32_266 = arith.constant 0 : i32
    %c0_i32_267 = arith.constant 0 : i32
    %306 = tpu.memref_slice %arg6[%16, %c0_i32_266, %c0_i32_267] : memref<2x16x640xbf16, #tpu.memory_space<vmem>> -> memref<1x16x640xbf16, #tpu.memory_space<vmem>>
    %307 = tpu.memref_squeeze %306 : memref<1x16x640xbf16, #tpu.memory_space<vmem>> -> memref<16x640xbf16, #tpu.memory_space<vmem>>
    %c0_268 = arith.constant 0 : index
    %c125 = arith.constant 125 : index
    %308 = vector.load %307[%c0_268, %c125] : memref<16x640xbf16, #tpu.memory_space<vmem>>, vector<16x384xbf16>
    %cst_269 = arith.constant dense<0.000000e+00> : vector<16x384xf32>
    %309 = tpu.matmul %305, %308, %cst_269 {dimension_numbers = #tpu.dot_dimension_numbers<[1], [0], [0], [1], [0, 0, 1, 1], [], []>} : vector<16x16xbf16>, vector<16x384xbf16>, vector<16x384xf32> -> vector<16x384xf32>
    %310 = arith.addf %303, %309 : vector<16x384xf32>
    %c41 = arith.constant 41 : index
    %c0_270 = arith.constant 0 : index
    %c0_271 = arith.constant 0 : index
    %311 = vector.load %arg3[%c41, %c0_270, %c0_271] : memref<49x16x16xbf16, #tpu.memory_space<vmem>>, vector<1x16x16xbf16>
    %312 = vector.shape_cast %311 : vector<1x16x16xbf16> to vector<16x16xbf16>
    %c0_i32_272 = arith.constant 0 : i32
    %c0_i32_273 = arith.constant 0 : i32
    %313 = tpu.memref_slice %arg6[%16, %c0_i32_272, %c0_i32_273] : memref<2x16x640xbf16, #tpu.memory_space<vmem>> -> memref<1x16x640xbf16, #tpu.memory_space<vmem>>
    %314 = tpu.memref_squeeze %313 : memref<1x16x640xbf16, #tpu.memory_space<vmem>> -> memref<16x640xbf16, #tpu.memory_space<vmem>>
    %c0_274 = arith.constant 0 : index
    %c149 = arith.constant 149 : index
    %315 = vector.load %314[%c0_274, %c149] : memref<16x640xbf16, #tpu.memory_space<vmem>>, vector<16x384xbf16>
    %cst_275 = arith.constant dense<0.000000e+00> : vector<16x384xf32>
    %316 = tpu.matmul %312, %315, %cst_275 {dimension_numbers = #tpu.dot_dimension_numbers<[1], [0], [0], [1], [0, 0, 1, 1], [], []>} : vector<16x16xbf16>, vector<16x384xbf16>, vector<16x384xf32> -> vector<16x384xf32>
    %317 = arith.addf %310, %316 : vector<16x384xf32>
    %c42 = arith.constant 42 : index
    %c0_276 = arith.constant 0 : index
    %c0_277 = arith.constant 0 : index
    %318 = vector.load %arg3[%c42, %c0_276, %c0_277] : memref<49x16x16xbf16, #tpu.memory_space<vmem>>, vector<1x16x16xbf16>
    %319 = vector.shape_cast %318 : vector<1x16x16xbf16> to vector<16x16xbf16>
    %c0_i32_278 = arith.constant 0 : i32
    %c0_i32_279 = arith.constant 0 : i32
    %320 = tpu.memref_slice %arg6[%16, %c0_i32_278, %c0_i32_279] : memref<2x16x640xbf16, #tpu.memory_space<vmem>> -> memref<1x16x640xbf16, #tpu.memory_space<vmem>>
    %321 = tpu.memref_squeeze %320 : memref<1x16x640xbf16, #tpu.memory_space<vmem>> -> memref<16x640xbf16, #tpu.memory_space<vmem>>
    %c0_280 = arith.constant 0 : index
    %c6_281 = arith.constant 6 : index
    %322 = vector.load %321[%c0_280, %c6_281] : memref<16x640xbf16, #tpu.memory_space<vmem>>, vector<16x384xbf16>
    %cst_282 = arith.constant dense<0.000000e+00> : vector<16x384xf32>
    %323 = tpu.matmul %319, %322, %cst_282 {dimension_numbers = #tpu.dot_dimension_numbers<[1], [0], [0], [1], [0, 0, 1, 1], [], []>} : vector<16x16xbf16>, vector<16x384xbf16>, vector<16x384xf32> -> vector<16x384xf32>
    %324 = arith.addf %317, %323 : vector<16x384xf32>
    %c43 = arith.constant 43 : index
    %c0_283 = arith.constant 0 : index
    %c0_284 = arith.constant 0 : index
    %325 = vector.load %arg3[%c43, %c0_283, %c0_284] : memref<49x16x16xbf16, #tpu.memory_space<vmem>>, vector<1x16x16xbf16>
    %326 = vector.shape_cast %325 : vector<1x16x16xbf16> to vector<16x16xbf16>
    %c0_i32_285 = arith.constant 0 : i32
    %c0_i32_286 = arith.constant 0 : i32
    %327 = tpu.memref_slice %arg6[%16, %c0_i32_285, %c0_i32_286] : memref<2x16x640xbf16, #tpu.memory_space<vmem>> -> memref<1x16x640xbf16, #tpu.memory_space<vmem>>
    %328 = tpu.memref_squeeze %327 : memref<1x16x640xbf16, #tpu.memory_space<vmem>> -> memref<16x640xbf16, #tpu.memory_space<vmem>>
    %c0_287 = arith.constant 0 : index
    %c30_288 = arith.constant 30 : index
    %329 = vector.load %328[%c0_287, %c30_288] : memref<16x640xbf16, #tpu.memory_space<vmem>>, vector<16x384xbf16>
    %cst_289 = arith.constant dense<0.000000e+00> : vector<16x384xf32>
    %330 = tpu.matmul %326, %329, %cst_289 {dimension_numbers = #tpu.dot_dimension_numbers<[1], [0], [0], [1], [0, 0, 1, 1], [], []>} : vector<16x16xbf16>, vector<16x384xbf16>, vector<16x384xf32> -> vector<16x384xf32>
    %331 = arith.addf %324, %330 : vector<16x384xf32>
    %c44 = arith.constant 44 : index
    %c0_290 = arith.constant 0 : index
    %c0_291 = arith.constant 0 : index
    %332 = vector.load %arg3[%c44, %c0_290, %c0_291] : memref<49x16x16xbf16, #tpu.memory_space<vmem>>, vector<1x16x16xbf16>
    %333 = vector.shape_cast %332 : vector<1x16x16xbf16> to vector<16x16xbf16>
    %c0_i32_292 = arith.constant 0 : i32
    %c0_i32_293 = arith.constant 0 : i32
    %334 = tpu.memref_slice %arg6[%16, %c0_i32_292, %c0_i32_293] : memref<2x16x640xbf16, #tpu.memory_space<vmem>> -> memref<1x16x640xbf16, #tpu.memory_space<vmem>>
    %335 = tpu.memref_squeeze %334 : memref<1x16x640xbf16, #tpu.memory_space<vmem>> -> memref<16x640xbf16, #tpu.memory_space<vmem>>
    %c0_294 = arith.constant 0 : index
    %c54 = arith.constant 54 : index
    %336 = vector.load %335[%c0_294, %c54] : memref<16x640xbf16, #tpu.memory_space<vmem>>, vector<16x384xbf16>
    %cst_295 = arith.constant dense<0.000000e+00> : vector<16x384xf32>
    %337 = tpu.matmul %333, %336, %cst_295 {dimension_numbers = #tpu.dot_dimension_numbers<[1], [0], [0], [1], [0, 0, 1, 1], [], []>} : vector<16x16xbf16>, vector<16x384xbf16>, vector<16x384xf32> -> vector<16x384xf32>
    %338 = arith.addf %331, %337 : vector<16x384xf32>
    %c45 = arith.constant 45 : index
    %c0_296 = arith.constant 0 : index
    %c0_297 = arith.constant 0 : index
    %339 = vector.load %arg3[%c45, %c0_296, %c0_297] : memref<49x16x16xbf16, #tpu.memory_space<vmem>>, vector<1x16x16xbf16>
    %340 = vector.shape_cast %339 : vector<1x16x16xbf16> to vector<16x16xbf16>
    %c0_i32_298 = arith.constant 0 : i32
    %c0_i32_299 = arith.constant 0 : i32
    %341 = tpu.memref_slice %arg6[%16, %c0_i32_298, %c0_i32_299] : memref<2x16x640xbf16, #tpu.memory_space<vmem>> -> memref<1x16x640xbf16, #tpu.memory_space<vmem>>
    %342 = tpu.memref_squeeze %341 : memref<1x16x640xbf16, #tpu.memory_space<vmem>> -> memref<16x640xbf16, #tpu.memory_space<vmem>>
    %c0_300 = arith.constant 0 : index
    %c78 = arith.constant 78 : index
    %343 = vector.load %342[%c0_300, %c78] : memref<16x640xbf16, #tpu.memory_space<vmem>>, vector<16x384xbf16>
    %cst_301 = arith.constant dense<0.000000e+00> : vector<16x384xf32>
    %344 = tpu.matmul %340, %343, %cst_301 {dimension_numbers = #tpu.dot_dimension_numbers<[1], [0], [0], [1], [0, 0, 1, 1], [], []>} : vector<16x16xbf16>, vector<16x384xbf16>, vector<16x384xf32> -> vector<16x384xf32>
    %345 = arith.addf %338, %344 : vector<16x384xf32>
    %c46 = arith.constant 46 : index
    %c0_302 = arith.constant 0 : index
    %c0_303 = arith.constant 0 : index
    %346 = vector.load %arg3[%c46, %c0_302, %c0_303] : memref<49x16x16xbf16, #tpu.memory_space<vmem>>, vector<1x16x16xbf16>
    %347 = vector.shape_cast %346 : vector<1x16x16xbf16> to vector<16x16xbf16>
    %c0_i32_304 = arith.constant 0 : i32
    %c0_i32_305 = arith.constant 0 : i32
    %348 = tpu.memref_slice %arg6[%16, %c0_i32_304, %c0_i32_305] : memref<2x16x640xbf16, #tpu.memory_space<vmem>> -> memref<1x16x640xbf16, #tpu.memory_space<vmem>>
    %349 = tpu.memref_squeeze %348 : memref<1x16x640xbf16, #tpu.memory_space<vmem>> -> memref<16x640xbf16, #tpu.memory_space<vmem>>
    %c0_306 = arith.constant 0 : index
    %c102 = arith.constant 102 : index
    %350 = vector.load %349[%c0_306, %c102] : memref<16x640xbf16, #tpu.memory_space<vmem>>, vector<16x384xbf16>
    %cst_307 = arith.constant dense<0.000000e+00> : vector<16x384xf32>
    %351 = tpu.matmul %347, %350, %cst_307 {dimension_numbers = #tpu.dot_dimension_numbers<[1], [0], [0], [1], [0, 0, 1, 1], [], []>} : vector<16x16xbf16>, vector<16x384xbf16>, vector<16x384xf32> -> vector<16x384xf32>
    %352 = arith.addf %345, %351 : vector<16x384xf32>
    %c47 = arith.constant 47 : index
    %c0_308 = arith.constant 0 : index
    %c0_309 = arith.constant 0 : index
    %353 = vector.load %arg3[%c47, %c0_308, %c0_309] : memref<49x16x16xbf16, #tpu.memory_space<vmem>>, vector<1x16x16xbf16>
    %354 = vector.shape_cast %353 : vector<1x16x16xbf16> to vector<16x16xbf16>
    %c0_i32_310 = arith.constant 0 : i32
    %c0_i32_311 = arith.constant 0 : i32
    %355 = tpu.memref_slice %arg6[%16, %c0_i32_310, %c0_i32_311] : memref<2x16x640xbf16, #tpu.memory_space<vmem>> -> memref<1x16x640xbf16, #tpu.memory_space<vmem>>
    %356 = tpu.memref_squeeze %355 : memref<1x16x640xbf16, #tpu.memory_space<vmem>> -> memref<16x640xbf16, #tpu.memory_space<vmem>>
    %c0_312 = arith.constant 0 : index
    %c126 = arith.constant 126 : index
    %357 = vector.load %356[%c0_312, %c126] : memref<16x640xbf16, #tpu.memory_space<vmem>>, vector<16x384xbf16>
    %cst_313 = arith.constant dense<0.000000e+00> : vector<16x384xf32>
    %358 = tpu.matmul %354, %357, %cst_313 {dimension_numbers = #tpu.dot_dimension_numbers<[1], [0], [0], [1], [0, 0, 1, 1], [], []>} : vector<16x16xbf16>, vector<16x384xbf16>, vector<16x384xf32> -> vector<16x384xf32>
    %359 = arith.addf %352, %358 : vector<16x384xf32>
    %c48_314 = arith.constant 48 : index
    %c0_315 = arith.constant 0 : index
    %c0_316 = arith.constant 0 : index
    %360 = vector.load %arg3[%c48_314, %c0_315, %c0_316] : memref<49x16x16xbf16, #tpu.memory_space<vmem>>, vector<1x16x16xbf16>
    %361 = vector.shape_cast %360 : vector<1x16x16xbf16> to vector<16x16xbf16>
    %c0_i32_317 = arith.constant 0 : i32
    %c0_i32_318 = arith.constant 0 : i32
    %362 = tpu.memref_slice %arg6[%16, %c0_i32_317, %c0_i32_318] : memref<2x16x640xbf16, #tpu.memory_space<vmem>> -> memref<1x16x640xbf16, #tpu.memory_space<vmem>>
    %363 = tpu.memref_squeeze %362 : memref<1x16x640xbf16, #tpu.memory_space<vmem>> -> memref<16x640xbf16, #tpu.memory_space<vmem>>
    %c0_319 = arith.constant 0 : index
    %c150 = arith.constant 150 : index
    %364 = vector.load %363[%c0_319, %c150] : memref<16x640xbf16, #tpu.memory_space<vmem>>, vector<16x384xbf16>
    %cst_320 = arith.constant dense<0.000000e+00> : vector<16x384xf32>
    %365 = tpu.matmul %361, %364, %cst_320 {dimension_numbers = #tpu.dot_dimension_numbers<[1], [0], [0], [1], [0, 0, 1, 1], [], []>} : vector<16x16xbf16>, vector<16x384xbf16>, vector<16x384xf32> -> vector<16x384xf32>
    %366 = arith.addf %359, %365 : vector<16x384xf32>
    %c0_321 = arith.constant 0 : index
    %c0_322 = arith.constant 0 : index
    %367 = vector.load %arg4[%c0_321, %c0_322] : memref<16x1xf32, #tpu.memory_space<vmem>>, vector<16x1xf32>
    %368 = vector.broadcast %367 : vector<16x1xf32> to vector<16x384xf32>
    %369 = arith.addf %366, %368 : vector<16x384xf32>
    %c0_323 = arith.constant 0 : index
    %c0_324 = arith.constant 0 : index
    %c0_325 = arith.constant 0 : index
    %370 = vector.load %arg5[%c0_323, %c0_324, %c0_325] : memref<1x16x384xf32, #tpu.memory_space<vmem>>, vector<1x16x384xf32>
    %371 = vector.shape_cast %370 : vector<1x16x384xf32> to vector<16x384xf32>
    %372 = vector.shape_cast %369 : vector<16x384xf32> to vector<1x16x384xf32>
    tpu.vector_store %arg5[%c0_323, %c0_324, %c0_325], %372 {strides = array<i32>} : memref<1x16x384xf32, #tpu.memory_space<vmem>>, vector<1x16x384xf32>,
    return
  }
  func.func @transform_1(%arg0: i32, %arg1: i32) -> (i32, i32, i32) {
    %c0_i32 = arith.constant 0 : i32
    %c0_i32_0 = arith.constant 0 : i32
    %c0_i32_1 = arith.constant 0 : i32
    %c0_i32_2 = arith.constant 0 : i32
    return %c0_i32, %c0_i32_0, %c0_i32_1 : i32, i32, i32
  }
  func.func @transform_2(%arg0: i32, %arg1: i32) -> (i32, i32) {
    %c0_i32 = arith.constant 0 : i32
    %c0_i32_0 = arith.constant 0 : i32
    %c0_i32_1 = arith.constant 0 : i32
    return %c0_i32, %c0_i32_0 : i32, i32
  }
  func.func @transform_3(%arg0: i32, %arg1: i32) -> (i32, i32, i32) {
    %c0_i32 = arith.constant 0 : i32
    %c0_i32_0 = arith.constant 0 : i32
    return %arg0, %c0_i32, %arg1 : i32, i32, i32
  }
}

</mosaic_0001>

<bundles_post_ra>
// kernel: tpu_custom_call.1
= control target key start
LH: loop header
LB: loop body
LE: loop exit
PB: predicated region body
PF: predicated region fallthrough
CT: control target
= control target key end

     0   :  { %8 = vsyncpa [#allocation5], 0  ;;  %s9255_s0 = inlined_call_operand.vmem [shape: bf16[2,16,640], index: 0, kind: input, shape index: {}]   ;;  %s9256_s1 = inlined_call_operand.vmem [shape: bf16[49,16,16], index: 1, kind: input, shape index: {}]   ;;  %s9257_s2 = inlined_call_operand.vmem [shape: f32[16,1], index: 2, kind: input, shape index: {}]   ;;  %s9258_s3 = inlined_call_operand.hbm [shape: f32[2,16,384], index: 3, kind: output, shape index: {}]  }
   0x1   :  { %10 = vsyncpa [#allocation5 + $0x1], 0  ;;  %s7387_s12 = smov 0   ;;  %s7389_s13 = smov 0  }
   0x2   :  { %s7391_s14 = smov 0   ;;  %s7393_s15 = smov 0  }
   0x3   :  { %s7395_s16 = smov 0   ;;  %s7397_s17 = smov 0  }
   0x4 LB: > { %s6205_s18 = sadd.s32 4294967295, %s7311_s17   ;;  %s6206_s19 = sadd.s32 4294967294, %s7311_s17   ;;  %s7311_s17 = sphi %s7397_s17, %s16_s17   ;;  %s7307_s16 = sphi %s7395_s16, %s9271_s16   ;;  %s7303_s15 = sphi %s7393_s15, %s9270_s15   ;;  %s7299_s14 = sphi %s7391_s14, %s9269_s14   ;;  %s7295_s13 = sphi %s7389_s13, %s9268_s13   ;;  %s7291_s12 = sphi %s7387_s12, %s9267_s12  }
   0x5   : > { %s28_s20 = sadd.s32 1, %s7307_s16  ;;  %s79_s21 = sadd.s32 1, %s7299_s14 }
   0x6   : > { %p30_p0 = scmp.ge.s32.totalorder %s28_s20, 2  ;;  %p89_p1 = scmp.ne.s32.totalorder %s7299_s14, %s7295_s13 }
   0x7   : > { %p90_p2 = scmp.eq.s32.totalorder %s6205_s18, 1  ;;  %p95_p3 = scmp.ne.s32.totalorder %s7295_s13, %s7291_s12 }
   0x8   : > { %s9273_s20 = smov (%p30_p0, %s28_s20), 0  ;;  %p96_p5 = scmp.eq.s32.totalorder %s6206_s19, 1 }
   0x9   : > { %p7427_p4 = por %p90_p2, %p89_p1  ;;  %s74_s23 = ssub.s32 %s7307_s16, %s9273_s20 }
   0xa   : > { %p6208_p6 = scmp.ge.s32.totalorder %s7311_s17, 1  ;;  %p77_p7 = scmp.eq.s32.totalorder %s74_s23, 0 }
   0xb   : > { %p7434_p8 = por %p96_p5, %p95_p3  ;;  %p120_p9 = scmp.lt.s32.totalorder %s7311_s17, 3 }
   0xc   : > { %s7440_s25 = scalar_select %p77_p7, %s7299_s14, %s79_s21  }
   0xd   : > { %p121_p10 = pnand %p6208_p6, %p120_p9 }
   0xe   : > { %s9259_s26 = sand.u32 (!%p121_p10), 1, %s7295_s13   ;;  %s6479_s27 = smul.u32 (!%p121_p10), 40, %s7303_s15 }
   0xf   : > { %124 = sbr.rel (%p121_p10) target bundleno = 961 (0x3c1), region = 28 }
  0x10   : > { %s7065_s28 = smul.u32 (!%p121_p10), 48, %s9259_s26  ;;  %s149_s4 = scalar_lea.vmem (!%p121_p10), %s9255_s0, %s6479_s27 }
  0x11   : > { %v167_v0 = vld [vmem:[%s149_s4] sm:$0xf] (!%p121_p10)  ;;  %v169_v1 = vld [vmem:[%s149_s4 + $0x14] sm:$0xf] (!%p121_p10)  ;;  %v171_v2 = vld [vmem:[%s149_s4 + $0x4] sm:$0xf] (!%p121_p10) }
  0x12   : > { %168 = vst [vmem:[#allocation2] sm:$0xf] (!%p121_p10), %v167_v0  ;;  %170 = vst [vmem:[#allocation2 + $0x4] sm:$0xf] (!%p121_p10), %v169_v1  ;;  %v173_v3 = vld [vmem:[%s149_s4 + $0x18] sm:$0xf] (!%p121_p10) }
  0x13   : > { %v175_v4 = vld [vmem:[%s149_s4 + $0x8] sm:$0xf] (!%p121_p10)  ;;  %172 = vst [vmem:[#allocation2 + $0x8] sm:$0xf] (!%p121_p10), %v171_v2  ;;  %174 = vst [vmem:[#allocation2 + $0xc] sm:$0xf] (!%p121_p10), %v173_v3 }
  0x14   : > { %176 = vst [vmem:[#allocation2 + $0x10] sm:$0xf] (!%p121_p10), %v175_v4  ;;  %v177_v5 = vld [vmem:[%s149_s4 + $0x1c] sm:$0xf] (!%p121_p10)  ;;  %v179_v6 = vld [vmem:[%s149_s4 + $0xc] sm:$0xf] (!%p121_p10) }
  0x15   : > { %v181_v7 = vld [vmem:[%s149_s4 + $0x20] sm:$0xf] (!%p121_p10)  ;;  %178 = vst [vmem:[#allocation2 + $0x14] sm:$0xf] (!%p121_p10), %v177_v5  ;;  %180 = vst [vmem:[#allocation2 + $0x18] sm:$0xf] (!%p121_p10), %v179_v6 }
  0x16   : > { %182 = vst [vmem:[#allocation2 + $0x1c] sm:$0xf] %v181_v7  ;;  %v183_v8 = vld [vmem:[%s149_s4 + $0x10] sm:$0xf]  ;;  %v185_v9 = vld [vmem:[%s149_s4 + $0x24] sm:$0xf] }
  0x17   : > { %184 = vst [vmem:[#allocation2 + $0x20] sm:$0xf] %v183_v8  ;;  %186 = vst [vmem:[#allocation2 + $0x24] sm:$0xf] %v185_v9  ;;  %s7449_s5 = scalar_lea.vmem [#allocation4], %s7065_s28 }
  0x18   : > { %237 = vsyncadd [#allocation3], 640 }
  0x19   : > { %7283 = dma.done.wait [#allocation3], 640 }
  0x1a   : > { %7284 = vsyncadd [#allocation3], 4294966656  ;;  %v7313_v10 = vmov 0   ;;  %v7454_v11 = vld [vmem:[#allocation2 + $0x8] sm:$0xff]  ;;  %v7456_v12 = vld [vmem:[#allocation2] sm:$0xff]  ;;  %s7314_s6 = smov 104  }
  0x1b   : > { %445 = vmatprep.mubr.bf16.mxu0 %v7313_v10  ;;  %7175 = vset.pattern.permute.xlu0 %v7313_v10  ;;  %s7315_s7 = smov 80   ;;  %s7316_s8 = smov 56   ;;  %v7328_v15 = vmov 0.0   ;;  %vm7329_vm0 = vmmov 0   ;;  %vm402_vm1 = vcmask 850944   ;;  %vm605_vm2 = vcmask 654336  }
  0x1c   : > { %7176 = vset.pattern.permute.xlu1 %v7313_v10  ;;  %396 = vrot.lane.b32.xlu0 %v7454_v11, %s7314_s6  ;;  %v7462_v13 = vld [vmem:[#allocation2 + $0x10] sm:$0xff]  ;;  %s7317_s9 = smov 32   ;;  %s7318_s10 = smov 8   ;;  %v7595_v22 = vld [vmem:[%s9256_s1 + $0x8] sm:$0xff]   ;;  %vm409_vm3 = vcmask 130048   ;;  %vm721_vm4 = vcmask 457728  }
  0x1d   : > { %394 = vrot.lane.b32.xlu1 %v7456_v12, %s7314_s6  ;;  %s7319_s11 = smov 112   ;;  %v7492_v14 = vld [vmem:[#allocation2 + $0x18] sm:$0xff]  ;;  %s7320_s18 = smov 127   ;;  %6579 = vmatprep.subr.bf16.mxu1 %v7328_v15  ;;  %v7625_v31 = vld [vmem:[%s9256_s1] sm:$0xff]   ;;  %vm837_vm5 = vcmask 261120   ;;  %v7654_v40 = vld [vmem:[%s9256_s1 + $0x10] sm:$0xff]  }
  0x1e   : > { %s7321_s19 = smov 103   ;;  %s7322_s21 = smov 79   ;;  %6581 = vmatprep.mubr.msk.bf16.mxu1 %vm7329_vm0, %v7328_v15  ;;  %v7599_v23 = vld [vmem:[#allocation2 + $0x20] sm:$0xff]  ;;  %vm953_vm6 = vcmask 64512   ;;  %v7689_v49 = vld [vmem:[%s9256_s1 + $0x18] sm:$0xff]   ;;  %vm1077_vm7 = vcmask 916480  }
  0x1f   : > { %s7323_s23 = smov 55   ;;  %s7324_s27 = smov 31   ;;  %v7724_v58 = vld [vmem:[%s9256_s1 + $0x20] sm:$0xff]   ;;  %vm1193_vm8 = vcmask 1039360   ;;  %v7758_v3 = vld [vmem:[%s9256_s1 + $0x28] sm:$0xff]   ;;  %vm1309_vm9 = vcmask 842752  }
  0x20   : > { %398 = vrot.lane.b32.xlu0 %v7462_v13, %s7314_s6  ;;  %s7325_s28 = smov 7   ;;  %s7326_s29 = smov 111   ;;  %vm1425_vm10 = vcmask 646144   ;;  %vm1541_vm11 = vcmask 449536   ;;  %vm1657_vm12 = vcmask 252928   ;;  %vm1773_vm13 = vcmask 56320  }
  0x21   : > { %599 = vrot.lane.b32.xlu1 %v7454_v11, %s7315_s7  ;;  %s9260_s30 = smov 126   ;;  %s7330_s4 = smov 102   ;;  %vm1889_vm14 = vcmask 908288   ;;  %vm2005_vm15 = vcmask 1031168  }
  0x22   : > { %s7331_s26 = smov 78  }
  0x24   : > { %601 = vrot.lane.b32.xlu0 %v7462_v13, %s7315_s7 }
  0x25   : > { %597 = vrot.lane.b32.xlu1 %v7456_v12, %s7315_s7 }
  0x28   : > { %715 = vrot.lane.b32.xlu0 %v7454_v11, %s7316_s8 }
  0x29   : > { %717 = vrot.lane.b32.xlu1 %v7462_v13, %s7316_s8 }
  0x2c   : > { %713 = vrot.lane.b32.xlu0 %v7456_v12, %s7316_s8 }
  0x2d   : > { %831 = vrot.lane.b32.xlu1 %v7454_v11, %s7317_s9 }
  0x30   : > { %833 = vrot.lane.b32.xlu0 %v7462_v13, %s7317_s9 }
  0x31   : > { %829 = vrot.lane.b32.xlu1 %v7456_v12, %s7317_s9 }
  0x34   : > { %947 = vrot.lane.b32.xlu0 %v7454_v11, %s7318_s10 }
  0x35   : > { %949 = vrot.lane.b32.xlu1 %v7462_v13, %s7318_s10 }
  0x38   : > { %945 = vrot.lane.b32.xlu0 %v7456_v12, %s7318_s10 }
  0x39   : > { %1071 = vrot.lane.b32.xlu1 %v7462_v13, %s7319_s11 }
  0x3c   : > { %1073 = vrot.lane.b32.xlu0 %v7492_v14, %s7319_s11 }
  0x3d   : > { %1069 = vrot.lane.b32.xlu1 %v7454_v11, %s7319_s11 }
  0x40   : > { %1187 = vrot.lane.b32.xlu0 %v7454_v11, %s7320_s18 }
  0x41   : > { %1189 = vrot.lane.b32.xlu1 %v7462_v13, %s7320_s18 }
  0x44   : > { %1185 = vrot.lane.b32.xlu0 %v7456_v12, %s7320_s18 }
  0x45   : > { %1303 = vrot.lane.b32.xlu1 %v7454_v11, %s7321_s19 }
  0x48   : > { %1305 = vrot.lane.b32.xlu0 %v7462_v13, %s7321_s19 }
  0x49   : > { %1301 = vrot.lane.b32.xlu1 %v7456_v12, %s7321_s19 }
  0x4c   : > { %1419 = vrot.lane.b32.xlu0 %v7454_v11, %s7322_s21 }
  0x4d   : > { %1421 = vrot.lane.b32.xlu1 %v7462_v13, %s7322_s21 }
  0x50   : > { %1417 = vrot.lane.b32.xlu0 %v7456_v12, %s7322_s21 }
  0x51   : > { %1535 = vrot.lane.b32.xlu1 %v7454_v11, %s7323_s23 }
  0x54   : > { %1537 = vrot.lane.b32.xlu0 %v7462_v13, %s7323_s23 }
  0x55   : > { %1533 = vrot.lane.b32.xlu1 %v7456_v12, %s7323_s23 }
  0x58   : > { %1651 = vrot.lane.b32.xlu0 %v7454_v11, %s7324_s27 }
  0x59   : > { %1653 = vrot.lane.b32.xlu1 %v7462_v13, %s7324_s27 }
  0x5c   : > { %1649 = vrot.lane.b32.xlu0 %v7456_v12, %s7324_s27 }
  0x5d   : > { %1767 = vrot.lane.b32.xlu1 %v7454_v11, %s7325_s28 }
  0x60   : > { %1769 = vrot.lane.b32.xlu0 %v7462_v13, %s7325_s28 }
  0x61   : > { %1765 = vrot.lane.b32.xlu1 %v7456_v12, %s7325_s28 }
  0x64   : > { %1883 = vrot.lane.b32.xlu0 %v7462_v13, %s7326_s29 }
  0x65   : > { %1885 = vrot.lane.b32.xlu1 %v7492_v14, %s7326_s29 }
  0x68   : > { %1881 = vrot.lane.b32.xlu0 %v7454_v11, %s7326_s29 }
  0x69   : > { %1999 = vrot.lane.b32.xlu1 %v7454_v11, %s9260_s30 }
  0x6c   : > { %2001 = vrot.lane.b32.xlu0 %v7462_v13, %s9260_s30 }
  0x6d   : > { %1997 = vrot.lane.b32.xlu1 %v7456_v12, %s9260_s30  ;;  %s9261_s30 = smov 54  }
  0x70   : > { %2115 = vrot.lane.b32.xlu0 %v7454_v11, %s7330_s4 }
  0x71   : > { %2117 = vrot.lane.b32.xlu1 %v7462_v13, %s7330_s4 }
  0x74   : > { %2113 = vrot.lane.b32.xlu0 %v7456_v12, %s7330_s4 }
  0x75   : > { %400 = vrot.lane.b32.xlu1 %v7492_v14, %s7314_s6  ;;  %s7333_s6 = smov 30  }
  0x78   : > { %2231 = vrot.lane.b32.xlu0 %v7454_v11, %s7331_s26 }
  0x79   : > { %2233 = vrot.lane.b32.xlu1 %v7462_v13, %s7331_s26 }
  0x7c   : > { %2229 = vrot.lane.b32.xlu0 %v7456_v12, %s7331_s26 }
  0x7d   : > { %2347 = vrot.lane.b32.xlu1 %v7454_v11, %s9261_s30 }
  0x80   : > { %2349 = vrot.lane.b32.xlu0 %v7462_v13, %s9261_s30 }
  0x81   : > { %2345 = vrot.lane.b32.xlu1 %v7456_v12, %s9261_s30  ;;  %s7334_s30 = smov 6  }
  0x84   : > { %603 = vrot.lane.b32.xlu0 %v7492_v14, %s7315_s7  ;;  %s7336_s7 = smov 125  }
  0x85   : > { %719 = vrot.lane.b32.xlu1 %v7492_v14, %s7316_s8  ;;  %s7340_s8 = smov 29  }
  0x88   : > { %2463 = vrot.lane.b32.xlu0 %v7454_v11, %s7333_s6 }
  0x89   : > { %2465 = vrot.lane.b32.xlu1 %v7462_v13, %s7333_s6 }
  0x8c   : > { %2461 = vrot.lane.b32.xlu0 %v7456_v12, %s7333_s6 }
  0x8d   : > { %835 = vrot.lane.b32.xlu1 %v7492_v14, %s7317_s9  ;;  %s7335_s9 = smov 110  }
  0x8e   : > { %v397_v16 = vpop.permute.xlu0 %396 }
  0x8f   : > { %v395_v17 = vpop.permute.xlu1 %394 }
  0x90   : > { %2579 = vrot.lane.b32.xlu0 %v7454_v11, %s7334_s30  ;;  %v403_v21 = vsel %vm402_vm1, %v395_v17, %v397_v16 }
  0x91   : > { %2581 = vrot.lane.b32.xlu1 %v7462_v13, %s7334_s30 }
  0x92   : > { %v7585_v18 = vpop.permute.xlu0 %398 }
  0x93   : > { %v600_v19 = vpop.permute.xlu1 %599  ;;  %v404_v20 = vsel %vm402_vm1, %v397_v16, %v7585_v18 }
  0x94   : > { %413 = vmatprep.subr.bf16.mxu0 %v404_v20  ;;  %2577 = vrot.lane.b32.xlu0 %v7456_v12, %s7334_s30 }
  0x95   : > { %951 = vrot.lane.b32.xlu1 %v7492_v14, %s7318_s10  ;;  %414 = vmatpush1.bf16.msra.mxu0 %v403_v21  ;;  %s6089_s10 = sshll.u32 %s7449_s5, 4  ;;  %s9202_s10 = int_to_ptr.vmem [resolvable:$true] %s6089_s10 }
  0x96   : > { %v7601_v24 = vpop.permute.xlu0 %601  ;;  %505 = vmatprep.subr.bf16.mxu0 %v7454_v11 }
  0x97   : > { %v598_v25 = vpop.permute.xlu1 %597  ;;  %v607_v26 = vsel %vm605_vm2, %v600_v19, %v7601_v24 }
  0x98   : > { %1075 = vrot.lane.b32.xlu0 %v7599_v23, %s7319_s11  ;;  %6234 = vmatmul.mubr.msk.bf16.vlgmr.msra.gmra.mrb[0].mxu0 %vm409_vm3, %v7595_v22  ;;  %v606_v32 = vsel %vm605_vm2, %v598_v25, %v600_v19  ;;  %s7339_s11 = smov 53   ;;  %v7796_v19 = vld [vmem:[%s9256_s1 + $0x30] sm:$0xff]  }
  0x99   : > { %2695 = vrot.lane.b32.xlu1 %v7462_v13, %s7335_s9  ;;  %506 = vmatpush1.bf16.msra.mxu0 %v7456_v12 }
  0x9a   : > { %v716_v27 = vpop.permute.xlu0 %715  ;;  %615 = vmatprep.subr.bf16.mxu0 %v607_v26  ;;  %537 = vmatprep.mubr.bf16.mxu0 %v7313_v10 }
  0x9b   : > { %v7613_v28 = vpop.permute.xlu1 %717 }
  0x9c   : > { %2697 = vrot.lane.b32.xlu0 %v7492_v14, %s7335_s9  ;;  %v723_v35 = vsel %vm721_vm4, %v716_v27, %v7613_v28 }
  0x9d   : > { %2693 = vrot.lane.b32.xlu1 %v7454_v11, %s7335_s9 }
  0x9e   : > { %v714_v29 = vpop.permute.xlu0 %713 }
  0x9f   : > { %v832_v30 = vpop.permute.xlu1 %831  ;;  %v722_v41 = vsel %vm721_vm4, %v714_v29, %v716_v27 }
  0xa0   : > { %1191 = vrot.lane.b32.xlu0 %v7492_v14, %s7320_s18  ;;  %s7337_s18 = smov 101  }
  0xa1   : > { %2811 = vrot.lane.b32.xlu1 %v7454_v11, %s7336_s7 }
  0xa2   : > { %v7630_v33 = vpop.permute.xlu0 %833 }
  0xa3   : > { %v830_v34 = vpop.permute.xlu1 %829  ;;  %v839_v44 = vsel %vm837_vm5, %v832_v30, %v7630_v33 }
  0xa4   : > { %2813 = vrot.lane.b32.xlu0 %v7462_v13, %s7336_s7  ;;  %6237 = vmatmul.mubr.msk.bf16.vlgmr.msra.gmra.mrb[0].mxu0 %vm409_vm3, %v7625_v31  ;;  %v838_v50 = vsel %vm837_vm5, %v830_v34, %v832_v30 }
  0xa5   : > { %2809 = vrot.lane.b32.xlu1 %v7456_v12, %s7336_s7  ;;  %616 = vmatpush1.bf16.msra.mxu0 %v606_v32 }
  0xa6   : > { %v948_v36 = vpop.permute.xlu0 %947  ;;  %731 = vmatprep.subr.bf16.mxu0 %v723_v35  ;;  %647 = vmatprep.mubr.bf16.mxu0 %v7313_v10  ;;  %v7834_v35 = vld [vmem:[%s9256_s1 + $0x38] sm:$0xff]  }
  0xa7   : > { %v7640_v37 = vpop.permute.xlu1 %949 }
  0xa8   : > { %1307 = vrot.lane.b32.xlu0 %v7492_v14, %s7321_s19  ;;  %s7338_s19 = smov 77   ;;  %v955_v53 = vsel %vm953_vm6, %v948_v36, %v7640_v37 }
  0xa9   : > { %1423 = vrot.lane.b32.xlu1 %v7492_v14, %s7322_s21  ;;  %s7344_s21 = smov 100  }
  0xaa   : > { %v946_v38 = vpop.permute.xlu0 %945 }
  0xab   : > { %v7647_v39 = vpop.permute.xlu1 %1071  ;;  %v954_v59 = vsel %vm953_vm6, %v946_v38, %v948_v36 }
  0xac   : > { %2927 = vrot.lane.b32.xlu0 %v7454_v11, %s7337_s18 }
  0xad   : > { %2929 = vrot.lane.b32.xlu1 %v7462_v13, %s7337_s18 }
  0xae   : > { %v7659_v42 = vpop.permute.xlu0 %1073 }
  0xaf   : > { %v7661_v43 = vpop.permute.xlu1 %1069  ;;  %v1079_v62 = vsel %vm1077_vm7, %v7647_v39, %v7659_v42 }
  0xb0   : > { %2925 = vrot.lane.b32.xlu0 %v7456_v12, %s7337_s18  ;;  %6242 = vmatmul.mubr.msk.bf16.vlgmr.msra.gmra.mrb[0].mxu0 %vm409_vm3, %v7654_v40  ;;  %v1078_v4 = vsel %vm1077_vm7, %v7661_v43, %v7647_v39 }
  0xb1   : > { %1539 = vrot.lane.b32.xlu1 %v7492_v14, %s7323_s23  ;;  %732 = vmatpush1.bf16.msra.mxu0 %v722_v41  ;;  %s7341_s23 = smov 5  }
  0xb2   : > { %v7671_v45 = vpop.permute.xlu0 %1187  ;;  %847 = vmatprep.subr.bf16.mxu0 %v839_v44  ;;  %763 = vmatprep.mubr.bf16.mxu0 %v7313_v10 }
  0xb3   : > { %v7673_v46 = vpop.permute.xlu1 %1189 }
  0xb4   : > { %3043 = vrot.lane.b32.xlu0 %v7454_v11, %s7338_s19  ;;  %v1195_v7 = vsel %vm1193_vm8, %v7671_v45, %v7673_v46 }
  0xb5   : > { %3045 = vrot.lane.b32.xlu1 %v7462_v13, %s7338_s19 }
  0xb6   : > { %v7680_v47 = vpop.permute.xlu0 %1185 }
  0xb7   : > { %v7682_v48 = vpop.permute.xlu1 %1303  ;;  %v1194_v20 = vsel %vm1193_vm8, %v7680_v47, %v7671_v45  ;;  %v7879_v45 = vld [vmem:[%s9256_s1 + $0x40] sm:$0xff]  }
  0xb8   : > { %3041 = vrot.lane.b32.xlu0 %v7456_v12, %s7338_s19 }
  0xb9   : > { %1655 = vrot.lane.b32.xlu1 %v7492_v14, %s7324_s27  ;;  %s7363_s27 = smov 106  }
  0xba   : > { %v7694_v51 = vpop.permute.xlu0 %1305 }
  0xbb   : > { %v7696_v52 = vpop.permute.xlu1 %1301  ;;  %v1311_v26 = vsel %vm1309_vm9, %v7682_v48, %v7694_v51 }
  0xbc   : > { %1771 = vrot.lane.b32.xlu0 %v7492_v14, %s7325_s28  ;;  %6247 = vmatmul.mubr.msk.bf16.vlgmr.msra.gmra.mrb[0].mxu0 %vm409_vm3, %v7689_v49  ;;  %s9265_s28 = smov 54   ;;  %v1310_v36 = vsel %vm1309_vm9, %v7696_v52, %v7682_v48 }
  0xbd   : > { %3159 = vrot.lane.b32.xlu1 %v7454_v11, %s7339_s11  ;;  %848 = vmatpush1.bf16.msra.mxu0 %v838_v50 }
  0xbe   : > { %v7706_v54 = vpop.permute.xlu0 %1419  ;;  %963 = vmatprep.subr.bf16.mxu0 %v955_v53  ;;  %879 = vmatprep.mubr.bf16.mxu0 %v7313_v10 }
  0xbf   : > { %v7708_v55 = vpop.permute.xlu1 %1421 }
  0xc0   : > { %3161 = vrot.lane.b32.xlu0 %v7462_v13, %s7339_s11 }
  0xc1   : > { %3157 = vrot.lane.b32.xlu1 %v7456_v12, %s7339_s11 }
  0xc2   : > { %v7715_v56 = vpop.permute.xlu0 %1417 }
  0xc3   : > { %v7717_v57 = vpop.permute.xlu1 %1535  ;;  %v1426_v47 = vsel %vm1425_vm10, %v7715_v56, %v7706_v54 }
  0xc4   : > { %1887 = vrot.lane.b32.xlu0 %v7599_v23, %s7326_s29  ;;  %s9264_s29 = smov 126  }
  0xc5   : > { %3275 = vrot.lane.b32.xlu1 %v7454_v11, %s7340_s8 }
  0xc6   : > { %v7729_v60 = vpop.permute.xlu0 %1537 }
  0xc7   : > { %v7731_v61 = vpop.permute.xlu1 %1533  ;;  %v1543_v52 = vsel %vm1541_vm11, %v7717_v57, %v7729_v60 }
  0xc8   : > { %3277 = vrot.lane.b32.xlu0 %v7462_v13, %s7340_s8  ;;  %6252 = vmatmul.mubr.msk.bf16.vlgmr.msra.gmra.mrb[0].mxu0 %vm409_vm3, %v7724_v58 }
  0xc9   : > { %3273 = vrot.lane.b32.xlu1 %v7456_v12, %s7340_s8  ;;  %964 = vmatpush1.bf16.msra.mxu0 %v954_v59 }
  0xca   : > { %v7742_v63 = vpop.permute.xlu0 %1651  ;;  %1087 = vmatprep.subr.bf16.mxu0 %v1079_v62  ;;  %995 = vmatprep.mubr.bf16.mxu0 %v7313_v10 }
  0xcb   : > { %v7744_v0 = vpop.permute.xlu1 %1653 }
  0xcc   : > { %2003 = vrot.lane.b32.xlu0 %v7492_v14, %s9264_s29  ;;  %s7343_s29 = smov 124  }
  0xcd   : > { %2119 = vrot.lane.b32.xlu1 %v7492_v14, %s7330_s4  ;;  %s7342_s4 = smov 109  }
  0xce   : > { %v7751_v1 = vpop.permute.xlu0 %1649 }
  0xcf   : > { %v7753_v2 = vpop.permute.xlu1 %1767 }
  0xd0   : > { %3391 = vrot.lane.b32.xlu0 %v7454_v11, %s7341_s23 }
  0xd1   : > { %3393 = vrot.lane.b32.xlu1 %v7462_v13, %s7341_s23 }
  0xd2   : > { %v7767_v5 = vpop.permute.xlu0 %1769 }
  0xd3   : > { %v7769_v6 = vpop.permute.xlu1 %1765 }
  0xd4   : > { %6257 = vmatmul.mubr.msk.bf16.vlgmr.msra.gmra.mrb[0].mxu0 %vm409_vm3, %v7758_v3  ;;  %3389 = vrot.lane.b32.xlu0 %v7456_v12, %s7341_s23 }
  0xd5   : > { %1088 = vmatpush1.bf16.msra.mxu0 %v1078_v4  ;;  %2235 = vrot.lane.b32.xlu1 %v7492_v14, %s7331_s26  ;;  %s7364_s26 = smov [#allocation4]  }
  0xd6   : > { %v7780_v8 = vpop.permute.xlu0 %1883  ;;  %1203 = vmatprep.subr.bf16.mxu0 %v1195_v7  ;;  %1119 = vmatprep.mubr.bf16.mxu0 %v7313_v10 }
  0xd7   : > { %v7782_v9 = vpop.permute.xlu1 %1885 }
  0xd8   : > { %3507 = vrot.lane.b32.xlu0 %v7462_v13, %s7342_s4 }
  0xd9   : > { %3509 = vrot.lane.b32.xlu1 %v7492_v14, %s7342_s4 }
  0xda   : > { %v7789_v16 = vpop.permute.xlu0 %1881 }
  0xdb   : > { %v7791_v17 = vpop.permute.xlu1 %1999 }
  0xdc   : > { %3505 = vrot.lane.b32.xlu0 %v7454_v11, %s7342_s4 }
  0xdd   : > { %2351 = vrot.lane.b32.xlu1 %v7492_v14, %s9265_s28  ;;  %s7346_s28 = smov 52  }
  0xde   : > { %v7805_v21 = vpop.permute.xlu0 %2001 }
  0xdf   : > { %v7807_v25 = vpop.permute.xlu1 %1997 }
  0xe0   : > { %6262 = vmatmul.mubr.msk.bf16.vlgmr.msra.gmra.mrb[0].mxu0 %vm409_vm3, %v7796_v19  ;;  %2467 = vrot.lane.b32.xlu0 %v7492_v14, %s7333_s6  ;;  %s7352_s6 = smov 75  }
  0xe1   : > { %1204 = vmatpush1.bf16.msra.mxu0 %v1194_v20  ;;  %1235 = vmatprep.mubr.bf16.mxu0 %v7313_v10  ;;  %v1659_v20 = vsel %vm1657_vm12, %v7742_v63, %v7744_v0 }
  0xe2   : > { %v7817_v27 = vpop.permute.xlu0 %2115  ;;  %1319 = vmatprep.subr.bf16.mxu0 %v1311_v26  ;;  %3623 = vrot.lane.b32.xlu1 %v7454_v11, %s7343_s29 }
  0xe3   : > { %v7819_v29 = vpop.permute.xlu1 %2117 }
  0xe4   : > { %3625 = vrot.lane.b32.xlu0 %v7462_v13, %s7343_s29 }
  0xe6   : > { %v7825_v30 = vpop.permute.xlu0 %2113  ;;  %3621 = vrot.lane.b32.xlu1 %v7456_v12, %s7343_s29 }
  0xe7   : > { %v401_v32 = vpop.permute.xlu1 %400 }
  0xe8   : > { %v405_v34 = vsel %vm402_vm1, %v7585_v18, %v401_v32  ;;  %2583 = vrot.lane.b32.xlu0 %v7492_v14, %s7334_s30  ;;  %v1427_v18 = vsel %vm1425_vm10, %v7706_v54, %v7708_v55  ;;  %v7964_v32 = vld [vmem:[%s9256_s1 + $0x50] sm:$0xff]   ;;  %vm2121_vm1 = vcmask 834560  }
  0xe9   : > { %6580 = vmatpush3.bf16.msra.mxu1 %v405_v34 }
  0xea   : > { %6585 = vmatprep.subr.bf16.mxu1 %v7328_v15  ;;  %v7842_v38 = vpop.permute.xlu0 %2231  ;;  %3739 = vrot.lane.b32.xlu1 %v7454_v11, %s7344_s21 }
  0xeb   : > { %v7844_v39 = vpop.permute.xlu1 %2233 }
  0xec   : > { %6582 = vmatmul.mubr.msk.bf16.vlgmr.msra.gmra.mrb[0].mxu1 %vm409_vm3, %v7595_v22  ;;  %6267 = vmatmul.mubr.msk.bf16.vlgmr.msra.gmra.mrb[0].mxu0 %vm409_vm3, %v7834_v35 }
  0xed   : > { %6586 = vmatpush3.bf16.msra.mxu1 %v7462_v13  ;;  %1320 = vmatpush1.bf16.msra.mxu0 %v1310_v36  ;;  %v1775_v36 = vsel %vm1773_vm13, %v7753_v2, %v7767_v5 }
  0xee   : > { %6587 = vmatprep.mubr.msk.bf16.mxu1 %vm7329_vm0, %v7328_v15  ;;  %v7858_v41 = vpop.permute.xlu0 %2229  ;;  %1435 = vmatprep.subr.bf16.mxu0 %v1427_v18 }
  0xef   : > { %v7860_v43 = vpop.permute.xlu1 %2347  ;;  %6591 = vmatprep.subr.bf16.mxu1 %v7328_v15  ;;  %1351 = vmatprep.mubr.bf16.mxu0 %v7313_v10 }
  0xf0   : > { %3741 = vrot.lane.b32.xlu0 %v7462_v13, %s7344_s21  ;;  %3737 = vrot.lane.b32.xlu1 %v7456_v12, %s7344_s21 }
  0xf2   : > { %v7868_v22 = vpop.permute.xlu0 %2349 }
  0xf3   : > { %v7870_v44 = vpop.permute.xlu1 %2345 }
  0xf4   : > { %6588 = vmatmul.mubr.msk.bf16.vlgmr.msra.gmra.mrb[4].mxu1 %vm409_vm3, %v7625_v31  ;;  %2699 = vrot.lane.b32.xlu0 %v7599_v23, %s7335_s9  ;;  %s7345_s9 = smov 76  }
  0xf5   : > { %6593 = vmatprep.mubr.msk.bf16.mxu1 %vm7329_vm0, %v7328_v15  ;;  %2815 = vrot.lane.b32.xlu1 %v7492_v14, %s7336_s7  ;;  %s7362_s7 = smov 2  }
  0xf6   : > { %v604_v31 = vpop.permute.xlu0 %603 }
  0xf7   : > { %v720_v48 = vpop.permute.xlu1 %719  ;;  %v608_v50 = vsel %vm605_vm2, %v7601_v24, %v604_v31  ;;  %v1774_v31 = vsel %vm1773_vm13, %v7769_v6, %v7753_v2  ;;  %vm2237_vm2 = vcmask 637952  }
  0xf8   : > { %3855 = vrot.lane.b32.xlu0 %v7454_v11, %s7345_s9  ;;  %6592 = vmatpush3.bf16.msra.mxu1 %v608_v50  ;;  %v724_v24 = vsel %vm721_vm4, %v7613_v28, %v720_v48  ;;  %v7921_v28 = vld [vmem:[%s9256_s1 + $0x48] sm:$0xff]   ;;  %vm2353_vm4 = vcmask 441344  }
  0xf9   : > { %6272 = vmatmul.mubr.msk.bf16.vlgmr.msra.gmra.mrb[0].mxu0 %vm409_vm3, %v7879_v45  ;;  %6597 = vmatprep.subr.bf16.mxu1 %v7328_v15 }
  0xfa   : > { %1436 = vmatpush1.bf16.msra.mxu0 %v1426_v47  ;;  %v7898_v53 = vpop.permute.xlu0 %2463  ;;  %1467 = vmatprep.mubr.bf16.mxu0 %v7313_v10 }
  0xfb   : > { %v7900_v54 = vpop.permute.xlu1 %2465  ;;  %1551 = vmatprep.subr.bf16.mxu0 %v1543_v52  ;;  %3857 = vrot.lane.b32.xlu1 %v7462_v13, %s7345_s9 }
  0xfc   : > { %6594 = vmatmul.mubr.msk.bf16.vlgmr.msra.gmra.mrb[8].mxu1 %vm409_vm3, %v7654_v40  ;;  %3853 = vrot.lane.b32.xlu0 %v7456_v12, %s7345_s9  ;;  %v1542_v40 = vsel %vm1541_vm11, %v7731_v61, %v7717_v57 }
  0xfd   : > { %6598 = vmatpush3.bf16.msra.mxu1 %v724_v24  ;;  %6599 = vmatprep.mubr.msk.bf16.mxu1 %vm7329_vm0, %v7328_v15 }
  0xfe   : > { %6603 = vmatprep.subr.bf16.mxu1 %v7328_v15  ;;  %v7914_v56 = vpop.permute.xlu0 %2461 }
  0xff   : > { %v836_v59 = vpop.permute.xlu1 %835  ;;  %2931 = vrot.lane.b32.xlu1 %v7492_v14, %s7337_s18  ;;  %s7347_s18 = smov 28  }
 0x100   : > { %3971 = vrot.lane.b32.xlu0 %v7454_v11, %s7346_s28  ;;  %v840_v7 = vsel %vm837_vm5, %v7630_v33, %v836_v59  ;;  %v8051_v59 = vld [vmem:[%s9256_s1 + $0x60] sm:$0xff]   ;;  %vm2469_vm5 = vcmask 244736  }
 0x102   : > { %v7928_v62 = vpop.permute.xlu0 %2579 }
 0x103   : > { %v7930_v4 = vpop.permute.xlu1 %2581  ;;  %3973 = vrot.lane.b32.xlu1 %v7462_v13, %s7346_s28 }
 0x104   : > { %6600 = vmatmul.mubr.msk.bf16.vlgmr.msra.gmra.mrb[12].mxu1 %vm409_vm3, %v7689_v49  ;;  %3969 = vrot.lane.b32.xlu0 %v7456_v12, %s7346_s28 }
 0x105   : > { %6604 = vmatpush3.bf16.msra.mxu1 %v840_v7  ;;  %6277 = vmatmul.mubr.msk.bf16.vlgmr.msra.gmra.mrb[0].mxu0 %vm409_vm3, %v7921_v28  ;;  %v2007_v7 = vsel %vm2005_vm15, %v7791_v17, %v7805_v21 }
 0x106   : > { %1552 = vmatpush1.bf16.msra.mxu0 %v1542_v40  ;;  %6605 = vmatprep.mubr.msk.bf16.mxu1 %vm7329_vm0, %v7328_v15  ;;  %v7945_v57 = vpop.permute.xlu0 %2577 }
 0x107   : > { %6609 = vmatprep.subr.bf16.mxu1 %v7328_v15  ;;  %1667 = vmatprep.subr.bf16.mxu0 %v1659_v20  ;;  %v952_v33 = vpop.permute.xlu1 %951 }
 0x108   : > { %1583 = vmatprep.mubr.bf16.mxu0 %v7313_v10  ;;  %3047 = vrot.lane.b32.xlu1 %v7492_v14, %s7338_s19  ;;  %v956_v61 = vsel %vm953_vm6, %v7640_v37, %v952_v33  ;;  %v1658_v37 = vsel %vm1657_vm12, %v7751_v1, %v7742_v63  ;;  %vm3629_vm6 = vcmask 1014784  }
 0x109   : > { %3163 = vrot.lane.b32.xlu0 %v7492_v14, %s7339_s11  ;;  %s7348_s11 = smov 4  }
 0x10a   : > { %v1076_v49 = vpop.permute.xlu0 %1075 }
 0x10b   : > { %v7955_v26 = vpop.permute.xlu1 %2695  ;;  %v1080_v63 = vsel %vm1077_vm7, %v7659_v42, %v1076_v49  ;;  %vm2585_vm7 = vcmask 48128  }
 0x10c   : > { %6606 = vmatmul.mubr.msk.bf16.vlgmr.msra.gmra.mrb[16].mxu1 %vm409_vm3, %v7724_v58  ;;  %4087 = vrot.lane.b32.xlu1 %v7454_v11, %s7347_s18 }
 0x10d   : > { %6610 = vmatpush3.bf16.msra.mxu1 %v956_v61  ;;  %6611 = vmatprep.mubr.msk.bf16.mxu1 %vm7329_vm0, %v7328_v15  ;;  %v8104_v61 = vld [vmem:[#allocation2 + $0x8] sm:$0xff] }
 0x10e   : > { %6615 = vmatprep.subr.bf16.mxu1 %v7328_v15  ;;  %v7974_v58 = vpop.permute.xlu0 %2697  ;;  %4089 = vrot.lane.b32.xlu0 %v7462_v13, %s7347_s18 }
 0x10f   : > { %v7976_v34 = vpop.permute.xlu1 %2693 }
 0x110   : > { %4085 = vrot.lane.b32.xlu1 %v7456_v12, %s7347_s18 }
 0x111   : > { %6282 = vmatmul.mubr.msk.bf16.vlgmr.msra.gmra.mrb[0].mxu0 %vm409_vm3, %v7964_v32 }
 0x112   : > { %1668 = vmatpush1.bf16.msra.mxu0 %v1658_v37  ;;  %1699 = vmatprep.mubr.bf16.mxu0 %v7313_v10  ;;  %v1192_v18 = vpop.permute.xlu0 %1191 }
 0x113   : > { %1783 = vmatprep.subr.bf16.mxu0 %v1775_v36  ;;  %v7990_v1 = vpop.permute.xlu1 %2811  ;;  %3279 = vrot.lane.b32.xlu0 %v7492_v14, %s7340_s8  ;;  %v1196_v50 = vsel %vm1193_vm8, %v7673_v46, %v1192_v18  ;;  %s7349_s8 = smov 108   ;;  %vm3745_vm8 = vcmask 818176  }
 0x114   : > { %6612 = vmatmul.mubr.msk.bf16.vlgmr.msra.gmra.mrb[20].mxu1 %vm409_vm3, %v7758_v3  ;;  %4203 = vrot.lane.b32.xlu1 %v7454_v11, %s7348_s11  ;;  %v8010_v3 = vld [vmem:[%s9256_s1 + $0x58] sm:$0xff]  }
 0x115   : > { %6616 = vmatpush3.bf16.msra.mxu1 %v1080_v63  ;;  %6617 = vmatprep.mubr.msk.bf16.mxu1 %vm7329_vm0, %v7328_v15 }
 0x116   : > { %6621 = vmatprep.subr.bf16.mxu1 %v7328_v15  ;;  %v7999_v47 = vpop.permute.xlu0 %2813 }
 0x117   : > { %v8003_v42 = vpop.permute.xlu1 %2809  ;;  %4205 = vrot.lane.b32.xlu0 %v7462_v13, %s7348_s11 }
 0x118   : > { %4201 = vrot.lane.b32.xlu1 %v7456_v12, %s7348_s11  ;;  %v1891_v12 = vsel %vm1889_vm14, %v7780_v8, %v7782_v9 }
 0x11a   : > { %v1308_v48 = vpop.permute.xlu0 %1307 }
 0x11b   : > { %v1424_v52 = vpop.permute.xlu1 %1423  ;;  %3395 = vrot.lane.b32.xlu0 %v7492_v14, %s7341_s23  ;;  %s7361_s23 = smov 26  }
 0x11c   : > { %6618 = vmatmul.mubr.msk.bf16.vlgmr.msra.gmra.mrb[24].mxu1 %vm409_vm3, %v7796_v19  ;;  %3511 = vrot.lane.b32.xlu1 %v7599_v23, %s7342_s4  ;;  %v1312_v19 = vsel %vm1309_vm9, %v7694_v51, %v1308_v48  ;;  %v1890_v51 = vsel %vm1889_vm14, %v7789_v16, %v7780_v8  ;;  %v1428_v8 = vsel %vm1425_vm10, %v7708_v55, %v1424_v52  ;;  %v8090_v55 = vld [vmem:[#allocation2] sm:$0xff]  ;;  %v8146_v48 = vld [vmem:[%s9256_s1 + $0x70] sm:$0xff]   ;;  %vm2701_vm9 = vcmask 900096  }
 0x11d   : > { %6622 = vmatpush3.bf16.msra.mxu1 %v1196_v50  ;;  %6287 = vmatmul.mubr.msk.bf16.vlgmr.msra.gmra.mrb[0].mxu0 %vm409_vm3, %v8010_v3  ;;  %v2239_v52 = vsel %vm2237_vm2, %v7842_v38, %v7844_v39  ;;  %vm3861_vm10 = vcmask 621568  }
 0x11e   : > { %1784 = vmatpush1.bf16.msra.mxu0 %v1774_v31  ;;  %6623 = vmatprep.mubr.msk.bf16.mxu1 %vm7329_vm0, %v7328_v15  ;;  %v8030_v46 = vpop.permute.xlu0 %2927 }
 0x11f   : > { %6627 = vmatprep.subr.bf16.mxu1 %v7328_v15  ;;  %1899 = vmatprep.subr.bf16.mxu0 %v1891_v12  ;;  %v8033_v2 = vpop.permute.xlu1 %2929 }
 0x120   : > { %1815 = vmatprep.mubr.bf16.mxu0 %v7313_v10  ;;  %4321 = vrot.lane.b32.xlu1 %v7492_v14, %s7349_s8 }
 0x121   : > { %4319 = vrot.lane.b32.xlu0 %v7462_v13, %s7349_s8 }
 0x122   : > { %v8040_v6 = vpop.permute.xlu0 %2925 }
 0x123   : > { %v1540_v24 = vpop.permute.xlu1 %1539 }
 0x124   : > { %6624 = vmatmul.mubr.msk.bf16.vlgmr.msra.gmra.mrb[28].mxu1 %vm409_vm3, %v7834_v35  ;;  %3627 = vrot.lane.b32.xlu1 %v7492_v14, %s7343_s29  ;;  %s7350_s29 = smov 123   ;;  %v1544_v37 = vsel %vm1541_vm11, %v7729_v60, %v1540_v24  ;;  %v2238_v24 = vsel %vm2237_vm2, %v7858_v41, %v7842_v38  ;;  %vm2817_vm11 = vcmask 1022976  }
 0x125   : > { %6628 = vmatpush3.bf16.msra.mxu1 %v1312_v19  ;;  %6629 = vmatprep.mubr.msk.bf16.mxu1 %vm7329_vm0, %v7328_v15 }
 0x126   : > { %6633 = vmatprep.subr.bf16.mxu1 %v7328_v15  ;;  %v8061_v35 = vpop.permute.xlu0 %3043  ;;  %4317 = vrot.lane.b32.xlu0 %v7454_v11, %s7349_s8 }
 0x127   : > { %v8063_v40 = vpop.permute.xlu1 %3045 }
 0x128   : > { %4437 = vrot.lane.b32.xlu1 %v7462_v13, %s7350_s29 }
 0x129   : > { %6292 = vmatmul.mubr.msk.bf16.vlgmr.msra.gmra.mrb[0].mxu0 %vm409_vm3, %v8051_v59 }
 0x12a   : > { %1900 = vmatpush1.bf16.msra.mxu0 %v1890_v51  ;;  %1931 = vmatprep.mubr.bf16.mxu0 %v7313_v10  ;;  %v8073_v20 = vpop.permute.xlu0 %3041 }
 0x12b   : > { %2015 = vmatprep.subr.bf16.mxu0 %v2007_v7  ;;  %v1656_v16 = vpop.permute.xlu1 %1655  ;;  %4435 = vrot.lane.b32.xlu0 %v7454_v11, %s7350_s29  ;;  %v8097_v11 = vld [vmem:[%s9256_s1 + $0x68] sm:$0xff]  }
 0x12c   : > { %6630 = vmatmul.mubr.msk.bf16.vlgmr.msra.gmra.mrb[32].mxu1 %vm409_vm3, %v7879_v45  ;;  %3743 = vrot.lane.b32.xlu1 %v7492_v14, %s7344_s21  ;;  %v2006_v45 = vsel %vm2005_vm15, %v7807_v25, %v7791_v17  ;;  %s7351_s21 = smov 99   ;;  %v2123_v17 = vsel %vm2121_vm1, %v7817_v27, %v7819_v29  ;;  %v1660_v63 = vsel %vm1657_vm12, %v7744_v0, %v1656_v16  ;;  %vm3977_vm12 = vcmask 424960  }
 0x12d   : > { %6634 = vmatpush3.bf16.msra.mxu1 %v1428_v8  ;;  %6635 = vmatprep.mubr.msk.bf16.mxu1 %vm7329_vm0, %v7328_v15  ;;  %v2122_v0 = vsel %vm2121_vm1, %v7825_v30, %v7817_v27  ;;  %v2355_v8 = vsel %vm2353_vm4, %v7860_v43, %v7868_v22 }
 0x12e   : > { %6639 = vmatprep.subr.bf16.mxu1 %v7328_v15  ;;  %v1772_v33 = vpop.permute.xlu0 %1771 }
 0x12f   : > { %v8088_v13 = vpop.permute.xlu1 %3159  ;;  %4433 = vrot.lane.b32.xlu0 %v8090_v55, %s7350_s29  ;;  %v1776_v27 = vsel %vm1773_vm13, %v7767_v5, %v1772_v33  ;;  %v2471_v33 = vsel %vm2469_vm5, %v7898_v53, %v7900_v54  ;;  %vm4093_vm13 = vcmask 228352  }
 0x130   : > { %4551 = vrot.lane.b32.xlu1 %v8104_v61, %s7351_s21 }
 0x132   : > { %v8102_v49 = vpop.permute.xlu0 %3161 }
 0x133   : > { %v8110_v36 = vpop.permute.xlu1 %3157  ;;  %3859 = vrot.lane.b32.xlu0 %v7492_v14, %s7345_s9  ;;  %s7358_s9 = smov 98  }
 0x134   : > { %6636 = vmatmul.mubr.msk.bf16.vlgmr.msra.gmra.mrb[36].mxu1 %vm409_vm3, %v7921_v28  ;;  %v8127_v28 = vld [vmem:[#allocation2 + $0x10] sm:$0xff]  ;;  %4549 = vrot.lane.b32.xlu1 %v8090_v55, %s7351_s21 }
 0x135   : > { %6640 = vmatpush3.bf16.msra.mxu1 %v1544_v37  ;;  %6297 = vmatmul.mubr.msk.bf16.vlgmr.msra.gmra.mrb[0].mxu0 %vm409_vm3, %v8097_v11 }
 0x136   : > { %2016 = vmatpush1.bf16.msra.mxu0 %v2006_v45  ;;  %6641 = vmatprep.mubr.msk.bf16.mxu1 %vm7329_vm0, %v7328_v15  ;;  %v1888_v60 = vpop.permute.xlu0 %1887  ;;  %v8252_v45 = vld [vmem:[#allocation2 + $0x18] sm:$0xff] }
 0x137   : > { %6645 = vmatprep.subr.bf16.mxu1 %v7328_v15  ;;  %2131 = vmatprep.subr.bf16.mxu0 %v2123_v17  ;;  %v8124_v25 = vpop.permute.xlu1 %3275 }
 0x138   : > { %2047 = vmatprep.mubr.bf16.mxu0 %v7313_v10  ;;  %4553 = vrot.lane.b32.xlu0 %v8127_v28, %s7351_s21 }
 0x139   : > { %4667 = vrot.lane.b32.xlu1 %v8104_v61, %s7352_s6 }
 0x13a   : > { %v8133_v18 = vpop.permute.xlu0 %3277 }
 0x13b   : > { %v8137_v31 = vpop.permute.xlu1 %3273 }
 0x13c   : > { %6642 = vmatmul.mubr.msk.bf16.vlgmr.msra.gmra.mrb[40].mxu1 %vm409_vm3, %v7964_v32  ;;  %3975 = vrot.lane.b32.xlu0 %v7492_v14, %s7346_s28  ;;  %s7353_s28 = smov 51  }
 0x13d   : > { %6646 = vmatpush3.bf16.msra.mxu1 %v1660_v63  ;;  %6647 = vmatprep.mubr.msk.bf16.mxu1 %vm7329_vm0, %v7328_v15 }
 0x13e   : > { %6651 = vmatprep.subr.bf16.mxu1 %v7328_v15  ;;  %v2004_v32 = vpop.permute.xlu0 %2003  ;;  %4665 = vrot.lane.b32.xlu1 %v8090_v55, %s7352_s6 }
 0x13f   : > { %v8156_v50 = vpop.permute.xlu1 %2119  ;;  %v2008_v41 = vsel %vm2005_vm15, %v7805_v21, %v2004_v32  ;;  %v2354_v21 = vsel %vm2353_vm4, %v7870_v44, %v7860_v43  ;;  %vm4209_vm15 = vcmask 31744  }
 0x140   : > { %4669 = vrot.lane.b32.xlu0 %v8127_v28, %s7352_s6  ;;  %v2124_v44 = vsel %vm2121_vm1, %v7819_v29, %v8156_v50  ;;  %v7194_v29 = vld [vmem:[%s9256_s1 + $0x88] sm:$0xff]   ;;  %vm3049_vm1 = vcmask 629760  }
 0x141   : > { %6302 = vmatmul.mubr.msk.bf16.vlgmr.msra.gmra.mrb[0].mxu0 %vm409_vm3, %v8146_v48 }
 0x142   : > { %2132 = vmatpush1.bf16.msra.mxu0 %v2122_v0  ;;  %2163 = vmatprep.mubr.bf16.mxu0 %v7313_v10  ;;  %v8166_v12 = vpop.permute.xlu0 %3391  ;;  %v2587_v0 = vsel %vm2585_vm7, %v7928_v62, %v7930_v4 }
 0x143   : > { %2247 = vmatprep.subr.bf16.mxu0 %v2239_v52  ;;  %v8174_v30 = vpop.permute.xlu1 %3393  ;;  %4207 = vrot.lane.b32.xlu1 %v7492_v14, %s7348_s11  ;;  %s7354_s11 = smov 27  }
 0x144   : > { %6648 = vmatmul.mubr.msk.bf16.vlgmr.msra.gmra.mrb[44].mxu1 %vm409_vm3, %v8010_v3  ;;  %4091 = vrot.lane.b32.xlu0 %v7492_v14, %s7347_s18  ;;  %v8192_v3 = vld [vmem:[%s9256_s1 + $0x78] sm:$0xff]   ;;  %v1892_v14 = vsel %vm1889_vm14, %v7782_v9, %v1888_v60  ;;  %vm2933_vm14 = vcmask 826368  }
 0x145   : > { %6652 = vmatpush3.bf16.msra.mxu1 %v1776_v27  ;;  %6653 = vmatprep.mubr.msk.bf16.mxu1 %vm7329_vm0, %v7328_v15 }
 0x146   : > { %6657 = vmatprep.subr.bf16.mxu1 %v7328_v15  ;;  %v8181_v19 = vpop.permute.xlu0 %3389 }
 0x147   : > { %v8185_v5 = vpop.permute.xlu1 %2235  ;;  %4785 = vrot.lane.b32.xlu1 %v8127_v28, %s7353_s28 }
 0x148   : > { %4783 = vrot.lane.b32.xlu0 %v8104_v61, %s7353_s28  ;;  %v2240_v50 = vsel %vm2237_vm2, %v7844_v39, %v8185_v5  ;;  %vm4325_vm2 = vcmask 883712  }
 0x14a   : > { %v8197_v51 = vpop.permute.xlu0 %3507 }
 0x14b   : > { %v8205_v7 = vpop.permute.xlu1 %3509  ;;  %4323 = vrot.lane.b32.xlu1 %v7599_v23, %s7349_s8  ;;  %v7193_v23 = vld [vmem:[%s9256_s1 + $0x80] sm:$0xff]   ;;  %s7355_s8 = smov 3  }
 0x14c   : > { %6654 = vmatmul.mubr.msk.bf16.vlgmr.msra.gmra.mrb[48].mxu1 %vm409_vm3, %v8051_v59  ;;  %4781 = vrot.lane.b32.xlu0 %v8090_v55, %s7353_s28 }
 0x14d   : > { %6658 = vmatpush3.bf16.msra.mxu1 %v1892_v14  ;;  %6307 = vmatmul.mubr.msk.bf16.vlgmr.msra.gmra.mrb[0].mxu0 %vm409_vm3, %v8192_v3 }
 0x14e   : > { %2248 = vmatpush1.bf16.msra.mxu0 %v2238_v24  ;;  %6659 = vmatprep.mubr.msk.bf16.mxu1 %vm7329_vm0, %v7328_v15  ;;  %v8217_v9 = vpop.permute.xlu0 %3505 }
 0x14f   : > { %6663 = vmatprep.subr.bf16.mxu1 %v7328_v15  ;;  %2363 = vmatprep.subr.bf16.mxu0 %v2355_v8  ;;  %v8222_v38 = vpop.permute.xlu1 %2351  ;;  %v2703_v8 = vsel %vm2701_vm9, %v7955_v26, %v7974_v58 }
 0x150   : > { %2279 = vmatprep.mubr.bf16.mxu0 %v7313_v10  ;;  %4899 = vrot.lane.b32.xlu0 %v8104_v61, %s7354_s11  ;;  %v2356_v5 = vsel %vm2353_vm4, %v7868_v22, %v8222_v38  ;;  %v2586_v22 = vsel %vm2585_vm7, %v7945_v57, %v7928_v62  ;;  %vm3165_vm4 = vcmask 433152  }
 0x151   : > { %4901 = vrot.lane.b32.xlu1 %v8127_v28, %s7354_s11 }
 0x152   : > { %v8230_v59 = vpop.permute.xlu0 %2467 }
 0x153   : > { %v2472_v57 = vsel %vm2469_vm5, %v7900_v54, %v8230_v59  ;;  %v7196_v54 = vld [vmem:[%s9256_s1 + $0x98] sm:$0xff]  }
 0x154   : > { %6660 = vmatmul.mubr.msk.bf16.vlgmr.msra.gmra.mrb[52].mxu1 %vm409_vm3, %v8097_v11  ;;  %v8239_v16 = vpop.permute.xlu1 %3623  ;;  %4897 = vrot.lane.b32.xlu0 %v8090_v55, %s7354_s11 }
 0x155   : > { %6664 = vmatpush3.bf16.msra.mxu1 %v2008_v41  ;;  %6665 = vmatprep.mubr.msk.bf16.mxu1 %vm7329_vm0, %v7328_v15 }
 0x156   : > { %6669 = vmatprep.subr.bf16.mxu1 %v7328_v15  ;;  %v8250_v11 = vpop.permute.xlu0 %3625  ;;  %4439 = vrot.lane.b32.xlu1 %v8252_v45, %s7350_s29  ;;  %s7356_s29 = smov 107  }
 0x158   : > { %v3622_v37 = vpop.permute.xlu1 %3621  ;;  %4555 = vrot.lane.b32.xlu0 %v8252_v45, %s7351_s21  ;;  %s7357_s21 = smov 122  }
 0x159   : > { %6312 = vmatmul.mubr.msk.bf16.vlgmr.msra.gmra.mrb[0].mxu0 %vm409_vm3, %v7193_v23  ;;  %v8260_v43 = vsel %vm3629_vm6, %v3622_v37, %v8239_v16  ;;  %v2819_v37 = vsel %vm2817_vm11, %v7990_v1, %v7999_v47 }
 0x15a   : > { %2364 = vmatpush1.bf16.msra.mxu0 %v2354_v21  ;;  %2395 = vmatprep.mubr.bf16.mxu0 %v7313_v10  ;;  %v8274_v60 = vpop.permute.xlu0 %2583 }
 0x15b   : > { %2479 = vmatprep.subr.bf16.mxu0 %v2471_v33  ;;  %5015 = vrot.lane.b32.xlu1 %v8104_v61, %s7355_s8  ;;  %v2702_v33 = vsel %vm2701_vm9, %v7976_v34, %v7955_v26 }
 0x15c   : > { %6666 = vmatmul.mubr.msk.bf16.vlgmr.msra.gmra.mrb[56].mxu1 %vm409_vm3, %v8146_v48  ;;  %v3740_v17 = vpop.permute.xlu1 %3739  ;;  %5017 = vrot.lane.b32.xlu0 %v8127_v28, %s7355_s8  ;;  %v2470_v48 = vsel %vm2469_vm5, %v7914_v56, %v7898_v53  ;;  %vm4441_vm5 = vcmask 1006592  }
 0x15d   : > { %6670 = vmatpush3.bf16.msra.mxu1 %v2124_v44  ;;  %6671 = vmatprep.mubr.msk.bf16.mxu1 %vm7329_vm0, %v7328_v15 }
 0x15e   : > { %6675 = vmatprep.subr.bf16.mxu1 %v7328_v15 }
 0x15f   : > { %5013 = vrot.lane.b32.xlu1 %v8090_v55, %s7355_s8 }
 0x160   : > { %4671 = vrot.lane.b32.xlu0 %v8252_v45, %s7352_s6 }
 0x162   : > { %v8283_v63 = vpop.permute.xlu0 %3741  ;;  %v3738_v32 = vpop.permute.xlu1 %3737 }
 0x163   : > { %v8299_v52 = vsel %vm3745_vm8, %v3738_v32, %v3740_v17  ;;  %5131 = vrot.lane.b32.xlu1 %v8127_v28, %s7356_s29  ;;  %v8305_v53 = vsel %vm3745_vm8, %v3740_v17, %v8283_v63  ;;  %v2588_v17 = vsel %vm2585_vm7, %v7930_v4, %v8274_v60  ;;  %v8405_v60 = vld [vmem:[#allocation2 + $0x20] sm:$0xff]  ;;  %vm3281_vm7 = vcmask 236544  }
 0x164   : > { %6672 = vmatmul.mubr.msk.bf16.vlgmr.msra.gmra.mrb[60].mxu1 %vm409_vm3, %v8192_v3  ;;  %5133 = vrot.lane.b32.xlu0 %v8252_v45, %s7356_s29  ;;  %v7195_v3 = vld [vmem:[%s9256_s1 + $0x90] sm:$0xff]  }
 0x165   : > { %6676 = vmatpush3.bf16.msra.mxu1 %v2240_v50  ;;  %6317 = vmatmul.mubr.msk.bf16.vlgmr.msra.gmra.mrb[0].mxu0 %vm409_vm3, %v7194_v29  ;;  %v7197_v50 = vld [vmem:[%s9256_s1 + $0xa0] sm:$0xff]  }
 0x166   : > { %2480 = vmatpush1.bf16.msra.mxu0 %v2470_v48  ;;  %6677 = vmatprep.mubr.msk.bf16.mxu1 %vm7329_vm0, %v7328_v15  ;;  %v8310_v39 = vpop.permute.xlu0 %2699 }
 0x167   : > { %6681 = vmatprep.subr.bf16.mxu1 %v7328_v15  ;;  %2595 = vmatprep.subr.bf16.mxu0 %v2587_v0  ;;  %v8314_v56 = vpop.permute.xlu1 %2815  ;;  %v2704_v48 = vsel %vm2701_vm9, %v7974_v58, %v8310_v39  ;;  %vm4557_vm9 = vcmask 809984  }
 0x168   : > { %2511 = vmatprep.mubr.bf16.mxu0 %v7313_v10  ;;  %5129 = vrot.lane.b32.xlu1 %v8104_v61, %s7356_s29 }
 0x169   : > { %4787 = vrot.lane.b32.xlu0 %v8252_v45, %s7353_s28  ;;  %s7359_s28 = smov 74  }
 0x16a   : > { %v3856_v27 = vpop.permute.xlu0 %3855 }
 0x16c   : > { %6678 = vmatmul.mubr.msk.bf16.vlgmr.msra.gmra.mrb[64].mxu1 %vm409_vm3, %v7193_v23  ;;  %4903 = vrot.lane.b32.xlu1 %v8252_v45, %s7354_s11  ;;  %s7360_s11 = smov 50  }
 0x16d   : > { %6682 = vmatpush3.bf16.msra.mxu1 %v2356_v5  ;;  %6683 = vmatprep.mubr.msk.bf16.mxu1 %vm7329_vm0, %v7328_v15  ;;  %v8332_v24 = vpop.permute.xlu1 %3857  ;;  %v2818_v5 = vsel %vm2817_vm11, %v8003_v42, %v7990_v1 }
 0x16e   : > { %6687 = vmatprep.subr.bf16.mxu1 %v7328_v15  ;;  %v8341_v14 = vsel %vm3861_vm10, %v3856_v27, %v8332_v24  ;;  %v3854_v38 = vpop.permute.xlu0 %3853  ;;  %5247 = vrot.lane.b32.xlu0 %v8104_v61, %s7357_s21 }
 0x16f   : > { %v8350_v41 = vsel %vm3861_vm10, %v3854_v38, %v3856_v27  ;;  %v7198_v38 = vld [vmem:[%s9256_s1 + $0xa8] sm:$0xff]  }
 0x170   : > { %5249 = vrot.lane.b32.xlu1 %v8127_v28, %s7357_s21 }
 0x171   : > { %6322 = vmatmul.mubr.msk.bf16.vlgmr.msra.gmra.mrb[0].mxu0 %vm409_vm3, %v7195_v3  ;;  %v8353_v62 = vpop.permute.xlu1 %2931 }
 0x172   : > { %2596 = vmatpush1.bf16.msra.mxu0 %v2586_v22  ;;  %2627 = vmatprep.mubr.bf16.mxu0 %v7313_v10  ;;  %v3972_v23 = vpop.permute.xlu0 %3971 }
 0x173   : > { %2711 = vmatprep.subr.bf16.mxu0 %v2703_v8  ;;  %5245 = vrot.lane.b32.xlu0 %v8090_v55, %s7357_s21  ;;  %v2820_v8 = vsel %vm2817_vm11, %v7999_v47, %v8314_v56  ;;  %vm3397_vm11 = vcmask 39936  }
 0x174   : > { %6684 = vmatmul.mubr.msk.bf16.vlgmr.msra.gmra.mrb[68].mxu1 %vm409_vm3, %v7194_v29  ;;  %5019 = vrot.lane.b32.xlu1 %v8252_v45, %s7355_s8 }
 0x175   : > { %6688 = vmatpush3.bf16.msra.mxu1 %v2472_v57  ;;  %6689 = vmatprep.mubr.msk.bf16.mxu1 %vm7329_vm0, %v7328_v15  ;;  %v8366_v21 = vpop.permute.xlu1 %3973  ;;  %v2936_v57 = vsel %vm2933_vm14, %v8033_v2, %v8353_v62 }
 0x176   : > { %6693 = vmatprep.subr.bf16.mxu1 %v7328_v15  ;;  %v3970_v44 = vpop.permute.xlu0 %3969  ;;  %v8396_v26 = vsel %vm3977_vm12, %v3972_v23, %v8366_v21 }
 0x177   : > { %5363 = vrot.lane.b32.xlu0 %v8104_v61, %s7358_s9  ;;  %v8390_v29 = vsel %vm3977_vm12, %v3970_v44, %v3972_v23 }
 0x178   : > { %5365 = vrot.lane.b32.xlu1 %v8127_v28, %s7358_s9 }
 0x17a   : > { %v8375_v59 = vpop.permute.xlu1 %3047 }
 0x17b   : > { %5361 = vrot.lane.b32.xlu0 %v8090_v55, %s7358_s9  ;;  %v8403_v34 = vpop.permute.xlu0 %3163  ;;  %v3052_v44 = vsel %vm3049_vm1, %v8063_v40, %v8375_v59  ;;  %v3050_v59 = vsel %vm3049_vm1, %v8073_v20, %v8061_v35 }
 0x17c   : > { %6690 = vmatmul.mubr.msk.bf16.vlgmr.msra.gmra.mrb[72].mxu1 %vm409_vm3, %v7195_v3  ;;  %5135 = vrot.lane.b32.xlu1 %v8405_v60, %s7356_s29  ;;  %v2935_v3 = vsel %vm2933_vm14, %v8030_v46, %v8033_v2  ;;  %s7231_s29 = scalar_lea.vmem %s9202_s10, 768 }
 0x17d   : > { %6694 = vmatpush3.bf16.msra.mxu1 %v2588_v17  ;;  %6327 = vmatmul.mubr.msk.bf16.vlgmr.msra.gmra.mrb[0].mxu0 %vm409_vm3, %v7196_v54  ;;  %p7232_p11 = scmp.ne.s32.totalorder %s9202_s10, %s7231_s29 }
 0x17e   : > { %2712 = vmatpush1.bf16.msra.mxu0 %v2702_v33  ;;  %6695 = vmatprep.mubr.msk.bf16.mxu1 %vm7329_vm0, %v7328_v15  ;;  %v4088_v4 = vpop.permute.xlu1 %4087 }
 0x17f   : > { %6699 = vmatprep.subr.bf16.mxu1 %v7328_v15  ;;  %2827 = vmatprep.subr.bf16.mxu0 %v2819_v37  ;;  %v3051_v37 = vsel %vm3049_vm1, %v8061_v35, %v8063_v40  ;;  %v3168_v35 = vsel %vm3165_vm4, %v8102_v49, %v8403_v34  ;;  %v7201_v34 = vld [vmem:[%s9256_s1 + $0xc0] sm:$0xff]   ;;  %vm3513_vm1 = vcmask 891904   ;;  %p7233_p12 = pnand %p7232_p11, %p7427_p4 }
 0x180   : > { %2743 = vmatprep.mubr.bf16.mxu0 %v7313_v10  ;;  %5251 = vrot.lane.b32.xlu0 %v8252_v45, %s7357_s21  ;;  %v8425_v58 = vpop.permute.xlu0 %4089 }
 0x181   : > { %5479 = vrot.lane.b32.xlu1 %v8104_v61, %s7359_s28  ;;  %v8432_v27 = vsel %vm4093_vm13, %v4088_v4, %v8425_v58  ;;  %p7234_p13 = pneg %p7233_p12 }
 0x182   : > { %v4086_v0 = vpop.permute.xlu1 %4085 }
 0x183   : > { %v8415_v32 = vsel %vm4093_vm13, %v4086_v0, %v4088_v4 }
 0x184   : > { %6696 = vmatmul.mubr.msk.bf16.vlgmr.msra.gmra.mrb[76].mxu1 %vm409_vm3, %v7196_v54  ;;  %5481 = vrot.lane.b32.xlu0 %v8127_v28, %s7359_s28  ;;  %v2934_v54 = vsel %vm2933_vm14, %v8040_v6, %v8030_v46  ;;  %v7199_v6 = vld [vmem:[%s9256_s1 + $0xb0] sm:$0xff]   ;;  %vm4673_vm14 = vcmask 613376  }
 0x185   : > { %6700 = vmatpush3.bf16.msra.mxu1 %v2704_v48  ;;  %6701 = vmatprep.mubr.msk.bf16.mxu1 %vm7329_vm0, %v7328_v15  ;;  %v8443_v22 = vpop.permute.xlu0 %3279 }
 0x186   : > { %6705 = vmatprep.subr.bf16.mxu1 %v7328_v15  ;;  %v4204_v39 = vpop.permute.xlu1 %4203  ;;  %5477 = vrot.lane.b32.xlu1 %v8090_v55, %s7359_s28 }
 0x188   : > { %5367 = vrot.lane.b32.xlu0 %v8252_v45, %s7358_s9 }
 0x189   : > { %6332 = vmatmul.mubr.msk.bf16.vlgmr.msra.gmra.mrb[0].mxu0 %vm409_vm3, %v7197_v50  ;;  %v8458_v47 = vpop.permute.xlu0 %4205 }
 0x18a   : > { %2828 = vmatpush1.bf16.msra.mxu0 %v2818_v5  ;;  %2859 = vmatprep.mubr.bf16.mxu0 %v7313_v10  ;;  %v4202_v1 = vpop.permute.xlu1 %4201  ;;  %v8487_v2 = vsel %vm4209_vm15, %v4204_v39, %v8458_v47 }
 0x18b   : > { %2943 = vmatprep.subr.bf16.mxu0 %v2935_v3  ;;  %v8450_v42 = vsel %vm4209_vm15, %v4202_v1, %v4204_v39  ;;  %5595 = vrot.lane.b32.xlu1 %v8104_v61, %s7360_s11  ;;  %v3167_v39 = vsel %vm3165_vm4, %v8088_v13, %v8102_v49 }
 0x18c   : > { %6702 = vmatmul.mubr.msk.bf16.vlgmr.msra.gmra.mrb[80].mxu1 %vm409_vm3, %v7197_v50  ;;  %5597 = vrot.lane.b32.xlu0 %v8127_v28, %s7360_s11  ;;  %v7200_v50 = vld [vmem:[%s9256_s1 + $0xb8] sm:$0xff]  }
 0x18d   : > { %6706 = vmatpush3.bf16.msra.mxu1 %v2820_v8  ;;  %6707 = vmatprep.mubr.msk.bf16.mxu1 %vm7329_vm0, %v7328_v15  ;;  %v8471_v23 = vpop.permute.xlu0 %3395 }
 0x18e   : > { %6711 = vmatprep.subr.bf16.mxu1 %v7328_v15  ;;  %v8461_v56 = vpop.permute.xlu1 %3511 }
 0x18f   : > { %5593 = vrot.lane.b32.xlu1 %v8090_v55, %s7360_s11 }
 0x190   : > { %5483 = vrot.lane.b32.xlu0 %v8252_v45, %s7359_s28 }
 0x192   : > { %v8476_v33 = vpop.permute.xlu1 %4321 }
 0x193   : > { %5599 = vrot.lane.b32.xlu1 %v8252_v45, %s7360_s11  ;;  %v4320_v46 = vpop.permute.xlu0 %4319  ;;  %s7066_s11 = smul.u32 768, %s7303_s15  ;;  %s9266_s15 = sand.u32 1, %s7295_s13  }
 0x194   : > { %6708 = vmatmul.mubr.msk.bf16.vlgmr.msra.gmra.mrb[84].mxu1 %vm409_vm3, %v7198_v38  ;;  %5711 = vrot.lane.b32.xlu0 %v8104_v61, %s7361_s23  ;;  %v8515_v0 = vsel %vm4325_vm2, %v4320_v46, %v8476_v33 }
 0x195   : > { %6337 = vmatmul.mubr.msk.bf16.vlgmr.msra.gmra.mrb[0].mxu0 %vm409_vm3, %v7198_v38  ;;  %6712 = vmatpush3.bf16.msra.mxu1 %v2936_v57  ;;  %v3166_v38 = vsel %vm3165_vm4, %v8110_v36, %v8088_v13  ;;  %v7202_v36 = vld [vmem:[%s9256_s1 + $0xc8] sm:$0xff]   ;;  %vm4789_vm4 = vcmask 416768   ;;  %s9200_s4 = scalar_lea.hbm %s9258_s3, %s7066_s11 }
 0x196   : > { %2944 = vmatpush1.bf16.msra.mxu0 %v2934_v54  ;;  %6713 = vmatprep.mubr.msk.bf16.mxu1 %vm7329_vm0, %v7328_v15  ;;  %v8497_v62 = vpop.permute.xlu1 %3627 }
 0x197   : > { %3059 = vmatprep.subr.bf16.mxu0 %v3051_v37  ;;  %2975 = vmatprep.mubr.bf16.mxu0 %v7313_v10 }
 0x198   : > { %6717 = vmatprep.subr.bf16.mxu1 %v7328_v15  ;;  %5713 = vrot.lane.b32.xlu1 %v8127_v28, %s7361_s23  ;;  %v4318_v17 = vpop.permute.xlu0 %4317 }
 0x199   : > { %v8505_v4 = vsel %vm4325_vm2, %v4318_v17, %v4320_v46  ;;  %5709 = vrot.lane.b32.xlu0 %v8090_v55, %s7361_s23  ;;  %v3399_v17 = vsel %vm3397_vm11, %v8166_v12, %v8174_v30 }
 0x19a   : > { %v8511_v48 = vpop.permute.xlu1 %4437 }
 0x19c   : > { %6714 = vmatmul.mubr.msk.bf16.vlgmr.msra.gmra.mrb[88].mxu1 %vm409_vm3, %v7199_v6  ;;  %5715 = vrot.lane.b32.xlu1 %v8252_v45, %s7361_s23  ;;  %s9209_s23 = scalar_lea.sflag [#allocation5], %s9266_s15 }
 0x19d   : > { %6718 = vmatpush3.bf16.msra.mxu1 %v3052_v44  ;;  %6719 = vmatprep.mubr.msk.bf16.mxu1 %vm7329_vm0, %v7328_v15  ;;  %v4436_v40 = vpop.permute.xlu0 %4435  ;;  %v7203_v44 = vld [vmem:[%s9256_s1 + $0xd0] sm:$0xff]  }
 0x19e   : > { %6723 = vmatprep.subr.bf16.mxu1 %v7328_v15  ;;  %5827 = vrot.lane.b32.xlu0 %v8104_v61, %s7362_s7  ;;  %v8530_v5 = vpop.permute.xlu1 %3743 }
 0x1a0   : > { %5829 = vrot.lane.b32.xlu1 %v8127_v28, %s7362_s7 }
 0x1a1   : > { %6342 = vmatmul.mubr.msk.bf16.vlgmr.msra.gmra.mrb[0].mxu0 %vm409_vm3, %v7199_v6  ;;  %v4434_v20 = vpop.permute.xlu0 %4433  ;;  %v3282_v6 = vsel %vm3281_vm7, %v8137_v31, %v8124_v25 }
 0x1a2   : > { %3060 = vmatpush1.bf16.msra.mxu0 %v3050_v59  ;;  %3091 = vmatprep.mubr.bf16.mxu0 %v7313_v10  ;;  %v8537_v3 = vsel %vm4441_vm5, %v4434_v20, %v4436_v40  ;;  %v4552_v8 = vpop.permute.xlu1 %4551  ;;  %v3516_v59 = vsel %vm3513_vm1, %v8205_v7, %v8461_v56 }
 0x1a3   : > { %3175 = vmatprep.subr.bf16.mxu0 %v3167_v39  ;;  %5825 = vrot.lane.b32.xlu0 %v8090_v55, %s7362_s7  ;;  %v3284_v55 = vsel %vm3281_vm7, %v8133_v18, %v8443_v22  ;;  %v8571_v22 = vsel %vm4441_vm5, %v4436_v40, %v8511_v48  ;;  %v8633_v39 = vld [vmem:[%s9256_s1 + $0xd8] sm:$0xff]  }
 0x1a4   : > { %6720 = vmatmul.mubr.msk.bf16.vlgmr.msra.gmra.mrb[92].mxu1 %vm409_vm3, %v7200_v50  ;;  %5831 = vrot.lane.b32.xlu1 %v8252_v45, %s7362_s7  ;;  %s7235_s7 = sshll.u32 %s7364_s26, 4  ;;  %s7236_s7 = int_to_ptr.vmem [resolvable:$false] %s7235_s7 }
 0x1a5   : > { %6724 = vmatpush3.bf16.msra.mxu1 %v3168_v35  ;;  %6725 = vmatprep.mubr.msk.bf16.mxu1 %vm7329_vm0, %v7328_v15  ;;  %v8545_v49 = vpop.permute.xlu0 %3859  ;;  %s7237_s21 = scalar_lea.vmem %s7236_s7, 1536  ;;  %p7238_p0 = scmp.lt.s32.totalorder %s9202_s10, %s7236_s7 }
 0x1a6   : > { %6729 = vmatprep.subr.bf16.mxu1 %v7328_v15  ;;  %v4550_v57 = vpop.permute.xlu1 %4549  ;;  %p7239_p1 = scmp.lt.s32.totalorder %s7237_s21, %s7231_s29 }
 0x1a7   : > { %5943 = vrot.lane.b32.xlu0 %v8127_v28, %s7363_s27  ;;  %v3283_v28 = vsel %vm3281_vm7, %v8124_v25, %v8133_v18  ;;  %v8566_v54 = vsel %vm4557_vm9, %v4550_v57, %v4552_v8  ;;  %vm4905_vm7 = vcmask 220160  }
 0x1a8   : > { %5945 = vrot.lane.b32.xlu1 %v8252_v45, %s7363_s27  ;;  %v3400_v45 = vsel %vm3397_vm11, %v8174_v30, %v8471_v23  ;;  %p7240_p2 = por %p7239_p1, %p7238_p0 }
 0x1aa   : > { %v8555_v1 = vpop.permute.xlu0 %4553  ;;  %p7241_p3 = pnand %p7240_p2, %p7234_p13 }
 0x1ab   : > { %5947 = vrot.lane.b32.xlu0 %v8405_v60, %s7363_s27  ;;  %v4668_v18 = vpop.permute.xlu1 %4667  ;;  %v8594_v46 = vsel %vm4557_vm9, %v4552_v8, %v8555_v1  ;;  %v3632_v8 = vsel %vm3629_vm6, %v8250_v11, %v8497_v62 }
 0x1ac   : > { %6726 = vmatmul.mubr.msk.bf16.vlgmr.msra.gmra.mrb[96].mxu1 %vm409_vm3, %v7201_v34  ;;  %5941 = vrot.lane.b32.xlu1 %v8104_v61, %s7363_s27 }
 0x1ad   : > { %6347 = vmatmul.mubr.msk.bf16.vlgmr.msra.gmra.mrb[0].mxu0 %vm409_vm3, %v7200_v50  ;;  %6730 = vmatpush3.bf16.msra.mxu1 %v3284_v55 }
 0x1ae   : > { %3176 = vmatpush1.bf16.msra.mxu0 %v3166_v38  ;;  %6731 = vmatprep.mubr.msk.bf16.mxu1 %vm7329_vm0, %v7328_v15  ;;  %v8576_v13 = vpop.permute.xlu0 %3975  ;;  %v3398_v38 = vsel %vm3397_vm11, %v8181_v19, %v8166_v12 }
 0x1af   : > { %3291 = vmatprep.subr.bf16.mxu0 %v3283_v28  ;;  %3207 = vmatprep.mubr.bf16.mxu0 %v7313_v10  ;;  %v3515_v28 = vsel %vm3513_vm1, %v8197_v51, %v8205_v7  ;;  %v8663_v7 = vld [vmem:[%s9256_s1 + $0xe0] sm:$0xff]  }
 0x1b0   : > { %6735 = vmatprep.subr.bf16.mxu1 %v7328_v15  ;;  %v4666_v37 = vpop.permute.xlu1 %4665 }
 0x1b1   : > { %v8600_v23 = vsel %vm4673_vm14, %v4666_v37, %v4668_v18 }
 0x1b2   : > { %v8587_v60 = vpop.permute.xlu0 %4669 }
 0x1b4   : > { %6732 = vmatmul.mubr.msk.bf16.vlgmr.msra.gmra.mrb[100].mxu1 %vm409_vm3, %v7202_v36 }
 0x1b5   : > { %6736 = vmatpush3.bf16.msra.mxu1 %v3400_v45  ;;  %6737 = vmatprep.mubr.msk.bf16.mxu1 %vm7329_vm0, %v7328_v15  ;;  %v8612_v40 = vpop.permute.xlu1 %4207  ;;  %v8652_v45 = vsel %vm4673_vm14, %v4668_v18, %v8587_v60 }
 0x1b6   : > { %6741 = vmatprep.subr.bf16.mxu1 %v7328_v15  ;;  %v8597_v61 = vpop.permute.xlu0 %4091 }
 0x1b9   : > { %6352 = vmatmul.mubr.msk.bf16.vlgmr.msra.gmra.mrb[0].mxu0 %vm409_vm3, %v7201_v34  ;;  %v8623_v31 = vpop.permute.xlu1 %4785 }
 0x1ba   : > { %3292 = vmatpush1.bf16.msra.mxu0 %v3282_v6  ;;  %3323 = vmatprep.mubr.bf16.mxu0 %v7313_v10  ;;  %v8618_v25 = vpop.permute.xlu0 %4783 }
 0x1bb   : > { %3407 = vmatprep.subr.bf16.mxu0 %v3399_v17  ;;  %v3748_v17 = vsel %vm3745_vm8, %v8283_v63, %v8530_v5  ;;  %v3514_v63 = vsel %vm3513_vm1, %v8217_v9, %v8197_v51  ;;  %v3864_v51 = vsel %vm3861_vm10, %v8332_v24, %v8545_v49  ;;  %vm5021_vm8 = vcmask 23552  }
 0x1bc   : > { %6738 = vmatmul.mubr.msk.bf16.vlgmr.msra.gmra.mrb[104].mxu1 %vm409_vm3, %v7203_v44  ;;  %vm5253_vm10 = vcmask 998400  }
 0x1bd   : > { %6742 = vmatpush3.bf16.msra.mxu1 %v3516_v59  ;;  %6743 = vmatprep.mubr.msk.bf16.mxu1 %vm7329_vm0, %v7328_v15  ;;  %v8638_v34 = vpop.permute.xlu1 %4323 }
 0x1be   : > { %6747 = vmatprep.subr.bf16.mxu1 %v7328_v15  ;;  %v4782_v30 = vpop.permute.xlu0 %4781 }
 0x1bf   : > { %v8628_v56 = vsel %vm4789_vm4, %v4782_v30, %v8618_v25  ;;  %v490_v50 = vpop.f32.mrb[0].mxu1 }
 0x1c0   : > { %v6583_v35 = vpop.f32.mrb[1].mxu1 }
 0x1c1   : > { %v493_v20 = vpop.f32.mrb[2].mxu1 }
 0x1c2   : > { %v6584_v55 = vpop.f32.mrb[3].mxu1  ;;  %v8643_v57 = vpop.permute.xlu0 %4899 }
 0x1c3   : > { %v8657_v12 = vpop.permute.xlu1 %4901  ;;  %v3631_v55 = vsel %vm3629_vm6, %v8239_v16, %v8250_v11  ;;  %v8705_v16 = vsel %vm4789_vm4, %v8618_v25, %v8623_v31  ;;  %v8723_v25 = vld [vmem:[%s9256_s1 + $0xf0] sm:$0xff]   ;;  %vm5137_vm6 = vcmask 875520  }
 0x1c4   : > { %6744 = vmatmul.mubr.msk.bf16.vlgmr.msra.gmra.mrb[108].mxu1 %vm409_vm3, %v8633_v39 }
 0x1c5   : > { %6357 = vmatmul.mubr.msk.bf16.vlgmr.msra.gmra.mrb[0].mxu0 %vm409_vm3, %v7202_v36  ;;  %6748 = vmatpush3.bf16.msra.mxu1 %v3632_v8 }
 0x1c6   : > { %3408 = vmatpush1.bf16.msra.mxu0 %v3398_v38  ;;  %6749 = vmatprep.mubr.msk.bf16.mxu1 %vm7329_vm0, %v7328_v15  ;;  %v4898_v62 = vpop.permute.xlu0 %4897 }
 0x1c7   : > { %3523 = vmatprep.subr.bf16.mxu0 %v3515_v28  ;;  %3439 = vmatprep.mubr.bf16.mxu0 %v7313_v10  ;;  %v582_v19 = vpop.f32.mrb[4].mxu1  ;;  %v8668_v37 = vsel %vm4905_vm7, %v4898_v62, %v8643_v57 }
 0x1c8   : > { %6753 = vmatprep.subr.bf16.mxu1 %v7328_v15  ;;  %v583_v36 = vadd.f32 %v582_v19, %v490_v50  ;;  %v6589_v18 = vpop.f32.mrb[5].mxu1  ;;  %v8673_v59 = vpop.permute.xlu1 %4439 }
 0x1c9   : > { %v585_v6 = vpop.f32.mrb[6].mxu1 }
 0x1ca   : > { %v586_v30 = vadd.f32 %v585_v6, %v493_v20  ;;  %v6590_v35 = vpop.f32.mrb[7].mxu1  ;;  %v8679_v50 = vpop.permute.xlu0 %4555  ;;  %v8690_v20 = vld [vmem:[%s9256_s1 + $0xe8] sm:$0xff]  }
 0x1cb   : > { %v3980_v35 = vsel %vm3977_vm12, %v8366_v21, %v8576_v13  ;;  %vm5369_vm12 = vcmask 801792  }
 0x1cc   : > { %6750 = vmatmul.mubr.msk.bf16.vlgmr.msra.gmra.mrb[112].mxu1 %vm409_vm3, %v8663_v7 }
 0x1cd   : > { %6754 = vmatpush3.bf16.msra.mxu1 %v3748_v17  ;;  %6755 = vmatprep.mubr.msk.bf16.mxu1 %vm7329_vm0, %v7328_v15  ;;  %v8682_v8 = vpop.permute.xlu1 %5015 }
 0x1ce   : > { %6759 = vmatprep.subr.bf16.mxu1 %v7328_v15  ;;  %v8696_v19 = vpop.permute.xlu0 %5017 }
 0x1cf   : > { %v692_v5 = vpop.f32.mrb[8].mxu1 }
 0x1d0   : > { %v701_v38 = vadd.f32 %v692_v5, %v583_v36  ;;  %v6595_v28 = vpop.f32.mrb[9].mxu1 }
 0x1d1   : > { %6362 = vmatmul.mubr.msk.bf16.vlgmr.msra.gmra.mrb[0].mxu0 %vm409_vm3, %v7203_v44  ;;  %v695_v62 = vpop.f32.mrb[10].mxu1  ;;  %v5014_v6 = vpop.permute.xlu1 %5013 }
 0x1d2   : > { %3524 = vmatpush1.bf16.msra.mxu0 %v3514_v63  ;;  %3555 = vmatprep.mubr.bf16.mxu0 %v7313_v10  ;;  %v704_v9 = vadd.f32 %v695_v62, %v586_v30  ;;  %v6596_v18 = vpop.f32.mrb[11].mxu1  ;;  %v8709_v11 = vsel %vm5021_vm8, %v5014_v6, %v8682_v8  ;;  %v8715_v24 = vpop.permute.xlu0 %4671 }
 0x1d3   : > { %3639 = vmatprep.subr.bf16.mxu0 %v3631_v55  ;;  %v4096_v18 = vsel %vm4093_vm13, %v8425_v58, %v8597_v61  ;;  %v8777_v61 = vld [vmem:[%s9256_s1 + $0x100] sm:$0xff]   ;;  %vm5485_vm13 = vcmask 605184  }
 0x1d4   : > { %6756 = vmatmul.mubr.msk.bf16.vlgmr.msra.gmra.mrb[116].mxu1 %vm409_vm3, %v8690_v20 }
 0x1d5   : > { %6760 = vmatpush3.bf16.msra.mxu1 %v3864_v51  ;;  %6761 = vmatprep.mubr.msk.bf16.mxu1 %vm7329_vm0, %v7328_v15  ;;  %v8718_v49 = vpop.permute.xlu1 %5131 }
 0x1d6   : > { %6765 = vmatprep.subr.bf16.mxu1 %v7328_v15  ;;  %v8728_v63 = vpop.permute.xlu0 %5133 }
 0x1d7   : > { %v808_v44 = vpop.f32.mrb[12].mxu1 }
 0x1d8   : > { %v817_v36 = vadd.f32 %v808_v44, %v701_v38  ;;  %v6601_v17 = vpop.f32.mrb[13].mxu1  ;;  %v8739_v38 = vsel %vm4905_vm7, %v8643_v57, %v8657_v12  ;;  %v8753_v57 = vld [vmem:[%s9256_s1 + $0xf8] sm:$0xff]  }
 0x1d9   : > { %v811_v30 = vpop.f32.mrb[14].mxu1 }
 0x1da   : > { %v820_v5 = vadd.f32 %v811_v30, %v704_v9  ;;  %v6602_v55 = vpop.f32.mrb[15].mxu1  ;;  %v5130_v28 = vpop.permute.xlu1 %5129 }
 0x1db   : > { %v8734_v62 = vsel %vm5137_vm6, %v5130_v28, %v8718_v49  ;;  %v8746_v21 = vpop.permute.xlu0 %4787 }
 0x1dc   : > { %6762 = vmatmul.mubr.msk.bf16.vlgmr.msra.gmra.mrb[120].mxu1 %vm409_vm3, %v8723_v25 }
 0x1dd   : > { %6367 = vmatmul.mubr.msk.bf16.vlgmr.msra.gmra.mrb[0].mxu0 %vm409_vm3, %v8633_v39  ;;  %6766 = vmatpush3.bf16.msra.mxu1 %v3980_v35 }
 0x1de   : > { %3640 = vmatpush1.bf16.msra.mxu0 %v8260_v43  ;;  %6767 = vmatprep.mubr.msk.bf16.mxu1 %vm7329_vm0, %v7328_v15  ;;  %v8756_v43 = vpop.permute.xlu1 %4903 }
 0x1df   : > { %3755 = vmatprep.subr.bf16.mxu0 %v8305_v53  ;;  %3671 = vmatprep.mubr.bf16.mxu0 %v7313_v10  ;;  %v924_v13 = vpop.f32.mrb[16].mxu1 }
 0x1e0   : > { %6771 = vmatprep.subr.bf16.mxu1 %v7328_v15  ;;  %v933_v39 = vadd.f32 %v924_v13, %v817_v36  ;;  %v6607_v51 = vpop.f32.mrb[17].mxu1  ;;  %v8761_v44 = vpop.permute.xlu0 %5247  ;;  %v4212_v13 = vsel %vm4209_vm15, %v8458_v47, %v8612_v40  ;;  %vm5601_vm15 = vcmask 408576  }
 0x1e1   : > { %v927_v9 = vpop.f32.mrb[18].mxu1 }
 0x1e2   : > { %v936_v53 = vadd.f32 %v927_v9, %v820_v5  ;;  %v6608_v6 = vpop.f32.mrb[19].mxu1  ;;  %v8767_v36 = vpop.permute.xlu1 %5249 }
 0x1e4   : > { %6768 = vmatmul.mubr.msk.bf16.vlgmr.msra.gmra.mrb[124].mxu1 %vm409_vm3, %v8753_v57 }
 0x1e5   : > { %6772 = vmatpush3.bf16.msra.mxu1 %v4096_v18  ;;  %6773 = vmatprep.mubr.msk.bf16.mxu1 %vm7329_vm0, %v7328_v15  ;;  %v5246_v17 = vpop.permute.xlu0 %5245 }
 0x1e6   : > { %6777 = vmatprep.subr.bf16.mxu1 %v7328_v15  ;;  %v8772_v58 = vsel %vm5253_vm10, %v5246_v17, %v8761_v44  ;;  %v8781_v28 = vpop.permute.xlu1 %5019  ;;  %v4328_v17 = vsel %vm4325_vm2, %v8476_v33, %v8638_v34  ;;  %vm5717_vm2 = vcmask 211968  }
 0x1e7   : > { %v1040_v30 = vpop.f32.mrb[20].mxu1 }
 0x1e8   : > { %v1049_v35 = vadd.f32 %v1040_v30, %v933_v39  ;;  %v6613_v5 = vpop.f32.mrb[21].mxu1  ;;  %v8793_v39 = vsel %vm5021_vm8, %v8682_v8, %v8696_v19 }
 0x1e9   : > { %6372 = vmatmul.mubr.msk.bf16.vlgmr.msra.gmra.mrb[0].mxu0 %vm409_vm3, %v8663_v7  ;;  %v1043_v55 = vpop.f32.mrb[22].mxu1  ;;  %v8788_v18 = vpop.permute.xlu0 %5363 }
 0x1ea   : > { %3756 = vmatpush1.bf16.msra.mxu0 %v8299_v52  ;;  %3787 = vmatprep.mubr.bf16.mxu0 %v7313_v10  ;;  %v1052_v51 = vadd.f32 %v1043_v55, %v936_v53  ;;  %v6614_v9 = vpop.f32.mrb[23].mxu1  ;;  %v8800_v52 = vpop.permute.xlu1 %5365 }
 0x1eb   : > { %3871 = vmatprep.subr.bf16.mxu0 %v8341_v14  ;;  %v8810_v14 = vld [vmem:[%s9256_s1 + $0x108] sm:$0xff]  }
 0x1ec   : > { %6774 = vmatmul.mubr.msk.bf16.vlgmr.msra.gmra.mrb[128].mxu1 %vm409_vm3, %v8777_v61 }
 0x1ed   : > { %6778 = vmatpush3.bf16.msra.mxu1 %v4212_v13  ;;  %6779 = vmatprep.mubr.msk.bf16.mxu1 %vm7329_vm0, %v7328_v15  ;;  %v5362_v47 = vpop.permute.xlu0 %5361  ;;  %v8820_v13 = vsel %vm5137_vm6, %v8718_v49, %v8728_v63  ;;  %v8838_v49 = vld [vmem:[%s9256_s1 + $0x110] sm:$0xff]  }
 0x1ee   : > { %6783 = vmatprep.subr.bf16.mxu1 %v7328_v15  ;;  %v8805_v7 = vsel %vm5369_vm12, %v5362_v47, %v8788_v18  ;;  %v8815_v55 = vpop.permute.xlu1 %5135  ;;  %v4444_v47 = vsel %vm4441_vm5, %v8511_v48, %v8673_v59  ;;  %vm5833_vm5 = vcmask 15360  }
 0x1ef   : > { %v1164_v40 = vpop.f32.mrb[24].mxu1 }
 0x1f0   : > { %v1173_v8 = vadd.f32 %v1164_v40, %v1049_v35  ;;  %v6619_v53 = vpop.f32.mrb[25].mxu1 }
 0x1f1   : > { %v1167_v6 = vpop.f32.mrb[26].mxu1 }
 0x1f2   : > { %v1176_v30 = vadd.f32 %v1167_v6, %v1052_v51  ;;  %v6620_v5 = vpop.f32.mrb[27].mxu1  ;;  %v8822_v9 = vpop.permute.xlu0 %5251 }
 0x1f3   : > { %v8831_v33 = vpop.permute.xlu1 %5479 }
 0x1f4   : > { %6780 = vmatmul.mubr.msk.bf16.vlgmr.msra.gmra.mrb[132].mxu1 %vm409_vm3, %v8810_v14 }
 0x1f5   : > { %6377 = vmatmul.mubr.msk.bf16.vlgmr.msra.gmra.mrb[0].mxu0 %vm409_vm3, %v8690_v20  ;;  %6784 = vmatpush3.bf16.msra.mxu1 %v4328_v17  ;;  %v8862_v17 = vld [vmem:[%s9256_s1 + $0x118] sm:$0xff]  }
 0x1f6   : > { %3872 = vmatpush1.bf16.msra.mxu0 %v8350_v41  ;;  %6785 = vmatprep.mubr.msk.bf16.mxu1 %vm7329_vm0, %v7328_v15  ;;  %v8841_v41 = vpop.permute.xlu0 %5481 }
 0x1f7   : > { %3987 = vmatprep.subr.bf16.mxu0 %v8396_v26  ;;  %3903 = vmatprep.mubr.bf16.mxu0 %v7313_v10  ;;  %v1280_v34 = vpop.f32.mrb[28].mxu1 }
 0x1f8   : > { %6789 = vmatprep.subr.bf16.mxu1 %v7328_v15  ;;  %v1289_v20 = vadd.f32 %v1280_v34, %v1173_v8  ;;  %v6625_v35 = vpop.f32.mrb[29].mxu1  ;;  %v5478_v53 = vpop.permute.xlu1 %5477 }
 0x1f9   : > { %v1283_v51 = vpop.f32.mrb[30].mxu1  ;;  %v8848_v6 = vsel %vm5485_vm13, %v5478_v53, %v8831_v33 }
 0x1fa   : > { %v1292_v26 = vadd.f32 %v1283_v51, %v1176_v30  ;;  %v6626_v40 = vpop.f32.mrb[31].mxu1  ;;  %v8854_v8 = vpop.permute.xlu0 %5367  ;;  %v4560_v51 = vsel %vm4557_vm9, %v8555_v1, %v8679_v50  ;;  %vm5949_vm9 = vcmask 867328  }
 0x1fc   : > { %6786 = vmatmul.mubr.msk.bf16.vlgmr.msra.gmra.mrb[136].mxu1 %vm409_vm3, %v8838_v49 }
 0x1fd   : > { %6790 = vmatpush3.bf16.msra.mxu1 %v4444_v47  ;;  %6791 = vmatprep.mubr.msk.bf16.mxu1 %vm7329_vm0, %v7328_v15  ;;  %v8857_v48 = vpop.permute.xlu1 %5595 }
 0x1fe   : > { %6795 = vmatprep.subr.bf16.mxu1 %v7328_v15  ;;  %v8866_v35 = vpop.permute.xlu0 %5597 }
 0x1ff   : > { %v1396_v59 = vpop.f32.mrb[32].mxu1 }
 0x200   : > { %v1405_v30 = vadd.f32 %v1396_v59, %v1289_v20  ;;  %v6631_v5 = vpop.f32.mrb[33].mxu1  ;;  %v8876_v20 = vsel %vm5253_vm10, %v8761_v44, %v8767_v36  ;;  %v4676_v59 = vsel %vm4673_vm14, %v8587_v60, %v8715_v24 }
 0x201   : > { %6382 = vmatmul.mubr.msk.bf16.vlgmr.msra.gmra.mrb[0].mxu0 %vm409_vm3, %v8723_v25  ;;  %v1399_v34 = vpop.f32.mrb[34].mxu1  ;;  %v5594_v53 = vpop.permute.xlu1 %5593 }
 0x202   : > { %3988 = vmatpush1.bf16.msra.mxu0 %v8390_v29  ;;  %4019 = vmatprep.mubr.bf16.mxu0 %v7313_v10  ;;  %v1408_v47 = vadd.f32 %v1399_v34, %v1292_v26  ;;  %v6632_v40 = vpop.f32.mrb[35].mxu1  ;;  %v8881_v29 = vsel %vm5601_vm15, %v5594_v53, %v8857_v48  ;;  %v8888_v1 = vpop.permute.xlu0 %5483 }
 0x203   : > { %4103 = vmatprep.subr.bf16.mxu0 %v8432_v27  ;;  %v8893_v27 = vld [vmem:[%s9256_s1 + $0x120] sm:$0xff]   ;;  %v8903_v40 = vsel %vm5369_vm12, %v8788_v18, %v8800_v52 }
 0x204   : > { %6792 = vmatmul.mubr.msk.bf16.vlgmr.msra.gmra.mrb[140].mxu1 %vm409_vm3, %v8862_v17 }
 0x205   : > { %6796 = vmatpush3.bf16.msra.mxu1 %v4560_v51  ;;  %6797 = vmatprep.mubr.msk.bf16.mxu1 %vm7329_vm0, %v7328_v15 }
 0x206   : > { %6801 = vmatprep.subr.bf16.mxu1 %v7328_v15  ;;  %v8898_v51 = vpop.permute.xlu0 %5711 }
 0x207   : > { %v1512_v50 = vpop.f32.mrb[36].mxu1 }
 0x208   : > { %v1521_v25 = vadd.f32 %v1512_v50, %v1405_v30  ;;  %v6637_v44 = vpop.f32.mrb[37].mxu1 }
 0x209   : > { %v1515_v26 = vpop.f32.mrb[38].mxu1 }
 0x20a   : > { %v1524_v5 = vadd.f32 %v1515_v26, %v1408_v47  ;;  %v6638_v34 = vpop.f32.mrb[39].mxu1 }
 0x20b   : > { %v5710_v60 = vpop.permute.xlu0 %5709 }
 0x20c   : > { %6798 = vmatmul.mubr.msk.bf16.vlgmr.msra.gmra.mrb[144].mxu1 %vm409_vm3, %v8893_v27  ;;  %v8916_v18 = vsel %vm5717_vm2, %v5710_v60, %v8898_v51  ;;  %v4908_v60 = vsel %vm4905_vm7, %v8657_v12, %v8756_v43  ;;  %v8964_v12 = vld [vmem:[%s9256_s1 + $0x138] sm:$0xff]  }
 0x20d   : > { %6387 = vmatmul.mubr.msk.bf16.vlgmr.msra.gmra.mrb[0].mxu0 %vm409_vm3, %v8753_v57  ;;  %6802 = vmatpush3.bf16.msra.mxu1 %v4676_v59  ;;  %v8921_v57 = vld [vmem:[%s9256_s1 + $0x128] sm:$0xff]  }
 0x20e   : > { %4104 = vmatpush1.bf16.msra.mxu0 %v8415_v32  ;;  %6803 = vmatprep.mubr.msk.bf16.mxu1 %vm7329_vm0, %v7328_v15 }
 0x20f   : > { %4219 = vmatprep.subr.bf16.mxu0 %v8487_v2  ;;  %4135 = vmatprep.mubr.bf16.mxu0 %v7313_v10  ;;  %v1628_v24 = vpop.f32.mrb[40].mxu1  ;;  %v4792_v2 = vsel %vm4789_vm4, %v8623_v31, %v8746_v21  ;;  %v8941_v31 = vld [vmem:[%s9256_s1 + $0x130] sm:$0xff]  }
 0x210   : > { %6807 = vmatprep.subr.bf16.mxu1 %v7328_v15  ;;  %v1637_v32 = vadd.f32 %v1628_v24, %v1521_v25  ;;  %v6643_v30 = vpop.f32.mrb[41].mxu1  ;;  %v8927_v44 = vpop.permute.xlu0 %5827 }
 0x211   : > { %v1631_v47 = vpop.f32.mrb[42].mxu1 }
 0x212   : > { %v1640_v53 = vadd.f32 %v1631_v47, %v1524_v5  ;;  %v6644_v50 = vpop.f32.mrb[43].mxu1  ;;  %v8953_v47 = vsel %vm5485_vm13, %v8831_v33, %v8841_v41 }
 0x214   : > { %6804 = vmatmul.mubr.msk.bf16.vlgmr.msra.gmra.mrb[148].mxu1 %vm409_vm3, %v8921_v57 }
 0x215   : > { %6808 = vmatpush3.bf16.msra.mxu1 %v4792_v2  ;;  %6809 = vmatprep.mubr.msk.bf16.mxu1 %vm7329_vm0, %v7328_v15  ;;  %v5826_v25 = vpop.permute.xlu0 %5825 }
 0x216   : > { %6813 = vmatprep.subr.bf16.mxu1 %v7328_v15  ;;  %v8936_v59 = vsel %vm5833_vm5, %v5826_v25, %v8927_v44  ;;  %v5140_v25 = vsel %vm5137_vm6, %v8728_v63, %v8815_v55 }
 0x217   : > { %v1744_v26 = vpop.f32.mrb[44].mxu1 }
 0x218   : > { %v1753_v21 = vadd.f32 %v1744_v26, %v1637_v32  ;;  %v6649_v5 = vpop.f32.mrb[45].mxu1 }
 0x219   : > { %6392 = vmatmul.mubr.msk.bf16.vlgmr.msra.gmra.mrb[0].mxu0 %vm409_vm3, %v8777_v61  ;;  %v1747_v34 = vpop.f32.mrb[46].mxu1 }
 0x21a   : > { %4220 = vmatpush1.bf16.msra.mxu0 %v8450_v42  ;;  %4251 = vmatprep.mubr.bf16.mxu0 %v7313_v10  ;;  %v1756_v24 = vadd.f32 %v1747_v34, %v1640_v53  ;;  %v6650_v30 = vpop.f32.mrb[47].mxu1  ;;  %v8972_v53 = vsel %vm5601_vm15, %v8857_v48, %v8866_v35  ;;  %v8988_v48 = vld [vmem:[%s9256_s1 + $0x140] sm:$0xff]   ;;  %v9004_v34 = vld [vmem:[%s9256_s1 + $0x148] sm:$0xff]  }
 0x21b   : > { %4335 = vmatprep.subr.bf16.mxu0 %v8515_v0  ;;  %v5024_v0 = vsel %vm5021_vm8, %v8696_v19, %v8781_v28  ;;  %v8983_v28 = vpop.permute.xlu1 %5599 }
 0x21c   : > { %6810 = vmatmul.mubr.msk.bf16.vlgmr.msra.gmra.mrb[152].mxu1 %vm409_vm3, %v8941_v31 }
 0x21d   : > { %6814 = vmatpush3.bf16.msra.mxu1 %v4908_v60  ;;  %6815 = vmatprep.mubr.msk.bf16.mxu1 %vm7329_vm0, %v7328_v15 }
 0x21e   : > { %6819 = vmatprep.subr.bf16.mxu1 %v7328_v15 }
 0x21f   : > { %v1860_v42 = vpop.f32.mrb[48].mxu1 }
 0x220   : > { %v1869_v43 = vadd.f32 %v1860_v42, %v1753_v21  ;;  %v6655_v61 = vpop.f32.mrb[49].mxu1  ;;  %v8998_v21 = vpop.permute.xlu1 %5713 }
 0x221   : > { %v1863_v33 = vpop.f32.mrb[50].mxu1 }
 0x222   : > { %v1872_v32 = vadd.f32 %v1863_v33, %v1756_v24  ;;  %v6656_v2 = vpop.f32.mrb[51].mxu1  ;;  %v5256_v24 = vsel %vm5253_vm10, %v8767_v36, %v8822_v9  ;;  %v9029_v36 = vld [vmem:[%s9256_s1 + $0x150] sm:$0xff]   ;;  %v5372_v33 = vsel %vm5369_vm12, %v8800_v52, %v8854_v8  ;;  %v9053_v8 = vld [vmem:[%s9256_s1 + $0x158] sm:$0xff]  }
 0x224   : > { %6816 = vmatmul.mubr.msk.bf16.vlgmr.msra.gmra.mrb[156].mxu1 %vm409_vm3, %v8964_v12  ;;  %v9019_v61 = vpop.permute.xlu1 %5715 }
 0x225   : > { %6397 = vmatmul.mubr.msk.bf16.vlgmr.msra.gmra.mrb[0].mxu0 %vm409_vm3, %v8810_v14  ;;  %6820 = vmatpush3.bf16.msra.mxu1 %v5024_v0 }
 0x226   : > { %4336 = vmatpush1.bf16.msra.mxu0 %v8505_v4  ;;  %6821 = vmatprep.mubr.msk.bf16.mxu1 %vm7329_vm0, %v7328_v15 }
 0x227   : > { %4451 = vmatprep.subr.bf16.mxu0 %v8571_v22  ;;  %4367 = vmatprep.mubr.bf16.mxu0 %v7313_v10  ;;  %v1976_v19 = vpop.f32.mrb[52].mxu1 }
 0x228   : > { %6825 = vmatprep.subr.bf16.mxu1 %v7328_v15  ;;  %v1985_v14 = vadd.f32 %v1976_v19, %v1869_v43  ;;  %v6661_v50 = vpop.f32.mrb[53].mxu1  ;;  %v9016_v43 = vsel %vm5717_vm2, %v8898_v51, %v8998_v21  ;;  %v9031_v51 = vpop.permute.xlu1 %5829 }
 0x229   : > { %v1979_v4 = vpop.f32.mrb[54].mxu1  ;;  %v9039_v2 = vsel %vm5833_vm5, %v8927_v44, %v9031_v51 }
 0x22a   : > { %v1988_v22 = vadd.f32 %v1979_v4, %v1872_v32  ;;  %v6662_v26 = vpop.f32.mrb[55].mxu1 }
 0x22c   : > { %6822 = vmatmul.mubr.msk.bf16.vlgmr.msra.gmra.mrb[160].mxu1 %vm409_vm3, %v8988_v48  ;;  %v5832_v4 = vpop.permute.xlu1 %5831 }
 0x22d   : > { %6826 = vmatpush3.bf16.msra.mxu1 %v5140_v25  ;;  %6827 = vmatprep.mubr.msk.bf16.mxu1 %vm7329_vm0, %v7328_v15  ;;  %v6050_v25 = vld [vmem:[%s9257_s2 + $0x8] sm:$0xff] }
 0x22e   : > { %6831 = vmatprep.subr.bf16.mxu1 %v7328_v15  ;;  %6058 = vperm.xlu1 %7176, %v6050_v25  }
 0x22f   : > { %v2092_v5 = vpop.f32.mrb[56].mxu1 }
 0x230   : > { %v2101_v63 = vadd.f32 %v2092_v5, %v1985_v14  ;;  %v6667_v55 = vpop.f32.mrb[57].mxu1  ;;  %v9073_v5 = vld [vmem:[%s9256_s1 + $0x160] sm:$0xff]  }
 0x231   : > { %6402 = vmatmul.mubr.msk.bf16.vlgmr.msra.gmra.mrb[0].mxu0 %vm409_vm3, %v8838_v49  ;;  %v2095_v60 = vpop.f32.mrb[58].mxu1  ;;  %v5944_v55 = vpop.permute.xlu0 %5943 }
 0x232   : > { %4452 = vmatpush1.bf16.msra.mxu0 %v8537_v3  ;;  %4483 = vmatprep.mubr.bf16.mxu0 %v7313_v10  ;;  %v2104_v30 = vadd.f32 %v2095_v60, %v1988_v22  ;;  %v6668_v42 = vpop.f32.mrb[59].mxu1 }
 0x233   : > { %4567 = vmatprep.subr.bf16.mxu0 %v8594_v46 }
 0x234   : > { %6828 = vmatmul.mubr.msk.bf16.vlgmr.msra.gmra.mrb[164].mxu1 %vm409_vm3, %v9004_v34 }
 0x235   : > { %6832 = vmatpush3.bf16.msra.mxu1 %v5256_v24  ;;  %6833 = vmatprep.mubr.msk.bf16.mxu1 %vm7329_vm0, %v7328_v15 }
 0x236   : > { %6837 = vmatprep.subr.bf16.mxu1 %v7328_v15 }
 0x237   : > { %v2208_v3 = vpop.f32.mrb[60].mxu1 }
 0x238   : > { %v2217_v9 = vadd.f32 %v2208_v3, %v2101_v63  ;;  %v6673_v49 = vpop.f32.mrb[61].mxu1 }
 0x239   : > { %v2211_v46 = vpop.f32.mrb[62].mxu1 }
 0x23a   : > { %v2220_v0 = vadd.f32 %v2211_v46, %v2104_v30  ;;  %v6674_v32 = vpop.f32.mrb[63].mxu1  ;;  %v5604_v30 = vsel %vm5601_vm15, %v8866_v35, %v8983_v28 }
 0x23c   : > { %6834 = vmatmul.mubr.msk.bf16.vlgmr.msra.gmra.mrb[168].mxu1 %vm409_vm3, %v9029_v36 }
 0x23d   : > { %6407 = vmatmul.mubr.msk.bf16.vlgmr.msra.gmra.mrb[0].mxu0 %vm409_vm3, %v8862_v17  ;;  %6838 = vmatpush3.bf16.msra.mxu1 %v5372_v33  ;;  %v5720_v33 = vsel %vm5717_vm2, %v8998_v21, %v9019_v61  ;;  %v9114_v21 = vld [vmem:[%s9256_s1 + $0x170] sm:$0xff]  }
 0x23e   : > { %4568 = vmatpush1.bf16.msra.mxu0 %v8566_v54  ;;  %6839 = vmatprep.mubr.msk.bf16.mxu1 %vm7329_vm0, %v7328_v15  ;;  %v5488_v54 = vsel %vm5485_vm13, %v8841_v41, %v8888_v1  ;;  %v5946_v41 = vpop.permute.xlu1 %5945 }
 0x23f   : > { %v2324_v52 = vpop.f32.mrb[64].mxu1  ;;  %4683 = vmatprep.subr.bf16.mxu0 %v8652_v45  ;;  %4599 = vmatprep.mubr.bf16.mxu0 %v7313_v10  ;;  %v6049_v45 = vld [vmem:[%s9257_s2] sm:$0xff]  ;;  %v9083_v42 = vsel %vm5949_vm9, %v5944_v55, %v5946_v41 }
 0x240   : > { %v2333_v44 = vadd.f32 %v2324_v52, %v2217_v9  ;;  %v6679_v19 = vpop.f32.mrb[65].mxu1  ;;  %6843 = vmatprep.subr.bf16.mxu1 %v7328_v15  ;;  %6053 = vperm.xlu0 %7175, %v6049_v45   ;;  %v9097_v9 = vld [vmem:[%s9256_s1 + $0x168] sm:$0xff]  }
 0x241   : > { %v2327_v17 = vpop.f32.mrb[66].mxu1  ;;  %v5948_v19 = vpop.permute.xlu0 %5947 }
 0x242   : > { %v2336_v14 = vadd.f32 %v2327_v17, %v2220_v0  ;;  %v6680_v50 = vpop.f32.mrb[67].mxu1  ;;  %v5942_v3 = vpop.permute.xlu1 %5941  ;;  %v5952_v45 = vsel %vm5949_vm9, %v5946_v41, %v5948_v19 }
 0x244   : > { %6840 = vmatmul.mubr.msk.bf16.vlgmr.msra.gmra.mrb[172].mxu1 %vm409_vm3, %v9053_v8 }
 0x245   : > { %6844 = vmatpush3.bf16.msra.mxu1 %v5488_v54  ;;  %6845 = vmatprep.mubr.msk.bf16.mxu1 %vm7329_vm0, %v7328_v15 }
 0x246   : > { %6849 = vmatprep.subr.bf16.mxu1 %v7328_v15 }
 0x247   : > { %v2440_v1 = vpop.f32.mrb[68].mxu1 }
 0x248   : > { %v2449_v22 = vadd.f32 %v2440_v1, %v2333_v44  ;;  %v6685_v26 = vpop.f32.mrb[69].mxu1  ;;  %v5836_v44 = vsel %vm5833_vm5, %v9031_v51, %v5832_v4 }
 0x249   : > { %6412 = vmatmul.mubr.msk.bf16.vlgmr.msra.gmra.mrb[0].mxu0 %vm409_vm3, %v8893_v27  ;;  %v2443_v63 = vpop.f32.mrb[70].mxu1  ;;  %v9087_v27 = vsel %vm5949_vm9, %v5942_v3, %v5944_v55 }
 0x24a   : > { %4684 = vmatpush1.bf16.msra.mxu0 %v8600_v23  ;;  %v2452_v60 = vadd.f32 %v2443_v63, %v2336_v14  ;;  %v6686_v24 = vpop.f32.mrb[71].mxu1  ;;  %4715 = vmatprep.mubr.bf16.mxu0 %v7313_v10  ;;  %v9127_v14 = vld [vmem:[%s9256_s1 + $0x178] sm:$0xff]  }
 0x24b   : > { %4799 = vmatprep.subr.bf16.mxu0 %v8705_v16 }
 0x24c   : > { %6846 = vmatmul.mubr.msk.bf16.vlgmr.msra.gmra.mrb[176].mxu1 %vm409_vm3, %v9073_v5 }
 0x24d   : > { %6850 = vmatpush3.bf16.msra.mxu1 %v5604_v30  ;;  %6851 = vmatprep.mubr.msk.bf16.mxu1 %vm7329_vm0, %v7328_v15 }
 0x24e   : > { %6855 = vmatprep.subr.bf16.mxu1 %v7328_v15 }
 0x24f   : > { %v2556_v23 = vpop.f32.mrb[72].mxu1 }
 0x250   : > { %v2565_v35 = vadd.f32 %v2556_v23, %v2449_v22  ;;  %v6691_v28 = vpop.f32.mrb[73].mxu1 }
 0x251   : > { %v2559_v16 = vpop.f32.mrb[74].mxu1 }
 0x252   : > { %v2568_v49 = vadd.f32 %v2559_v16, %v2452_v60  ;;  %v6692_v46 = vpop.f32.mrb[75].mxu1 }
 0x254   : > { %6852 = vmatmul.mubr.msk.bf16.vlgmr.msra.gmra.mrb[180].mxu1 %vm409_vm3, %v9097_v9 }
 0x255   : > { %6417 = vmatmul.mubr.msk.bf16.vlgmr.msra.gmra.mrb[0].mxu0 %vm409_vm3, %v8921_v57  ;;  %6856 = vmatpush3.bf16.msra.mxu1 %v5720_v33 }
 0x256   : > { %4800 = vmatpush1.bf16.msra.mxu0 %v8628_v56  ;;  %6857 = vmatprep.mubr.msk.bf16.mxu1 %vm7329_vm0, %v7328_v15 }
 0x257   : > { %v2672_v0 = vpop.f32.mrb[76].mxu1  ;;  %4915 = vmatprep.subr.bf16.mxu0 %v8739_v38  ;;  %4831 = vmatprep.mubr.bf16.mxu0 %v7313_v10 }
 0x258   : > { %v2681_v32 = vadd.f32 %v2672_v0, %v2565_v35  ;;  %v6697_v52 = vpop.f32.mrb[77].mxu1  ;;  %6861 = vmatprep.subr.bf16.mxu1 %v7328_v15 }
 0x259   : > { %v2675_v57 = vpop.f32.mrb[78].mxu1 }
 0x25a   : > { %v2684_v61 = vadd.f32 %v2675_v57, %v2568_v49  ;;  %v6698_v56 = vpop.f32.mrb[79].mxu1 }
 0x25c   : > { %6858 = vmatmul.mubr.msk.bf16.vlgmr.msra.gmra.mrb[184].mxu1 %vm409_vm3, %v9114_v21 }
 0x25d   : > { %6862 = vmatpush3.bf16.msra.mxu1 %v5836_v44  ;;  %6863 = vmatprep.mubr.msk.bf16.mxu1 %vm7329_vm0, %v7328_v15 }
 0x25e   : > { %6867 = vmatprep.subr.bf16.mxu1 %v7328_v15 }
 0x25f   : > { %v2788_v38 = vpop.f32.mrb[80].mxu1 }
 0x260   : > { %v2797_v17 = vadd.f32 %v2788_v38, %v2681_v32  ;;  %v6703_v54 = vpop.f32.mrb[81].mxu1 }
 0x261   : > { %v2791_v50 = vpop.f32.mrb[82].mxu1  ;;  %6422 = vmatmul.mubr.msk.bf16.vlgmr.msra.gmra.mrb[0].mxu0 %vm409_vm3, %v8941_v31 }
 0x262   : > { %v2800_v51 = vadd.f32 %v2791_v50, %v2684_v61  ;;  %4916 = vmatpush1.bf16.msra.mxu0 %v8668_v37  ;;  %v6704_v4 = vpop.f32.mrb[83].mxu1  ;;  %4947 = vmatprep.mubr.bf16.mxu0 %v7313_v10  ;;  %v9142_v37 = vld [vmem:[%s9256_s1 + $0x180] sm:$0xff]  }
 0x263   : > { %5031 = vmatprep.subr.bf16.mxu0 %v8793_v39 }
 0x264   : > { %6864 = vmatmul.mubr.msk.bf16.vlgmr.msra.gmra.mrb[188].mxu1 %vm409_vm3, %v9127_v14 }
 0x265   : > { %6868 = vmatpush3.bf16.msra.mxu1 %v5952_v45  ;;  %6869 = vmatprep.mubr.msk.bf16.mxu1 %vm7329_vm0, %v7328_v15 }
 0x267   : > { %v2904_v25 = vpop.f32.mrb[84].mxu1 }
 0x268   : > { %v2913_v1 = vadd.f32 %v2904_v25, %v2797_v17  ;;  %v6709_v31 = vpop.f32.mrb[85].mxu1 }
 0x269   : > { %v2907_v41 = vpop.f32.mrb[86].mxu1 }
 0x26a   : > { %v2916_v22 = vadd.f32 %v2907_v41, %v2800_v51  ;;  %v6710_v26 = vpop.f32.mrb[87].mxu1 }
 0x26c   : > { %6870 = vmatmul.mubr.msk.bf16.vlgmr.msra.gmra.mrb[192].mxu1 %vm409_vm3, %v9142_v37 }
 0x26d   : > { %6427 = vmatmul.mubr.msk.bf16.vlgmr.msra.gmra.mrb[0].mxu0 %vm409_vm3, %v8964_v12 }
 0x26e   : > { %5032 = vmatpush1.bf16.msra.mxu0 %v8709_v11  ;;  %5063 = vmatprep.mubr.bf16.mxu0 %v7313_v10 }
 0x26f   : > { %v3020_v15 = vpop.f32.mrb[88].mxu1  ;;  %5147 = vmatprep.subr.bf16.mxu0 %v8820_v13 }
 0x270   : > { %v3029_v39 = vadd.f32 %v3020_v15, %v2913_v1  ;;  %v6715_v63 = vpop.f32.mrb[89].mxu1 }
 0x271   : > { %v3023_v55 = vpop.f32.mrb[90].mxu1 }
 0x272   : > { %v3032_v60 = vadd.f32 %v3023_v55, %v2916_v22  ;;  %v6716_v24 = vpop.f32.mrb[91].mxu1 }
 0x277   : > { %v3136_v30 = vpop.f32.mrb[92].mxu1 }
 0x278   : > { %v3145_v3 = vadd.f32 %v3136_v30, %v3029_v39  ;;  %v6721_v23 = vpop.f32.mrb[93].mxu1 }
 0x279   : > { %v3139_v35 = vpop.f32.mrb[94].mxu1  ;;  %6432 = vmatmul.mubr.msk.bf16.vlgmr.msra.gmra.mrb[0].mxu0 %vm409_vm3, %v8988_v48 }
 0x27a   : > { %v3148_v12 = vadd.f32 %v3139_v35, %v3032_v60  ;;  %5148 = vmatpush1.bf16.msra.mxu0 %v8734_v62  ;;  %v6722_v11 = vpop.f32.mrb[95].mxu1  ;;  %5179 = vmatprep.mubr.bf16.mxu0 %v7313_v10 }
 0x27b   : > { %5263 = vmatprep.subr.bf16.mxu0 %v8876_v20 }
 0x27f   : > { %v3252_v13 = vpop.f32.mrb[96].mxu1 }
 0x280   : > { %v3261_v28 = vadd.f32 %v3252_v13, %v3145_v3  ;;  %v6727_v16 = vpop.f32.mrb[97].mxu1 }
 0x281   : > { %v3255_v49 = vpop.f32.mrb[98].mxu1 }
 0x282   : > { %v3264_v46 = vadd.f32 %v3255_v49, %v3148_v12  ;;  %v6728_v33 = vpop.f32.mrb[99].mxu1 }
 0x285   : > { %6437 = vmatmul.mubr.msk.bf16.vlgmr.msra.gmra.mrb[0].mxu0 %vm409_vm3, %v9004_v34 }
 0x286   : > { %5264 = vmatpush1.bf16.msra.mxu0 %v8772_v58  ;;  %5295 = vmatprep.mubr.bf16.mxu0 %v7313_v10 }
 0x287   : > { %v3368_v48 = vpop.f32.mrb[100].mxu1  ;;  %5379 = vmatprep.subr.bf16.mxu0 %v8903_v40 }
 0x288   : > { %v3377_v62 = vadd.f32 %v3368_v48, %v3261_v28  ;;  %v6733_v0 = vpop.f32.mrb[101].mxu1 }
 0x289   : > { %v3371_v32 = vpop.f32.mrb[102].mxu1 }
 0x28a   : > { %v3380_v20 = vadd.f32 %v3371_v32, %v3264_v46  ;;  %v6734_v52 = vpop.f32.mrb[103].mxu1 }
 0x28f   : > { %v3484_v57 = vpop.f32.mrb[104].mxu1 }
 0x290   : > { %v3493_v61 = vadd.f32 %v3484_v57, %v3377_v62  ;;  %v6739_v56 = vpop.f32.mrb[105].mxu1 }
 0x291   : > { %v3487_v44 = vpop.f32.mrb[106].mxu1  ;;  %6442 = vmatmul.mubr.msk.bf16.vlgmr.msra.gmra.mrb[0].mxu0 %vm409_vm3, %v9029_v36 }
 0x292   : > { %v3496_v34 = vadd.f32 %v3487_v44, %v3380_v20  ;;  %5380 = vmatpush1.bf16.msra.mxu0 %v8805_v7  ;;  %v6740_v58 = vpop.f32.mrb[107].mxu1  ;;  %5411 = vmatprep.mubr.bf16.mxu0 %v7313_v10 }
 0x293   : > { %5495 = vmatprep.subr.bf16.mxu0 %v8953_v47 }
 0x297   : > { %v3600_v40 = vpop.f32.mrb[108].mxu1 }
 0x298   : > { %v3609_v38 = vadd.f32 %v3600_v40, %v3493_v61  ;;  %v6745_v19 = vpop.f32.mrb[109].mxu1 }
 0x299   : > { %v3603_v17 = vpop.f32.mrb[110].mxu1 }
 0x29a   : > { %v3612_v54 = vadd.f32 %v3603_v17, %v3496_v34  ;;  %v6746_v50 = vpop.f32.mrb[111].mxu1 }
 0x29d   : > { %6447 = vmatmul.mubr.msk.bf16.vlgmr.msra.gmra.mrb[0].mxu0 %vm409_vm3, %v9053_v8 }
 0x29e   : > { %5496 = vmatpush1.bf16.msra.mxu0 %v8848_v6  ;;  %5527 = vmatprep.mubr.bf16.mxu0 %v7313_v10 }
 0x29f   : > { %v3716_v36 = vpop.f32.mrb[112].mxu1  ;;  %5611 = vmatprep.subr.bf16.mxu0 %v8972_v53 }
 0x2a0   : > { %v3725_v7 = vadd.f32 %v3716_v36, %v3609_v38  ;;  %v6751_v51 = vpop.f32.mrb[113].mxu1 }
 0x2a1   : > { %v3719_v4 = vpop.f32.mrb[114].mxu1 }
 0x2a2   : > { %v3728_v47 = vadd.f32 %v3719_v4, %v3612_v54  ;;  %v6752_v45 = vpop.f32.mrb[115].mxu1 }
 0x2a7   : > { %v3832_v25 = vpop.f32.mrb[116].mxu1 }
 0x2a8   : > { %v3841_v1 = vadd.f32 %v3832_v25, %v3725_v7  ;;  %v6757_v31 = vpop.f32.mrb[117].mxu1 }
 0x2a9   : > { %v3835_v41 = vpop.f32.mrb[118].mxu1  ;;  %6452 = vmatmul.mubr.msk.bf16.vlgmr.msra.gmra.mrb[0].mxu0 %vm409_vm3, %v9073_v5 }
 0x2aa   : > { %v3844_v8 = vadd.f32 %v3835_v41, %v3728_v47  ;;  %5612 = vmatpush1.bf16.msra.mxu0 %v8881_v29  ;;  %v6758_v6 = vpop.f32.mrb[119].mxu1  ;;  %5643 = vmatprep.mubr.bf16.mxu0 %v7313_v10 }
 0x2ab   : > { %5727 = vmatprep.subr.bf16.mxu0 %v9016_v43 }
 0x2af   : > { %v3948_v53 = vpop.f32.mrb[120].mxu1 }
 0x2b0   : > { %v3957_v22 = vadd.f32 %v3948_v53, %v3841_v1  ;;  %v6763_v26 = vpop.f32.mrb[121].mxu1 }
 0x2b1   : > { %v3951_v15 = vpop.f32.mrb[122].mxu1 }
 0x2b2   : > { %v3960_v39 = vadd.f32 %v3951_v15, %v3844_v8  ;;  %v6764_v63 = vpop.f32.mrb[123].mxu1 }
 0x2b5   : > { %6457 = vmatmul.mubr.msk.bf16.vlgmr.msra.gmra.mrb[0].mxu0 %vm409_vm3, %v9097_v9 }
 0x2b6   : > { %5728 = vmatpush1.bf16.msra.mxu0 %v8916_v18  ;;  %5759 = vmatprep.mubr.bf16.mxu0 %v7313_v10 }
 0x2b7   : > { %v4064_v5 = vpop.f32.mrb[124].mxu1  ;;  %5843 = vmatprep.subr.bf16.mxu0 %v9039_v2 }
 0x2b8   : > { %v4073_v29 = vadd.f32 %v4064_v5, %v3957_v22  ;;  %v6769_v55 = vpop.f32.mrb[125].mxu1 }
 0x2b9   : > { %v4067_v60 = vpop.f32.mrb[126].mxu1 }
 0x2ba   : > { %v4076_v43 = vadd.f32 %v4067_v60, %v3960_v39  ;;  %v6770_v24 = vpop.f32.mrb[127].mxu1 }
 0x2bf   : > { %v4180_v30 = vpop.f32.mrb[128].mxu1 }
 0x2c0   : > { %v4189_v3 = vadd.f32 %v4180_v30, %v4073_v29  ;;  %v6775_v23 = vpop.f32.mrb[129].mxu1 }
 0x2c1   : > { %v4183_v35 = vpop.f32.mrb[130].mxu1  ;;  %6462 = vmatmul.mubr.msk.bf16.vlgmr.msra.gmra.mrb[0].mxu0 %vm409_vm3, %v9114_v21 }
 0x2c2   : > { %v4192_v9 = vadd.f32 %v4183_v35, %v4076_v43  ;;  %5844 = vmatpush1.bf16.msra.mxu0 %v8936_v59  ;;  %v6776_v18 = vpop.f32.mrb[131].mxu1  ;;  %5875 = vmatprep.mubr.bf16.mxu0 %v7313_v10 }
 0x2c3   : > { %5959 = vmatprep.subr.bf16.mxu0 %v9083_v42 }
 0x2c7   : > { %v4296_v2 = vpop.f32.mrb[132].mxu1 }
 0x2c8   : > { %v4305_v12 = vadd.f32 %v4296_v2, %v4189_v3  ;;  %v6781_v11 = vpop.f32.mrb[133].mxu1 }
 0x2c9   : > { %v4299_v13 = vpop.f32.mrb[134].mxu1 }
 0x2ca   : > { %v4308_v28 = vadd.f32 %v4299_v13, %v4192_v9  ;;  %v6782_v16 = vpop.f32.mrb[135].mxu1 }
 0x2cd   : > { %6467 = vmatmul.mubr.msk.bf16.vlgmr.msra.gmra.mrb[0].mxu0 %vm409_vm3, %v9127_v14 }
 0x2ce   : > { %5960 = vmatpush1.bf16.msra.mxu0 %v9087_v27  ;;  %5991 = vmatprep.mubr.bf16.mxu0 %v7313_v10 }
 0x2cf   : > { %v4412_v21 = vpop.f32.mrb[136].mxu1 }
 0x2d0   : > { %v4421_v59 = vadd.f32 %v4412_v21, %v4305_v12  ;;  %v6787_v49 = vpop.f32.mrb[137].mxu1 }
 0x2d1   : > { %v4415_v46 = vpop.f32.mrb[138].mxu1 }
 0x2d2   : > { %v4424_v33 = vadd.f32 %v4415_v46, %v4308_v28  ;;  %v6788_v48 = vpop.f32.mrb[139].mxu1 }
 0x2d7   : > { %v4528_v42 = vpop.f32.mrb[140].mxu1 }
 0x2d8   : > { %v4537_v62 = vadd.f32 %v4528_v42, %v4421_v59  ;;  %v6793_v0 = vpop.f32.mrb[141].mxu1 }
 0x2d9   : > { %v4531_v32 = vpop.f32.mrb[142].mxu1  ;;  %6472 = vmatmul.mubr.msk.bf16.vlgmr.msra.gmra.mrb[0].mxu0 %vm409_vm3, %v9142_v37 }
 0x2da   : > { %v4540_v20 = vadd.f32 %v4531_v32, %v4424_v33  ;;  %v6794_v52 = vpop.f32.mrb[143].mxu1 }
 0x2df   : > { %v4644_v14 = vpop.f32.mrb[144].mxu1 }
 0x2e0   : > { %v4653_v57 = vadd.f32 %v4644_v14, %v4537_v62  ;;  %v6799_v27 = vpop.f32.mrb[145].mxu1 }
 0x2e1   : > { %v4647_v61 = vpop.f32.mrb[146].mxu1 }
 0x2e2   : > { %v4656_v10 = vadd.f32 %v4647_v61, %v4540_v20  ;;  %v6800_v56 = vpop.f32.mrb[147].mxu1 }
 0x2e7   : > { %v4760_v44 = vpop.f32.mrb[148].mxu1 }
 0x2e8   : > { %v4769_v34 = vadd.f32 %v4760_v44, %v4653_v57  ;;  %v6805_v58 = vpop.f32.mrb[149].mxu1 }
 0x2e9   : > { %v4763_v40 = vpop.f32.mrb[150].mxu1 }
 0x2ea   : > { %v4772_v38 = vadd.f32 %v4763_v40, %v4656_v10  ;;  %v6806_v19 = vpop.f32.mrb[151].mxu1  ;;  %v6054_v40 = vpop.permute.xlu0 %6053 }
 0x2ef   : > { %v4876_v17 = vpop.f32.mrb[152].mxu1 }
 0x2f0   : > { %v4885_v54 = vadd.f32 %v4876_v17, %v4769_v34  ;;  %v6811_v50 = vpop.f32.mrb[153].mxu1 }
 0x2f1   : > { %v4879_v36 = vpop.f32.mrb[154].mxu1 }
 0x2f2   : > { %v4888_v7 = vadd.f32 %v4879_v36, %v4772_v38  ;;  %v6812_v37 = vpop.f32.mrb[155].mxu1 }
 0x2f7   : > { %v4992_v51 = vpop.f32.mrb[156].mxu1 }
 0x2f8   : > { %v5001_v4 = vadd.f32 %v4992_v51, %v4885_v54  ;;  %v6817_v47 = vpop.f32.mrb[157].mxu1  ;;  %v6059_v54 = vpop.permute.xlu1 %6058 }
 0x2f9   : > { %v4995_v45 = vpop.f32.mrb[158].mxu1 }
 0x2fa   : > { %v5004_v25 = vadd.f32 %v4995_v45, %v4888_v7  ;;  %v6818_v1 = vpop.f32.mrb[159].mxu1 }
 0x2ff   : > { %v5108_v31 = vpop.f32.mrb[160].mxu1 }
 0x300   : > { %v5117_v41 = vadd.f32 %v5108_v31, %v5001_v4  ;;  %v6823_v8 = vpop.f32.mrb[161].mxu1 }
 0x301   : > { %v5111_v6 = vpop.f32.mrb[162].mxu1 }
 0x302   : > { %v5120_v53 = vadd.f32 %v5111_v6, %v5004_v25  ;;  %v6824_v22 = vpop.f32.mrb[163].mxu1 }
 0x307   : > { %v5224_v26 = vpop.f32.mrb[164].mxu1 }
 0x308   : > { %v5233_v15 = vadd.f32 %v5224_v26, %v5117_v41  ;;  %v6829_v39 = vpop.f32.mrb[165].mxu1 }
 0x309   : > { %v5227_v63 = vpop.f32.mrb[166].mxu1 }
 0x30a   : > { %v5236_v5 = vadd.f32 %v5227_v63, %v5120_v53  ;;  %v6830_v29 = vpop.f32.mrb[167].mxu1 }
 0x30f   : > { %v5340_v55 = vpop.f32.mrb[168].mxu1 }
 0x310   : > { %v5349_v60 = vadd.f32 %v5340_v55, %v5233_v15  ;;  %v6835_v43 = vpop.f32.mrb[169].mxu1 }
 0x311   : > { %v5343_v24 = vpop.f32.mrb[170].mxu1 }
 0x312   : > { %v5352_v30 = vadd.f32 %v5343_v24, %v5236_v5  ;;  %v6836_v3 = vpop.f32.mrb[171].mxu1 }
 0x317   : > { %v5456_v23 = vpop.f32.mrb[172].mxu1 }
 0x318   : > { %v5465_v35 = vadd.f32 %v5456_v23, %v5349_v60  ;;  %v6841_v9 = vpop.f32.mrb[173].mxu1 }
 0x319   : > { %v5459_v18 = vpop.f32.mrb[174].mxu1 }
 0x31a   : > { %v5468_v2 = vadd.f32 %v5459_v18, %v5352_v30  ;;  %v6842_v12 = vpop.f32.mrb[175].mxu1 }
 0x31f   : > { %v5572_v11 = vpop.f32.mrb[176].mxu1 }
 0x320   : > { %v5581_v13 = vadd.f32 %v5572_v11, %v5465_v35  ;;  %v6847_v28 = vpop.f32.mrb[177].mxu1 }
 0x321   : > { %v5575_v16 = vpop.f32.mrb[178].mxu1 }
 0x322   : > { %v5584_v21 = vadd.f32 %v5575_v16, %v5468_v2  ;;  %v6848_v59 = vpop.f32.mrb[179].mxu1 }
 0x327   : > { %v5688_v49 = vpop.f32.mrb[180].mxu1 }
 0x328   : > { %v5697_v46 = vadd.f32 %v5688_v49, %v5581_v13  ;;  %v6853_v33 = vpop.f32.mrb[181].mxu1 }
 0x329   : > { %v5691_v48 = vpop.f32.mrb[182].mxu1 }
 0x32a   : > { %v5700_v42 = vadd.f32 %v5691_v48, %v5584_v21  ;;  %v6854_v62 = vpop.f32.mrb[183].mxu1 }
 0x32f   : > { %v5804_v0 = vpop.f32.mrb[184].mxu1 }
 0x330   : > { %v5813_v32 = vadd.f32 %v5804_v0, %v5697_v46  ;;  %v6859_v20 = vpop.f32.mrb[185].mxu1 }
 0x331   : > { %v5807_v52 = vpop.f32.mrb[186].mxu1 }
 0x332   : > { %v5816_v14 = vadd.f32 %v5807_v52, %v5700_v42  ;;  %v6860_v57 = vpop.f32.mrb[187].mxu1 }
 0x337   : > { %v5920_v27 = vpop.f32.mrb[188].mxu1 }
 0x338   : > { %v5929_v61 = vadd.f32 %v5920_v27, %v5813_v32  ;;  %v6865_v10 = vpop.f32.mrb[189].mxu1 }
 0x339   : > { %v5923_v56 = vpop.f32.mrb[190].mxu1 }
 0x33a   : > { %v5932_v44 = vadd.f32 %v5923_v56, %v5816_v14  ;;  %v6866_v34 = vpop.f32.mrb[191].mxu1 }
 0x33f   : > { %v6036_v58 = vpop.f32.mrb[192].mxu1 }
 0x340   : > { %v6045_v38 = vadd.f32 %v6036_v58, %v5929_v61  ;;  %v6871_v19 = vpop.f32.mrb[193].mxu1 }
 0x341   : > { %v6039_v17 = vpop.f32.mrb[194].mxu1 }
 0x342   : > { %v6063_v50 = vadd.f32 %v6054_v40, %v6045_v38  ;;  %v6048_v36 = vadd.f32 %v6039_v17, %v5932_v44  ;;  %v6872_v7 = vpop.f32.mrb[195].mxu1 }
 0x344   : > { %6069 = vst [vmem:[%s7449_s5 + $0x10] sm:$0xff] %v6063_v50  ;;  %v6066_v37 = vadd.f32 %v6059_v54, %v6048_v36 }
 0x346   : > { %6072 = vst [vmem:[%s7449_s5 + $0x28] sm:$0xff] %v6066_v37 }
 0x3ac   : > { %v5993_v51 = vpop.f32.mrb[0].mxu0 }
 0x3ad   : > { %v6061_v4 = vadd.f32 %v6054_v40, %v5993_v51  ;;  %v5995_v47 = vpop.f32.mrb[1].mxu0 }
 0x3ae   : > { %v6062_v45 = vadd.f32 %v6054_v40, %v5995_v47  ;;  %v5997_v25 = vpop.f32.mrb[2].mxu0 }
 0x3af   : > { %6067 = vst [vmem:[%s7449_s5] sm:$0xff] %v6061_v4  ;;  %v6064_v1 = vadd.f32 %v6059_v54, %v5997_v25  ;;  %v5999_v31 = vpop.f32.mrb[3].mxu0 }
 0x3b0   : > { %6068 = vst [vmem:[%s7449_s5 + $0x8] sm:$0xff] %v6062_v45  ;;  %v6065_v41 = vadd.f32 %v6059_v54, %v5999_v31 }
 0x3b1   : > { %6070 = vst [vmem:[%s7449_s5 + $0x18] sm:$0xff] %v6064_v1 }
 0x3b2   : > { %6071 = vst [vmem:[%s7449_s5 + $0x20] sm:$0xff] %v6065_v41 }
 0x3b3   : > { %7244 = shalt.err (!%p7241_p3)
}
 0x3b4   : > { %s7245_s5 = scalar_lea.hbm %s9200_s4, 768  ;;  %s7249_s6 = scalar_lea.hbm %s9258_s3, 1536 }
 0x3b5   : > { %p7246_p5 = scmp.ne.s32.totalorder %s9200_s4, %s7245_s5  ;;  %p7250_p9 = scmp.lt.u32.totalorder %s9200_s4, %s9258_s3 }
 0x3b6   : > { %p7251_p10 = scmp.lt.u32.totalorder %s7249_s6, %s7245_s5  ;;  %p7253_p12 = scmp.lt.u32.totalorder %s7245_s5, %s9200_s4 }
 0x3b7   : > { %p7247_p6 = pnand %p7246_p5, %p7427_p4 }
 0x3b8   : > { %p7252_p11 = por %p7251_p10, %p7250_p9 }
 0x3b9   : > { %p7248_p7 = pneg %p7247_p6 }
 0x3ba   : > { %p7254_p13 = por %p7253_p12, %p7252_p11 }
 0x3bc   : > { %p7255_p0 = pnand %p7254_p13, %p7248_p7 }
 0x3be   : > { %7258 = shalt.err (!%p7255_p0)
}
 0x3bf   : > { %s7365_s18 = smov 384   ;;  %s7366_s11 = smov 24  }
 0x3c0   : > { %7067 = dma.vmem_to_hbm [thread:$0]  (%p7427_p4), %s9202_s10, 768, %s9200_s4, %s9209_s23, %s7365_s18, %s7365_s18, %s7366_s11  }
 0x3c1 PF: > { %p7073_p1 = scmp.ge.s32.totalorder %s7311_s17, 2  ;;  %s6104_s30 = sand.u32 1, %s7291_s12  }
 0x3c2   : > { %s6105_s8 = scalar_lea.sflag [#allocation5], %s6104_s30 }
 0x3c3   : > { %p7070_p2 = pnand %p7073_p1, %p7434_p8 }
 0x3c5   : > { %7286 = dma.done.wait (!%p7070_p2), %s6105_s8, 768  }
 0x3c6   : > { %7288 = vsyncadd (!%p7070_p2), %s6105_s8, 4294966528  ;;  %s16_s17 = sadd.s32 1, %s7311_s17   ;;  %s9267_s12 = smov %s7295_s13 }
 0x3c7   : > { %p13_p3 = scmp.ge.s32.totalorder %s16_s17, 4   ;;  %s9268_s13 = smov %s7299_s14 }
 0x3c8   : > { %s9269_s14 = smov %s7440_s25  ;;  %s9270_s15 = smov %s7307_s16 }
 0x3c9   : > { %s9271_s16 = smov %s9273_s20  ;;  %15 = sbr.rel (!%p13_p3) target bundleno = 4 (0x4), region = 225 }
 0x3d0   :  { %6110 = vsyncpa [#allocation5], 1 }
 0x3d1   :  { %6112 = vsyncpa [#allocation5 + $0x1], 1 }
 0x3d2   :  { %6113 = vsyncmov [#allocation3] }
 0x3d5   :  { %s6114_s22 = vpop.sfrf %6113 }
 0x3d6   :  { %p6477_p4 = scmp.ne.s32.totalorder %s6114_s22, 0 }
 0x3d8   :  { %6118 = shalt.err (%p6477_p4)  }
 0x3d9   :  { %6120 = vsyncmov [#allocation3 + $0x1] }
 0x3dc   :  { %s6121_s24 = vpop.sfrf %6120 }
 0x3dd   :  { %p6478_p8 = scmp.ne.s32.totalorder %s6121_s24, 0 }
 0x3df   :  { %6125 = shalt.err (%p6478_p8)  }

</bundles_post_ra>
